<compile_context>
chip_gen: v5e
topology: v5e:2x2
jax: 0.10.0
libtpu: 0.0.40
codegen_flags: <defaults>
</compile_context>

<pallas_src>
import jax
import jax.numpy as jnp
import numpy as np
from jax import lax
from jax.experimental import pallas as pl
from jax.experimental.pallas import tpu as pltpu

L = 128        # chunk length (lanes; matches the 128-wide v5e MXU, fine on v6e/v7x)
R_MAX = 1024   # rows (= (batch, chunk) pairs) per grid step -> 512 KiB x / 512 KiB out tiles


def _round_up(n, m):
    return ((n + m - 1) // m) * m


# ---------------------------------------------------------------------------
# 1) one-off coefficient MLP (depends only on params, not on the signal)
# ---------------------------------------------------------------------------
def _coeff_mlp_kernel(tv_ref, bias_ref, w1_ref, b1_ref, w2_ref, b2_ref,
                      w3_ref, b3_ref, w4_ref, b4_ref, ag_ref):
    h = tv_ref[...] + bias_ref[...]                                                          # (1, 1024)
    h = jnp.sin(jnp.dot(h, w1_ref[...], preferred_element_type=jnp.float32) + b1_ref[...])   # (1, 512)
    h = jnp.sin(jnp.dot(h, w2_ref[...], preferred_element_type=jnp.float32) + b2_ref[...])   # (1, 256)
    h = jnp.sin(jnp.dot(h, w3_ref[...], preferred_element_type=jnp.float32) + b3_ref[...])   # (1, 128)
    ag_ref[...] = jnp.tanh(
        jnp.dot(h, w4_ref[...], preferred_element_type=jnp.float32) + b4_ref[...])           # (1, 2)


def coeff_mlp(params):
    p = params
    ag = pl.pallas_call(
        _coeff_mlp_kernel,
        out_shape=jax.ShapeDtypeStruct((1, 2), jnp.float32),
    )(p["tv"], p["bias"], p["w1t"], p["b1"], p["w2t"], p["b2"],
      p["w3t"], p["b3"], p["w4t"], p["b4"])
    return ag[0, 0], ag[0, 1]


# ---------------------------------------------------------------------------
# 2) blocked-scan coefficient matrices (tiny, one-off, built in the wrapper)
# ---------------------------------------------------------------------------
def _filter_matrices(a, g):
    c1 = a + g
    c2 = 1.0 + a * g
    inv_c2 = 1.0 / c2                    # hoisted reciprocal: no divides inside the kernel
    A = -c1 * inv_c2                     # state_t = A*state_{t-1} + Bc*x_t
    Bc = (c2 * c2 - c1 * c1) * inv_c2

    # A^0 .. A^L via cumprod (robust for negative A); |A| < 1 since a,g come from tanh
    pows = jnp.concatenate([jnp.ones((1,), jnp.float32),
                            jnp.cumprod(jnp.full((L,), A, dtype=jnp.float32))])   # (L+1,)

    idx = jnp.arange(L)
    diff = idx[None, :] - idx[:, None] - 1                          # (L, L): i - j - 1
    # T[j, i] = c1/c2 (j==i) ; (Bc/c2)*A^(i-1-j) (j<i) ; 0 (j>i)
    T_off = jnp.where(diff >= 0, jnp.take(pows, jnp.clip(diff, 0, L)), 0.0)
    T = inv_c2 * Bc * T_off + (inv_c2 * c1) * jnp.eye(L, dtype=jnp.float32)        # (L, L)

    apow = (inv_c2 * pows[:L])[None, :]                             # (1, L) carry -> out
    w = Bc * pows[:L][::-1]                                         # (L,)   x -> carry-after-chunk
    aL = pows[L]                                                    # scalar carry -> carry (A^L)
    return T, apow, w, aL


# ---------------------------------------------------------------------------
# 3) the bulk kernel: fully parallel rows, one tall MXU matmul + broadcast FMA
# ---------------------------------------------------------------------------
def _allpass_apply_kernel(x_ref, s0_ref, t_ref, apow_ref, out_ref):
    # rows = independent (batch, chunk) pairs, cols = time within the chunk
    y = jnp.dot(x_ref[...], t_ref[...], preferred_element_type=jnp.float32)   # (R, L)
    out_ref[...] = y + s0_ref[...] * apow_ref[...]                            # + carry term


# ---------------------------------------------------------------------------
# forward pass (matches AllPass1stOrder_W.forward)
# ---------------------------------------------------------------------------
@jax.jit
def allpass_forward(params, x):
    """x: (B, S, 1) float32 -> (B, S, 1) float32."""
    B, S, _ = x.shape

    a, g = coeff_mlp(params)
    T, apow, w, aL = _filter_matrices(a, g)

    # (B, S) layout, trailing zero padding to a whole number of L-chunks (causal => safe)
    x2 = x[..., 0].astype(jnp.float32)
    nC = -(-S // L)
    Sp = nC * L
    if Sp != S:
        x2 = jnp.pad(x2, ((0, 0), (0, Sp - S)))
    x3 = x2.reshape(B, nC, L)

    # Per-chunk carry injections + prefix scan (tiny: B x S/128 values, done in XLA).
    d = jnp.einsum("bcl,l->bc", x3, w)                              # (B, nC)
    aL_full = jnp.full_like(d, aL)

    def _combine(lo, hi):
        a1, b1 = lo
        a2, b2 = hi
        return a1 * a2, b1 * a2 + b2

    _, s_after = lax.associative_scan(_combine, (aL_full, d), axis=1)
    s0 = jnp.concatenate([jnp.zeros((B, 1), jnp.float32),
                          s_after[:, :-1]], axis=1)                 # carry at chunk start

    # Flatten (batch, chunk) -> rows; every row is now independent of every other row.
    n_rows = B * nC
    R = min(R_MAX, _round_up(n_rows, 8))
    n_pad = _round_up(n_rows, R)
    x_rows = x3.reshape(n_rows, L)
    s0_rows = s0.reshape(n_rows, 1)
    if n_pad != n_rows:
        x_rows = jnp.pad(x_rows, ((0, n_pad - n_rows), (0, 0)))
        s0_rows = jnp.pad(s0_rows, ((0, n_pad - n_rows), (0, 0)))

    out_rows = pl.pallas_call(
        _allpass_apply_kernel,
        grid=(n_pad // R,),
        in_specs=[
            pl.BlockSpec((R, L), lambda i: (i, 0)),     # x rows
            pl.BlockSpec((R, 1), lambda i: (i, 0)),     # per-row starting carry
            pl.BlockSpec((L, L), lambda i: (0, 0)),     # T (constant block, loaded once)
            pl.BlockSpec((1, L), lambda i: (0, 0)),     # apow (constant block)
        ],
        out_specs=pl.BlockSpec((R, L), lambda i: (i, 0)),
        out_shape=jax.ShapeDtypeStruct((n_pad, L), jnp.float32),
        compiler_params=pltpu.CompilerParams(dimension_semantics=("parallel",)),
    )(x_rows, s0_rows, T, apow)

    out = out_rows[:n_rows].reshape(B, Sp)[:, :S]
    return out[..., None]


# ---------------------------------------------------------------------------
# pure-JAX reference (sequential, mirrors the PyTorch module exactly)
# ---------------------------------------------------------------------------
def allpass_reference(params, x):
    p = params
    h = p["tv"] + p["bias"]
    h = jnp.sin(h @ p["w1t"] + p["b1"])
    h = jnp.sin(h @ p["w2t"] + p["b2"])
    h = jnp.sin(h @ p["w3t"] + p["b3"])
    h = jnp.tanh(h @ p["w4t"] + p["b4"])
    a, g = h[0, 0], h[0, 1]
    c1, c2 = a + g, 1.0 + a * g

    def step(state, xt):
        out = (c1 * xt + state) / c2
        state = c2 * xt - c1 * out
        return state, out

    x_sb = jnp.transpose(x[..., 0])                                 # (S, B)
    _, out_sb = lax.scan(step, jnp.zeros((x.shape[0],), jnp.float32), x_sb)
    return jnp.transpose(out_sb)[..., None]                         # (B, S, 1)


# ---------------------------------------------------------------------------
# deterministic init mimicking the PyTorch module's __init__
# ---------------------------------------------------------------------------
def init_params(key):
    ks = jax.random.split(key, 9)

    def linear(kw, kb, fan_in, fan_out):
        bound = 1.0 / (fan_in ** 0.5)
        wgt = jax.random.uniform(kw, (fan_out, fan_in), jnp.float32, -bound, bound)
        b = jax.random.uniform(kb, (fan_out,), jnp.float32, -bound, bound)
        return wgt, b

    w1, b1 = linear(ks[0], ks[1], 1024, 512)
    w2, b2 = linear(ks[2], ks[3], 512, 256)
    w3, b3 = linear(ks[4], ks[5], 256, 128)
    w4, b4 = linear(ks[6], ks[7], 128, 2)

    tv = jnp.zeros((1, 1024), jnp.float32)                          # trainable_vector (zeros)
    bias = jax.random.uniform(ks[8], (1, 1024), jnp.float32)        # torch.rand(1024)

    return dict(
        tv=tv, bias=bias,
        w1t=jnp.transpose(w1), b1=b1[None, :],
        w2t=jnp.transpose(w2), b2=b2[None, :],
        w3t=jnp.transpose(w3), b3=b3[None, :],
        w4t=jnp.transpose(w4), b4=b4[None, :],
    )


if __name__ == "__main__":
    key = jax.random.PRNGKey(0)
    pkey, xkey = jax.random.split(key)

    params = init_params(pkey)

    B, S = 2, 8                                  # batch=2, seq=8, feature=1
    x = jax.random.normal(xkey, (B, S, 1), jnp.float32)

    out = allpass_forward(params, x)
    jax.block_until_ready(out)
    assert out.shape == (B, S, 1) and out.dtype == jnp.float32

    # validate the blocked-scan reformulation against the sequential reference
    ref = allpass_reference(params, x)
    np.testing.assert_allclose(np.asarray(out), np.asarray(ref), rtol=2e-2, atol=2e-2)

    print("KERNEL_OK")
</pallas_src>

<mosaic_0001>
module attributes {stable_mosaic.version = 11 : i64} {
  func.func @_coeff_mlp_kernel(%arg0: memref<1x1024xf32, #tpu.memory_space<vmem>>, %arg1: memref<1x1024xf32, #tpu.memory_space<vmem>>, %arg2: memref<1024x512xf32, #tpu.memory_space<vmem>>, %arg3: memref<1x512xf32, #tpu.memory_space<vmem>>, %arg4: memref<512x256xf32, #tpu.memory_space<vmem>>, %arg5: memref<1x256xf32, #tpu.memory_space<vmem>>, %arg6: memref<256x128xf32, #tpu.memory_space<vmem>>, %arg7: memref<1x128xf32, #tpu.memory_space<vmem>>, %arg8: memref<128x2xf32, #tpu.memory_space<vmem>>, %arg9: memref<1x2xf32, #tpu.memory_space<vmem>>, %arg10: memref<1x2xf32, #tpu.memory_space<vmem>>) attributes {dimension_semantics = [], scalar_prefetch = 0 : i64, scratch_operands = 0 : i64, tpu.core_type = #tpu.core_type<tc>} {
    %c0 = arith.constant 0 : index
    %c0_0 = arith.constant 0 : index
    %0 = vector.load %arg0[%c0, %c0_0] : memref<1x1024xf32, #tpu.memory_space<vmem>>, vector<1x1024xf32>
    %c0_1 = arith.constant 0 : index
    %c0_2 = arith.constant 0 : index
    %1 = vector.load %arg1[%c0_1, %c0_2] : memref<1x1024xf32, #tpu.memory_space<vmem>>, vector<1x1024xf32>
    %2 = arith.addf %0, %1 : vector<1x1024xf32>
    %c0_3 = arith.constant 0 : index
    %c0_4 = arith.constant 0 : index
    %3 = vector.load %arg2[%c0_3, %c0_4] : memref<1024x512xf32, #tpu.memory_space<vmem>>, vector<1024x512xf32>
    %cst = arith.constant dense<0.000000e+00> : vector<1x512xf32>
    %4 = tpu.matmul %2, %3, %cst {dimension_numbers = #tpu.dot_dimension_numbers<[1], [0], [0], [1], [0, 0, 1, 1], [], []>} : vector<1x1024xf32>, vector<1024x512xf32>, vector<1x512xf32> -> vector<1x512xf32>
    %c0_5 = arith.constant 0 : index
    %c0_6 = arith.constant 0 : index
    %5 = vector.load %arg3[%c0_5, %c0_6] : memref<1x512xf32, #tpu.memory_space<vmem>>, vector<1x512xf32>
    %6 = arith.addf %4, %5 : vector<1x512xf32>
    %7 = math.sin %6 : vector<1x512xf32>
    %c0_7 = arith.constant 0 : index
    %c0_8 = arith.constant 0 : index
    %8 = vector.load %arg4[%c0_7, %c0_8] : memref<512x256xf32, #tpu.memory_space<vmem>>, vector<512x256xf32>
    %cst_9 = arith.constant dense<0.000000e+00> : vector<1x256xf32>
    %9 = tpu.matmul %7, %8, %cst_9 {dimension_numbers = #tpu.dot_dimension_numbers<[1], [0], [0], [1], [0, 0, 1, 1], [], []>} : vector<1x512xf32>, vector<512x256xf32>, vector<1x256xf32> -> vector<1x256xf32>
    %c0_10 = arith.constant 0 : index
    %c0_11 = arith.constant 0 : index
    %10 = vector.load %arg5[%c0_10, %c0_11] : memref<1x256xf32, #tpu.memory_space<vmem>>, vector<1x256xf32>
    %11 = arith.addf %9, %10 : vector<1x256xf32>
    %12 = math.sin %11 : vector<1x256xf32>
    %c0_12 = arith.constant 0 : index
    %c0_13 = arith.constant 0 : index
    %13 = vector.load %arg6[%c0_12, %c0_13] : memref<256x128xf32, #tpu.memory_space<vmem>>, vector<256x128xf32>
    %cst_14 = arith.constant dense<0.000000e+00> : vector<1x128xf32>
    %14 = tpu.matmul %12, %13, %cst_14 {dimension_numbers = #tpu.dot_dimension_numbers<[1], [0], [0], [1], [0, 0, 1, 1], [], []>} : vector<1x256xf32>, vector<256x128xf32>, vector<1x128xf32> -> vector<1x128xf32>
    %c0_15 = arith.constant 0 : index
    %c0_16 = arith.constant 0 : index
    %15 = vector.load %arg7[%c0_15, %c0_16] : memref<1x128xf32, #tpu.memory_space<vmem>>, vector<1x128xf32>
    %16 = arith.addf %14, %15 : vector<1x128xf32>
    %17 = math.sin %16 : vector<1x128xf32>
    %c0_17 = arith.constant 0 : index
    %c0_18 = arith.constant 0 : index
    %18 = vector.load %arg8[%c0_17, %c0_18] : memref<128x2xf32, #tpu.memory_space<vmem>>, vector<128x2xf32>
    %cst_19 = arith.constant dense<0.000000e+00> : vector<1x2xf32>
    %19 = tpu.matmul %17, %18, %cst_19 {dimension_numbers = #tpu.dot_dimension_numbers<[1], [0], [0], [1], [0, 0, 1, 1], [], []>} : vector<1x128xf32>, vector<128x2xf32>, vector<1x2xf32> -> vector<1x2xf32>
    %c0_20 = arith.constant 0 : index
    %c0_21 = arith.constant 0 : index
    %20 = vector.load %arg9[%c0_20, %c0_21] : memref<1x2xf32, #tpu.memory_space<vmem>>, vector<1x2xf32>
    %21 = arith.addf %19, %20 : vector<1x2xf32>
    %22 = math.tanh %21 : vector<1x2xf32>
    %c0_22 = arith.constant 0 : index
    %c0_23 = arith.constant 0 : index
    %23 = vector.load %arg10[%c0_22, %c0_23] : memref<1x2xf32, #tpu.memory_space<vmem>>, vector<1x2xf32>
    tpu.vector_store %arg10[%c0_22, %c0_23], %22 {strides = array<i32>} : memref<1x2xf32, #tpu.memory_space<vmem>>, vector<1x2xf32>,
    return
  }
}

module attributes {stable_mosaic.version = 11 : i64} {
  func.func @_allpass_apply_kernel(%arg0: i32, %arg1: memref<8x128xf32, #tpu.memory_space<vmem>>, %arg2: memref<8x1xf32, #tpu.memory_space<vmem>>, %arg3: memref<128x128xf32, #tpu.memory_space<vmem>>, %arg4: memref<1x128xf32, #tpu.memory_space<vmem>>, %arg5: memref<8x128xf32, #tpu.memory_space<vmem>>) attributes {dimension_semantics = [#tpu.dimension_semantics<parallel>], iteration_bounds = array<i64: 1>, scalar_prefetch = 0 : i64, scratch_operands = 0 : i64, tpu.core_type = #tpu.core_type<tc>, window_params = [{transform_indices = @transform_0, window_bounds = array<i64: 8, 128>}, {transform_indices = @transform_1, window_bounds = array<i64: 8, 1>}, {pipeline_mode = #tpu.pipeline_mode<synchronous>, transform_indices = @transform_2, window_bounds = array<i64: 128, 128>}, {pipeline_mode = #tpu.pipeline_mode<synchronous>, transform_indices = @transform_3, window_bounds = array<i64: 1, 128>}, {transform_indices = @transform_4, window_bounds = array<i64: 8, 128>}]} {
    %c0 = arith.constant 0 : index
    %c0_0 = arith.constant 0 : index
    %0 = vector.load %arg1[%c0, %c0_0] : memref<8x128xf32, #tpu.memory_space<vmem>>, vector<8x128xf32>
    %c0_1 = arith.constant 0 : index
    %c0_2 = arith.constant 0 : index
    %1 = vector.load %arg3[%c0_1, %c0_2] : memref<128x128xf32, #tpu.memory_space<vmem>>, vector<128x128xf32>
    %cst = arith.constant dense<0.000000e+00> : vector<8x128xf32>
    %2 = tpu.matmul %0, %1, %cst {dimension_numbers = #tpu.dot_dimension_numbers<[1], [0], [0], [1], [0, 0, 1, 1], [], []>} : vector<8x128xf32>, vector<128x128xf32>, vector<8x128xf32> -> vector<8x128xf32>
    %c0_3 = arith.constant 0 : index
    %c0_4 = arith.constant 0 : index
    %3 = vector.load %arg2[%c0_3, %c0_4] : memref<8x1xf32, #tpu.memory_space<vmem>>, vector<8x1xf32>
    %c0_5 = arith.constant 0 : index
    %c0_6 = arith.constant 0 : index
    %4 = vector.load %arg4[%c0_5, %c0_6] : memref<1x128xf32, #tpu.memory_space<vmem>>, vector<1x128xf32>
    %5 = vector.broadcast %3 : vector<8x1xf32> to vector<8x128xf32>
    %6 = vector.broadcast %4 : vector<1x128xf32> to vector<8x128xf32>
    %7 = arith.mulf %5, %6 : vector<8x128xf32>
    %8 = arith.addf %2, %7 : vector<8x128xf32>
    %c0_7 = arith.constant 0 : index
    %c0_8 = arith.constant 0 : index
    %9 = vector.load %arg5[%c0_7, %c0_8] : memref<8x128xf32, #tpu.memory_space<vmem>>, vector<8x128xf32>
    tpu.vector_store %arg5[%c0_7, %c0_8], %8 {strides = array<i32>} : memref<8x128xf32, #tpu.memory_space<vmem>>, vector<8x128xf32>,
    return
  }
  func.func @transform_0(%arg0: i32) -> (i32, i32) {
    %c0_i32 = arith.constant 0 : i32
    %c0_i32_0 = arith.constant 0 : i32
    return %arg0, %c0_i32 : i32, i32
  }
  func.func @transform_1(%arg0: i32) -> (i32, i32) {
    %c0_i32 = arith.constant 0 : i32
    %c0_i32_0 = arith.constant 0 : i32
    return %arg0, %c0_i32 : i32, i32
  }
  func.func @transform_2(%arg0: i32) -> (i32, i32) {
    %c0_i32 = arith.constant 0 : i32
    %c0_i32_0 = arith.constant 0 : i32
    %c0_i32_1 = arith.constant 0 : i32
    return %c0_i32, %c0_i32_0 : i32, i32
  }
  func.func @transform_3(%arg0: i32) -> (i32, i32) {
    %c0_i32 = arith.constant 0 : i32
    %c0_i32_0 = arith.constant 0 : i32
    %c0_i32_1 = arith.constant 0 : i32
    return %c0_i32, %c0_i32_0 : i32, i32
  }
  func.func @transform_4(%arg0: i32) -> (i32, i32) {
    %c0_i32 = arith.constant 0 : i32
    %c0_i32_0 = arith.constant 0 : i32
    return %arg0, %c0_i32 : i32, i32
  }
}

</mosaic_0001>

<bundles_post_ra>
// kernel: allpass_forward.3
= control target key start
LH: loop header
LB: loop body
LE: loop exit
PB: predicated region body
PF: predicated region fallthrough
CT: control target
= control target key end

     0   :  { %v73_v2 = vmov 0   ;;  %s159_s2 = inlined_call_operand.vmem [shape: f32[128,128], index: 2, kind: input, shape index: {}]   ;;  %s160_s1 = inlined_call_operand.vmem [shape: f32[8,1], index: 1, kind: input, shape index: {}]   ;;  %s161_s3 = inlined_call_operand.vmem [shape: f32[1,128], index: 3, kind: input, shape index: {}]   ;;  %s162_s0 = inlined_call_operand.vmem [shape: f32[8,128], index: 0, kind: input, shape index: {}]   ;;  %s163_s4 = inlined_call_operand.vmem [shape: f32[8,128], index: 4, kind: output, shape index: {}]  }
   0x1   :  { %v33_v0 = vld [vmem:[%s159_s2 + $0x78] sm:$0xff]  ;;  %v32_v1 = vld [vmem:[%s159_s2 + $0x70] sm:$0xff]  ;;  %71 = vset.pattern.permute.xlu0 %v73_v2  ;;  %v31_v3 = vld [vmem:[%s159_s2 + $0x68] sm:$0xff] }
   0x2   :  { %45 = vmatpush.msra.mxu0 %v33_v0  ;;  %v30_v4 = vld [vmem:[%s159_s2 + $0x60] sm:$0xff]  ;;  %v29_v6 = vld [vmem:[%s159_s2 + $0x58] sm:$0xff]  ;;  %v28_v7 = vld [vmem:[%s159_s2 + $0x50] sm:$0xff] }
   0x3   :  { %v34_v5 = vld [vmem:[%s160_s1] sm:$0xff]  ;;  %v27_v8 = vld [vmem:[%s159_s2 + $0x48] sm:$0xff]  ;;  %v25_v10 = vld [vmem:[%s159_s2 + $0x38] sm:$0xff] }
   0x4   :  { %46 = vmatpush.msra.mxu0 %v32_v1  ;;  %38 = vperm.xlu0 %71, %v34_v5   ;;  %v26_v9 = vld [vmem:[%s159_s2 + $0x40] sm:$0xff]  ;;  %v24_v11 = vld [vmem:[%s159_s2 + $0x30] sm:$0xff]  ;;  %v23_v12 = vld [vmem:[%s159_s2 + $0x28] sm:$0xff] }
   0x5   :  { %v22_v13 = vld [vmem:[%s159_s2 + $0x20] sm:$0xff]  ;;  %v21_v14 = vld [vmem:[%s159_s2 + $0x18] sm:$0xff]  ;;  %v20_v15 = vld [vmem:[%s159_s2 + $0x10] sm:$0xff] }
   0x6   :  { %47 = vmatpush.msra.mxu0 %v31_v3  ;;  %v19_v16 = vld [vmem:[%s159_s2 + $0x8] sm:$0xff]  ;;  %v18_v17 = vld [vmem:[%s159_s2] sm:$0xff] }
   0x7   :  { %v17_v18 = vld [vmem:[%s162_s0] sm:$0xff] }
   0x8   :  { %48 = vmatpush.msra.mxu0 %v30_v4  ;;  %v72_v19 = vld [vmem:[%s161_s3] ss:$0 sm:$0xff] }
   0xa   :  { %49 = vmatpush.msra.mxu0 %v29_v6 }
   0xc   :  { %50 = vmatpush.msra.mxu0 %v28_v7 }
   0xe   :  { %51 = vmatpush.msra.mxu0 %v27_v8 }
  0x10   :  { %52 = vmatpush.msra.mxu0 %v26_v9 }
  0x12   :  { %53 = vmatpush.msra.mxu0 %v25_v10 }
  0x14   :  { %54 = vmatpush.msra.mxu0 %v24_v11 }
  0x16   :  { %55 = vmatpush.msra.mxu0 %v23_v12 }
  0x18   :  { %56 = vmatpush.msra.mxu0 %v22_v13 }
  0x1a   :  { %57 = vmatpush.msra.mxu0 %v21_v14 }
  0x1c   :  { %58 = vmatpush.msra.mxu0 %v20_v15 }
  0x1e   :  { %59 = vmatpush.msra.mxu0 %v19_v16 }
  0x20   :  { %60 = vmatpush.msra.mxu0 %v18_v17 }
  0x21   :  { %61 = vmatmul.f32.vlgmr.msra.gmra.mxu0 %v17_v18 }
  0x76   :  { %v39_v20 = vpop.permute.xlu0 %38 }
  0x77   :  { %v44_v21 = vmul.f32 %v72_v19, %v39_v20 }
  0x9e   :  { %v62_v22 = vpop.f32.mrf.mxu0 }
  0x9f   :  { %v63_v23 = vadd.f32 %v62_v22, %v44_v21 }
  0xa1   :  { %65 = vst [vmem:[%s163_s4] sm:$0xff] %v63_v23 }

// kernel: allpass_forward.2
= control target key start
LH: loop header
LB: loop body
LE: loop exit
PB: predicated region body
PF: predicated region fallthrough
CT: control target
= control target key end

     0   :  { %15 = vsyncpa [#allocation3], 0  ;;  %s4139_s0 = inlined_call_operand.hbm [shape: f32[1,1024], index: 0, kind: input, shape index: {}]   ;;  %s4140_s1 = inlined_call_operand.hbm [shape: f32[1,1024], index: 1, kind: input, shape index: {}]   ;;  %s4141_s2 = inlined_call_operand.hbm [shape: f32[1024,512], index: 2, kind: input, shape index: {}]   ;;  %s4142_s3 = inlined_call_operand.hbm [shape: f32[1,512], index: 3, kind: input, shape index: {}]   ;;  %s4143_s4 = inlined_call_operand.hbm [shape: f32[512,256], index: 4, kind: input, shape index: {}]   ;;  %s4144_s5 = inlined_call_operand.hbm [shape: f32[1,256], index: 5, kind: input, shape index: {}]   ;;  %s4145_s6 = inlined_call_operand.hbm [shape: f32[256,128], index: 6, kind: input, shape index: {}]   ;;  %s4146_s7 = inlined_call_operand.hbm [shape: f32[1,128], index: 7, kind: input, shape index: {}]   ;;  %s4147_s8 = inlined_call_operand.vmem [shape: f32[128,2], index: 8, kind: input, shape index: {}]   ;;  %s4148_s9 = inlined_call_operand.hbm [shape: f32[1,2], index: 9, kind: input, shape index: {}]   ;;  %s4149_s10 = inlined_call_operand.vmem [shape: f32[1,2], index: 10, kind: output, shape index: {}]  }
   0x1   :  { %16 = vsyncpa [#allocation5], 0 }
   0x2   :  { %17 = vsyncpa [#allocation8], 0 }
   0x3   :  { %18 = vsyncpa [#allocation11], 0  ;;  %s36_s15 = sshll.u32 %s4140_s1, 4  ;;  %s37_s15 = int_to_ptr.hbm [resolvable:$true] %s36_s15 }
   0x4   :  { %19 = vsyncpa [#allocation14], 0  ;;  %s3118_s16 = smov [#allocation4]   ;;  %s60_s20 = sshll.u32 %s4142_s3, 4  ;;  %s61_s20 = int_to_ptr.hbm [resolvable:$true] %s60_s20 }
   0x5   :  { %s38_s17 = sshll.u32 %s3118_s16, 4  ;;  %s3119_s21 = smov [#allocation7]   ;;  %s39_s17 = int_to_ptr.vmem [resolvable:$true] %s38_s17 }
   0x6   :  { %41 = dma.hbm_to_vmem [thread:$0]  %s37_s15, 128, %s39_s17, [#allocation5]  }
   0x7   :  { %s62_s22 = sshll.u32 %s3119_s21, 4  ;;  %s84_s25 = sshll.u32 %s4144_s5, 4  ;;  %s63_s22 = int_to_ptr.vmem [resolvable:$true] %s62_s22  ;;  %s85_s25 = int_to_ptr.hbm [resolvable:$true] %s84_s25 }
   0x8   :  { %65 = dma.hbm_to_vmem [thread:$0]  %s61_s20, 64, %s63_s22, [#allocation8]  }
   0x9   :  { %s108_s27 = sshll.u32 %s4146_s7, 4  ;;  %s3120_s28 = smov [#allocation10]   ;;  %s109_s27 = int_to_ptr.hbm [resolvable:$true] %s108_s27 }
   0xa   :  { %s86_s29 = sshll.u32 %s3120_s28, 4  ;;  %s3121_s3 = smov [#allocation13]   ;;  %s87_s29 = int_to_ptr.vmem [resolvable:$true] %s86_s29 }
   0xb   :  { %89 = dma.hbm_to_vmem [thread:$0]  %s85_s25, 32, %s87_s29, [#allocation11]  }
   0xc   :  { %s110_s30 = sshll.u32 %s3121_s3, 4  ;;  %s25_s13 = sshll.u32 %s4139_s0, 4  ;;  %s111_s30 = int_to_ptr.vmem [resolvable:$true] %s110_s30  ;;  %s26_s13 = int_to_ptr.hbm [resolvable:$true] %s25_s13 }
   0xd   :  { %113 = dma.hbm_to_vmem [thread:$0]  %s109_s27, 16, %s111_s30, [#allocation14]  }
   0xe   :  { %s46_s15 = sshll.u32 %s4141_s2, 4  ;;  %s3122_s16 = smov [#allocation2]   ;;  %s47_s15 = int_to_ptr.hbm [resolvable:$true] %s46_s15 }
   0xf   :  { %s27_s7 = sshll.u32 %s3122_s16, 4  ;;  %s3123_s17 = smov [#allocation6]   ;;  %s28_s7 = int_to_ptr.vmem [resolvable:$true] %s27_s7 }
  0x10   :  { %30 = dma.hbm_to_vmem [thread:$0]  %s26_s13, 128, %s28_s7, [#allocation3]  }
  0x11   :  { %s48_s18 = sshll.u32 %s3123_s17, 4  ;;  %s3124_s19 = smov 512   ;;  %s49_s18 = int_to_ptr.vmem [resolvable:$true] %s48_s18 }
  0x12   :  { %s3125_s20 = smov 32   ;;  %s70_s22 = sshll.u32 %s4143_s4, 4  ;;  %s71_s22 = int_to_ptr.hbm [resolvable:$true] %s70_s22 }
  0x13   :  { %54 = dma.hbm_to_vmem [thread:$0]  %s47_s15, 65536, %s49_s18, [#allocation5], %s3124_s19, %s3124_s19, %s3125_s20  }
  0x14   :  { %s3126_s23 = smov [#allocation9]   ;;  %s94_s1 = sshll.u32 %s4145_s6, 4  ;;  %s95_s1 = int_to_ptr.hbm [resolvable:$true] %s94_s1 }
  0x15   :  { %s72_s24 = sshll.u32 %s3126_s23, 4  ;;  %s3127_s26 = smov 256   ;;  %s73_s24 = int_to_ptr.vmem [resolvable:$true] %s72_s24 }
  0x16   :  { %s3128_s27 = smov 16   ;;  %s3129_s28 = smov [#allocation12]  }
  0x17   :  { %78 = dma.hbm_to_vmem [thread:$0]  %s71_s22, 16384, %s73_s24, [#allocation8], %s3127_s26, %s3127_s26, %s3128_s27  }
  0x18   :  { %s96_s29 = sshll.u32 %s3129_s28, 4  ;;  %s3130_s3 = smov 128   ;;  %s97_s29 = int_to_ptr.vmem [resolvable:$true] %s96_s29 }
  0x19   :  { %s3131_s30 = smov 8   ;;  %s121_s12 = sshll.u32 %s4148_s9, 4  ;;  %s122_s12 = int_to_ptr.hbm [resolvable:$true] %s121_s12 }
  0x1a   :  { %102 = dma.hbm_to_vmem [thread:$0]  %s95_s1, 4096, %s97_s29, [#allocation11], %s3130_s3, %s3130_s3, %s3131_s30  }
  0x1b   :  { %s3132_s13 = smov [#allocation15]  }
  0x1c   :  { %s123_s5 = sshll.u32 %s3132_s13, 4  ;;  %s124_s5 = int_to_ptr.vmem [resolvable:$true] %s123_s5 }
  0x1d   :  { %126 = dma.hbm_to_vmem [thread:$0]  %s122_s12, 16, %s124_s5, [#allocation14]  }
  0x1e   :  { %3108 = dma.done.wait [#allocation3], 128  }
  0x1f   :  { %3109 = vsyncadd [#allocation3], 4294967168 }
  0x20   :  { %3110 = dma.done.wait [#allocation5], 65664  }
  0x21   :  { %3111 = vsyncadd [#allocation5], 4294901632 }
  0x22   :  { %3112 = dma.done.wait [#allocation8], 16448  }
  0x23   :  { %3113 = vsyncadd [#allocation8], 4294950848 }
  0x24   :  { %3114 = dma.done.wait [#allocation11], 4128  }
  0x25   :  { %3115 = vsyncadd [#allocation11], 4294963168 }
  0x26   :  { %3116 = dma.done.wait [#allocation14], 32  }
  0x27   :  { %3117 = vsyncadd [#allocation14], 4294967264  ;;  %v226_v0 = vld [vmem:[#allocation6 + $0x1e0] sm:$0xff] }
  0x28   :  { %v354_v1 = vld [vmem:[#allocation6 + $0x5e0] sm:$0xff]  ;;  %705 = vmatpush.msra.mxu0 %v226_v0 }
  0x29   :  { %v222_v2 = vld [vmem:[#allocation6 + $0x1c0] sm:$0xff]  ;;  %745 = vmatpush.msra.mxu2 %v354_v1 }
  0x2a   :  { %v350_v3 = vld [vmem:[#allocation6 + $0x5c0] sm:$0xff]  ;;  %706 = vmatpush.msra.mxu0 %v222_v2 }
  0x2b   :  { %v418_v4 = vld [vmem:[#allocation6 + $0x7e0] sm:$0xff]  ;;  %746 = vmatpush.msra.mxu2 %v350_v3 }
  0x2c   :  { %v218_v5 = vld [vmem:[#allocation6 + $0x1a0] sm:$0xff]  ;;  %765 = vmatpush.msra.mxu3 %v418_v4 }
  0x2d   :  { %v290_v6 = vld [vmem:[#allocation6 + $0x3e0] sm:$0xff]  ;;  %707 = vmatpush.msra.mxu0 %v218_v5 }
  0x2e   :  { %v346_v7 = vld [vmem:[#allocation6 + $0x5a0] sm:$0xff]  ;;  %725 = vmatpush.msra.mxu1 %v290_v6 }
  0x2f   :  { %v414_v8 = vld [vmem:[#allocation6 + $0x7c0] sm:$0xff]  ;;  %747 = vmatpush.msra.mxu2 %v346_v7 }
  0x30   :  { %v286_v9 = vld [vmem:[#allocation6 + $0x3c0] sm:$0xff]  ;;  %766 = vmatpush.msra.mxu3 %v414_v8 }
  0x31   :  { %v214_v10 = vld [vmem:[#allocation6 + $0x180] sm:$0xff]  ;;  %726 = vmatpush.msra.mxu1 %v286_v9 }
  0x32   :  { %v342_v11 = vld [vmem:[#allocation6 + $0x580] sm:$0xff]  ;;  %708 = vmatpush.msra.mxu0 %v214_v10 }
  0x33   :  { %v410_v12 = vld [vmem:[#allocation6 + $0x7a0] sm:$0xff]  ;;  %748 = vmatpush.msra.mxu2 %v342_v11 }
  0x34   :  { %v282_v13 = vld [vmem:[#allocation6 + $0x3a0] sm:$0xff]  ;;  %767 = vmatpush.msra.mxu3 %v410_v12 }
  0x35   :  { %v406_v14 = vld [vmem:[#allocation6 + $0x780] sm:$0xff]  ;;  %727 = vmatpush.msra.mxu1 %v282_v13 }
  0x36   :  { %v210_v15 = vld [vmem:[#allocation6 + $0x160] sm:$0xff]  ;;  %768 = vmatpush.msra.mxu3 %v406_v14 }
  0x37   :  { %v338_v16 = vld [vmem:[#allocation6 + $0x560] sm:$0xff]  ;;  %709 = vmatpush.msra.mxu0 %v210_v15 }
  0x38   :  { %v278_v17 = vld [vmem:[#allocation6 + $0x380] sm:$0xff]  ;;  %749 = vmatpush.msra.mxu2 %v338_v16 }
  0x39   :  { %v402_v18 = vld [vmem:[#allocation6 + $0x760] sm:$0xff]  ;;  %728 = vmatpush.msra.mxu1 %v278_v17 }
  0x3a   :  { %v206_v19 = vld [vmem:[#allocation6 + $0x140] sm:$0xff]  ;;  %769 = vmatpush.msra.mxu3 %v402_v18 }
  0x3b   :  { %v334_v20 = vld [vmem:[#allocation6 + $0x540] sm:$0xff]  ;;  %710 = vmatpush.msra.mxu0 %v206_v19 }
  0x3c   :  { %v274_v21 = vld [vmem:[#allocation6 + $0x360] sm:$0xff]  ;;  %750 = vmatpush.msra.mxu2 %v334_v20 }
  0x3d   :  { %v398_v22 = vld [vmem:[#allocation6 + $0x740] sm:$0xff]  ;;  %729 = vmatpush.msra.mxu1 %v274_v21 }
  0x3e   :  { %v202_v23 = vld [vmem:[#allocation6 + $0x120] sm:$0xff]  ;;  %770 = vmatpush.msra.mxu3 %v398_v22 }
  0x3f   :  { %v330_v24 = vld [vmem:[#allocation6 + $0x520] sm:$0xff]  ;;  %711 = vmatpush.msra.mxu0 %v202_v23 }
  0x40   :  { %v270_v25 = vld [vmem:[#allocation6 + $0x340] sm:$0xff]  ;;  %751 = vmatpush.msra.mxu2 %v330_v24 }
  0x41   :  { %v394_v26 = vld [vmem:[#allocation6 + $0x720] sm:$0xff]  ;;  %730 = vmatpush.msra.mxu1 %v270_v25 }
  0x42   :  { %v198_v27 = vld [vmem:[#allocation6 + $0x100] sm:$0xff]  ;;  %771 = vmatpush.msra.mxu3 %v394_v26 }
  0x43   :  { %v326_v28 = vld [vmem:[#allocation6 + $0x500] sm:$0xff]  ;;  %712 = vmatpush.msra.mxu0 %v198_v27 }
  0x44   :  { %v266_v29 = vld [vmem:[#allocation6 + $0x320] sm:$0xff]  ;;  %752 = vmatpush.msra.mxu2 %v326_v28 }
  0x45   :  { %v390_v30 = vld [vmem:[#allocation6 + $0x700] sm:$0xff]  ;;  %731 = vmatpush.msra.mxu1 %v266_v29 }
  0x46   :  { %v194_v31 = vld [vmem:[#allocation6 + $0xe0] sm:$0xff]  ;;  %772 = vmatpush.msra.mxu3 %v390_v30 }
  0x47   :  { %v322_v32 = vld [vmem:[#allocation6 + $0x4e0] sm:$0xff]  ;;  %713 = vmatpush.msra.mxu0 %v194_v31  ;;  %v163_v31 = vld [vmem:[#allocation2] sm:$0xff] }
  0x48   :  { %v262_v33 = vld [vmem:[#allocation6 + $0x300] sm:$0xff]  ;;  %753 = vmatpush.msra.mxu2 %v322_v32  ;;  %v164_v32 = vld [vmem:[#allocation4] sm:$0xff] }
  0x49   :  { %v386_v34 = vld [vmem:[#allocation6 + $0x6e0] sm:$0xff]  ;;  %732 = vmatpush.msra.mxu1 %v262_v33 }
  0x4a   :  { %v190_v35 = vld [vmem:[#allocation6 + $0xc0] sm:$0xff]  ;;  %773 = vmatpush.msra.mxu3 %v386_v34 }
  0x4b   :  { %v318_v36 = vld [vmem:[#allocation6 + $0x4c0] sm:$0xff]  ;;  %714 = vmatpush.msra.mxu0 %v190_v35 }
  0x4c   :  { %v258_v37 = vld [vmem:[#allocation6 + $0x2e0] sm:$0xff]  ;;  %754 = vmatpush.msra.mxu2 %v318_v36 }
  0x4d   :  { %v382_v38 = vld [vmem:[#allocation6 + $0x6c0] sm:$0xff]  ;;  %733 = vmatpush.msra.mxu1 %v258_v37 }
  0x4e   :  { %v186_v39 = vld [vmem:[#allocation6 + $0xa0] sm:$0xff]  ;;  %774 = vmatpush.msra.mxu3 %v382_v38 }
  0x4f   :  { %v314_v40 = vld [vmem:[#allocation6 + $0x4a0] sm:$0xff]  ;;  %715 = vmatpush.msra.mxu0 %v186_v39  ;;  %v3222_v39 = vadd.f32 %v164_v32, %v163_v31  ;;  %v403_v31 = vld [vmem:[#allocation6 + $0x768] sm:$0xff] }
  0x50   :  { %v254_v41 = vld [vmem:[#allocation6 + $0x2c0] sm:$0xff]  ;;  %755 = vmatpush.msra.mxu2 %v314_v40  ;;  %v203_v32 = vld [vmem:[#allocation6 + $0x128] sm:$0xff] }
  0x51   :  { %v378_v42 = vld [vmem:[#allocation6 + $0x6a0] sm:$0xff]  ;;  %734 = vmatpush.msra.mxu1 %v254_v41 }
  0x52   :  { %v182_v43 = vld [vmem:[#allocation6 + $0x80] sm:$0xff]  ;;  %775 = vmatpush.msra.mxu3 %v378_v42 }
  0x53   :  { %v310_v44 = vld [vmem:[#allocation6 + $0x480] sm:$0xff]  ;;  %716 = vmatpush.msra.mxu0 %v182_v43 }
  0x54   :  { %v250_v45 = vld [vmem:[#allocation6 + $0x2a0] sm:$0xff]  ;;  %756 = vmatpush.msra.mxu2 %v310_v44 }
  0x55   :  { %v374_v46 = vld [vmem:[#allocation6 + $0x680] sm:$0xff]  ;;  %735 = vmatpush.msra.mxu1 %v250_v45 }
  0x56   :  { %v178_v47 = vld [vmem:[#allocation6 + $0x60] sm:$0xff]  ;;  %776 = vmatpush.msra.mxu3 %v374_v46 }
  0x57   :  { %v306_v48 = vld [vmem:[#allocation6 + $0x460] sm:$0xff]  ;;  %717 = vmatpush.msra.mxu0 %v178_v47 }
  0x58   :  { %v246_v49 = vld [vmem:[#allocation6 + $0x280] sm:$0xff]  ;;  %757 = vmatpush.msra.mxu2 %v306_v48  ;;  %v3225_v48 = vperm.slane %v3222_v39, 2 }
  0x59   :  { %v370_v50 = vld [vmem:[#allocation6 + $0x660] sm:$0xff]  ;;  %736 = vmatpush.msra.mxu1 %v246_v49 }
  0x5a   :  { %v174_v51 = vld [vmem:[#allocation6 + $0x40] sm:$0xff]  ;;  %777 = vmatpush.msra.mxu3 %v370_v50 }
  0x5b   :  { %v302_v52 = vld [vmem:[#allocation6 + $0x440] sm:$0xff]  ;;  %718 = vmatpush.msra.mxu0 %v174_v51 }
  0x5c   :  { %v242_v53 = vld [vmem:[#allocation6 + $0x260] sm:$0xff]  ;;  %758 = vmatpush.msra.mxu2 %v302_v52  ;;  %v3228_v52 = vperm.slane %v3222_v39, 0 }
  0x5d   :  { %v366_v54 = vld [vmem:[#allocation6 + $0x640] sm:$0xff]  ;;  %737 = vmatpush.msra.mxu1 %v242_v53 }
  0x5e   :  { %v170_v55 = vld [vmem:[#allocation6 + $0x20] sm:$0xff]  ;;  %778 = vmatpush.msra.mxu3 %v366_v54  ;;  %v3231_v54 = vperm.slane %v3222_v39, 3 }
  0x5f   :  { %v298_v56 = vld [vmem:[#allocation6 + $0x420] sm:$0xff]  ;;  %719 = vmatpush.msra.mxu0 %v170_v55 }
  0x60   :  { %v238_v57 = vld [vmem:[#allocation6 + $0x240] sm:$0xff]  ;;  %759 = vmatpush.msra.mxu2 %v298_v56 }
  0x61   :  { %v362_v58 = vld [vmem:[#allocation6 + $0x620] sm:$0xff]  ;;  %738 = vmatpush.msra.mxu1 %v238_v57 }
  0x62   :  { %v166_v59 = vld [vmem:[#allocation6] sm:$0xff]  ;;  %779 = vmatpush.msra.mxu3 %v362_v58  ;;  %v3235_v58 = vperm.slane %v3222_v39, 1 }
  0x63   :  { %v294_v60 = vld [vmem:[#allocation6 + $0x400] sm:$0xff]  ;;  %720 = vmatpush.msra.mxu0 %v166_v59 }
  0x64   :  { %v482_v61 = vld [vmem:[#allocation6 + $0x9e0] sm:$0xff]  ;;  %760 = vmatpush.msra.mxu2 %v294_v60  ;;  %721 = vmatmul.f32.vlgmr.msra.gmra.mxu0 %v3228_v52 }
  0x65   :  { %v610_v62 = vld [vmem:[#allocation6 + $0xde0] sm:$0xff]  ;;  %785 = vmatpush.msrb.mxu0 %v482_v61  ;;  %761 = vmatmul.f32.vlgmr.msra.gmra.mxu2 %v3225_v48 }
  0x66   :  { %v234_v63 = vld [vmem:[#allocation6 + $0x220] sm:$0xff]  ;;  %825 = vmatpush.msrb.mxu2 %v610_v62 }
  0x67   :  { %v358_v0 = vld [vmem:[#allocation6 + $0x600] sm:$0xff]  ;;  %739 = vmatpush.msra.mxu1 %v234_v63 }
  0x68   :  { %v478_v1 = vld [vmem:[#allocation6 + $0x9c0] sm:$0xff]  ;;  %780 = vmatpush.msra.mxu3 %v358_v0 }
  0x69   :  { %v606_v2 = vld [vmem:[#allocation6 + $0xdc0] sm:$0xff]  ;;  %786 = vmatpush.msrb.mxu0 %v478_v1  ;;  %781 = vmatmul.f32.vlgmr.msra.gmra.mxu3 %v3231_v54 }
  0x6a   :  { %v674_v3 = vld [vmem:[#allocation6 + $0xfe0] sm:$0xff]  ;;  %826 = vmatpush.msrb.mxu2 %v606_v2 }
  0x6b   :  { %v230_v4 = vld [vmem:[#allocation6 + $0x200] sm:$0xff]  ;;  %845 = vmatpush.msrb.mxu3 %v674_v3 }
  0x6c   :  { %v474_v5 = vld [vmem:[#allocation6 + $0x9a0] sm:$0xff]  ;;  %740 = vmatpush.msra.mxu1 %v230_v4  ;;  %v3241_v4 = vperm.slane %v3222_v39, 6 }
  0x6d   :  { %v546_v6 = vld [vmem:[#allocation6 + $0xbe0] sm:$0xff]  ;;  %787 = vmatpush.msrb.mxu0 %v474_v5  ;;  %741 = vmatmul.f32.vlgmr.msra.gmra.mxu1 %v3235_v58  ;;  %v227_v5 = vld [vmem:[#allocation6 + $0x1e8] sm:$0xff] }
  0x6e   :  { %v602_v7 = vld [vmem:[#allocation6 + $0xda0] sm:$0xff]  ;;  %805 = vmatpush.msrb.mxu1 %v546_v6  ;;  %v355_v6 = vld [vmem:[#allocation6 + $0x5e8] sm:$0xff] }
  0x6f   :  { %v670_v8 = vld [vmem:[#allocation6 + $0xfc0] sm:$0xff]  ;;  %827 = vmatpush.msrb.mxu2 %v602_v7 }
  0x70   :  { %v470_v9 = vld [vmem:[#allocation6 + $0x980] sm:$0xff]  ;;  %846 = vmatpush.msrb.mxu3 %v670_v8  ;;  %v3244_v8 = vperm.slane %v3222_v39, 4 }
  0x71   :  { %v542_v10 = vld [vmem:[#allocation6 + $0xbc0] sm:$0xff]  ;;  %788 = vmatpush.msrb.mxu0 %v470_v9 }
  0x72   :  { %v598_v11 = vld [vmem:[#allocation6 + $0xd80] sm:$0xff]  ;;  %806 = vmatpush.msrb.mxu1 %v542_v10  ;;  %v3247_v10 = vperm.slane %v3222_v39, 7 }
  0x73   :  { %v666_v12 = vld [vmem:[#allocation6 + $0xfa0] sm:$0xff]  ;;  %828 = vmatpush.msrb.mxu2 %v598_v11  ;;  %v223_v11 = vld [vmem:[#allocation6 + $0x1c8] sm:$0xff] }
  0x74   :  { %v466_v13 = vld [vmem:[#allocation6 + $0x960] sm:$0xff]  ;;  %847 = vmatpush.msrb.mxu3 %v666_v12  ;;  %v351_v12 = vld [vmem:[#allocation6 + $0x5c8] sm:$0xff] }
  0x75   :  { %v538_v14 = vld [vmem:[#allocation6 + $0xba0] sm:$0xff]  ;;  %789 = vmatpush.msrb.mxu0 %v466_v13  ;;  %v419_v13 = vld [vmem:[#allocation6 + $0x7e8] sm:$0xff] }
  0x76   :  { %v594_v15 = vld [vmem:[#allocation6 + $0xd60] sm:$0xff]  ;;  %807 = vmatpush.msrb.mxu1 %v538_v14 }
  0x77   :  { %v662_v16 = vld [vmem:[#allocation6 + $0xf80] sm:$0xff]  ;;  %829 = vmatpush.msrb.mxu2 %v594_v15  ;;  %v3252_v15 = vperm.slane %v3222_v39, 5  ;;  %v395_v39 = vld [vmem:[#allocation6 + $0x728] sm:$0xff] }
  0x78   :  { %v462_v17 = vld [vmem:[#allocation6 + $0x940] sm:$0xff]  ;;  %848 = vmatpush.msrb.mxu3 %v662_v16  ;;  %v219_v16 = vld [vmem:[#allocation6 + $0x1a8] sm:$0xff] }
  0x79   :  { %v534_v18 = vld [vmem:[#allocation6 + $0xb80] sm:$0xff]  ;;  %790 = vmatpush.msrb.mxu0 %v462_v17  ;;  %v347_v17 = vld [vmem:[#allocation6 + $0x5a8] sm:$0xff] }
  0x7a   :  { %v590_v19 = vld [vmem:[#allocation6 + $0xd40] sm:$0xff]  ;;  %808 = vmatpush.msrb.mxu1 %v534_v18  ;;  %v291_v18 = vld [vmem:[#allocation6 + $0x3e8] sm:$0xff] }
  0x7b   :  { %v658_v20 = vld [vmem:[#allocation6 + $0xf60] sm:$0xff]  ;;  %830 = vmatpush.msrb.mxu2 %v590_v19  ;;  %v415_v19 = vld [vmem:[#allocation6 + $0x7c8] sm:$0xff] }
  0x7c   :  { %v458_v21 = vld [vmem:[#allocation6 + $0x920] sm:$0xff]  ;;  %849 = vmatpush.msrb.mxu3 %v658_v20  ;;  %v215_v20 = vld [vmem:[#allocation6 + $0x188] sm:$0xff] }
  0x7d   :  { %v530_v22 = vld [vmem:[#allocation6 + $0xb60] sm:$0xff]  ;;  %791 = vmatpush.msrb.mxu0 %v458_v21  ;;  %v343_v21 = vld [vmem:[#allocation6 + $0x588] sm:$0xff] }
  0x7e   :  { %v586_v23 = vld [vmem:[#allocation6 + $0xd20] sm:$0xff]  ;;  %809 = vmatpush.msrb.mxu1 %v530_v22  ;;  %v287_v22 = vld [vmem:[#allocation6 + $0x3c8] sm:$0xff] }
  0x7f   :  { %v654_v24 = vld [vmem:[#allocation6 + $0xf40] sm:$0xff]  ;;  %831 = vmatpush.msrb.mxu2 %v586_v23  ;;  %v411_v23 = vld [vmem:[#allocation6 + $0x7a8] sm:$0xff] }
  0x80   :  { %v454_v25 = vld [vmem:[#allocation6 + $0x900] sm:$0xff]  ;;  %850 = vmatpush.msrb.mxu3 %v654_v24  ;;  %v211_v24 = vld [vmem:[#allocation6 + $0x168] sm:$0xff] }
  0x81   :  { %v526_v26 = vld [vmem:[#allocation6 + $0xb40] sm:$0xff]  ;;  %792 = vmatpush.msrb.mxu0 %v454_v25  ;;  %v339_v25 = vld [vmem:[#allocation6 + $0x568] sm:$0xff] }
  0x82   :  { %v582_v27 = vld [vmem:[#allocation6 + $0xd00] sm:$0xff]  ;;  %810 = vmatpush.msrb.mxu1 %v526_v26  ;;  %v283_v26 = vld [vmem:[#allocation6 + $0x3a8] sm:$0xff] }
  0x83   :  { %v650_v28 = vld [vmem:[#allocation6 + $0xf20] sm:$0xff]  ;;  %832 = vmatpush.msrb.mxu2 %v582_v27  ;;  %v407_v27 = vld [vmem:[#allocation6 + $0x788] sm:$0xff] }
  0x84   :  { %v450_v29 = vld [vmem:[#allocation6 + $0x8e0] sm:$0xff]  ;;  %851 = vmatpush.msrb.mxu3 %v650_v28  ;;  %v207_v28 = vld [vmem:[#allocation6 + $0x148] sm:$0xff] }
  0x85   :  { %v522_v30 = vld [vmem:[#allocation6 + $0xb20] sm:$0xff]  ;;  %793 = vmatpush.msrb.mxu0 %v450_v29  ;;  %v335_v29 = vld [vmem:[#allocation6 + $0x548] sm:$0xff] }
  0x86   :  { %v578_v33 = vld [vmem:[#allocation6 + $0xce0] sm:$0xff]  ;;  %811 = vmatpush.msrb.mxu1 %v522_v30  ;;  %v279_v30 = vld [vmem:[#allocation6 + $0x388] sm:$0xff] }
  0x87   :  { %v646_v34 = vld [vmem:[#allocation6 + $0xf00] sm:$0xff]  ;;  %833 = vmatpush.msrb.mxu2 %v578_v33  ;;  %v331_v33 = vld [vmem:[#allocation6 + $0x528] sm:$0xff] }
  0x88   :  { %v446_v35 = vld [vmem:[#allocation6 + $0x8c0] sm:$0xff]  ;;  %852 = vmatpush.msrb.mxu3 %v646_v34  ;;  %v275_v34 = vld [vmem:[#allocation6 + $0x368] sm:$0xff] }
  0x89   :  { %v518_v36 = vld [vmem:[#allocation6 + $0xb00] sm:$0xff]  ;;  %794 = vmatpush.msrb.mxu0 %v446_v35  ;;  %v399_v35 = vld [vmem:[#allocation6 + $0x748] sm:$0xff] }
  0x8a   :  { %v574_v37 = vld [vmem:[#allocation6 + $0xcc0] sm:$0xff]  ;;  %812 = vmatpush.msrb.mxu1 %v518_v36  ;;  %v199_v36 = vld [vmem:[#allocation6 + $0x108] sm:$0xff] }
  0x8b   :  { %v642_v38 = vld [vmem:[#allocation6 + $0xee0] sm:$0xff]  ;;  %834 = vmatpush.msrb.mxu2 %v574_v37  ;;  %v327_v37 = vld [vmem:[#allocation6 + $0x508] sm:$0xff] }
  0x8c   :  { %v442_v40 = vld [vmem:[#allocation6 + $0x8a0] sm:$0xff]  ;;  %853 = vmatpush.msrb.mxu3 %v642_v38  ;;  %v271_v38 = vld [vmem:[#allocation6 + $0x348] sm:$0xff] }
  0x8d   :  { %v514_v41 = vld [vmem:[#allocation6 + $0xae0] sm:$0xff]  ;;  %795 = vmatpush.msrb.mxu0 %v442_v40  ;;  %v195_v40 = vld [vmem:[#allocation6 + $0xe8] sm:$0xff] }
  0x8e   :  { %v570_v42 = vld [vmem:[#allocation6 + $0xca0] sm:$0xff]  ;;  %813 = vmatpush.msrb.mxu1 %v514_v41  ;;  %v323_v41 = vld [vmem:[#allocation6 + $0x4e8] sm:$0xff] }
  0x8f   :  { %v638_v43 = vld [vmem:[#allocation6 + $0xec0] sm:$0xff]  ;;  %835 = vmatpush.msrb.mxu2 %v570_v42  ;;  %v267_v42 = vld [vmem:[#allocation6 + $0x328] sm:$0xff] }
  0x90   :  { %v438_v44 = vld [vmem:[#allocation6 + $0x880] sm:$0xff]  ;;  %854 = vmatpush.msrb.mxu3 %v638_v43  ;;  %v391_v43 = vld [vmem:[#allocation6 + $0x708] sm:$0xff] }
  0x91   :  { %v510_v45 = vld [vmem:[#allocation6 + $0xac0] sm:$0xff]  ;;  %796 = vmatpush.msrb.mxu0 %v438_v44  ;;  %v191_v44 = vld [vmem:[#allocation6 + $0xc8] sm:$0xff] }
  0x92   :  { %v566_v46 = vld [vmem:[#allocation6 + $0xc80] sm:$0xff]  ;;  %814 = vmatpush.msrb.mxu1 %v510_v45  ;;  %v319_v45 = vld [vmem:[#allocation6 + $0x4c8] sm:$0xff] }
  0x93   :  { %v634_v47 = vld [vmem:[#allocation6 + $0xea0] sm:$0xff]  ;;  %836 = vmatpush.msrb.mxu2 %v566_v46  ;;  %v263_v46 = vld [vmem:[#allocation6 + $0x308] sm:$0xff] }
  0x94   :  { %v434_v49 = vld [vmem:[#allocation6 + $0x860] sm:$0xff]  ;;  %855 = vmatpush.msrb.mxu3 %v634_v47  ;;  %v387_v47 = vld [vmem:[#allocation6 + $0x6e8] sm:$0xff] }
  0x95   :  { %v506_v50 = vld [vmem:[#allocation6 + $0xaa0] sm:$0xff]  ;;  %797 = vmatpush.msrb.mxu0 %v434_v49  ;;  %v187_v49 = vld [vmem:[#allocation6 + $0xa8] sm:$0xff] }
  0x96   :  { %v562_v51 = vld [vmem:[#allocation6 + $0xc60] sm:$0xff]  ;;  %815 = vmatpush.msrb.mxu1 %v506_v50  ;;  %v315_v50 = vld [vmem:[#allocation6 + $0x4a8] sm:$0xff] }
  0x97   :  { %v630_v53 = vld [vmem:[#allocation6 + $0xe80] sm:$0xff]  ;;  %837 = vmatpush.msrb.mxu2 %v562_v51  ;;  %v259_v51 = vld [vmem:[#allocation6 + $0x2e8] sm:$0xff] }
  0x98   :  { %v430_v55 = vld [vmem:[#allocation6 + $0x840] sm:$0xff]  ;;  %856 = vmatpush.msrb.mxu3 %v630_v53  ;;  %v383_v53 = vld [vmem:[#allocation6 + $0x6c8] sm:$0xff] }
  0x99   :  { %v502_v56 = vld [vmem:[#allocation6 + $0xa80] sm:$0xff]  ;;  %798 = vmatpush.msrb.mxu0 %v430_v55  ;;  %v183_v55 = vld [vmem:[#allocation6 + $0x88] sm:$0xff] }
  0x9a   :  { %v558_v57 = vld [vmem:[#allocation6 + $0xc40] sm:$0xff]  ;;  %816 = vmatpush.msrb.mxu1 %v502_v56  ;;  %v311_v56 = vld [vmem:[#allocation6 + $0x488] sm:$0xff] }
  0x9b   :  { %v626_v59 = vld [vmem:[#allocation6 + $0xe60] sm:$0xff]  ;;  %838 = vmatpush.msrb.mxu2 %v558_v57  ;;  %v255_v57 = vld [vmem:[#allocation6 + $0x2c8] sm:$0xff] }
  0x9c   :  { %v426_v60 = vld [vmem:[#allocation6 + $0x820] sm:$0xff]  ;;  %857 = vmatpush.msrb.mxu3 %v626_v59  ;;  %v379_v59 = vld [vmem:[#allocation6 + $0x6a8] sm:$0xff] }
  0x9d   :  { %v498_v61 = vld [vmem:[#allocation6 + $0xa60] sm:$0xff]  ;;  %799 = vmatpush.msrb.mxu0 %v426_v60  ;;  %v179_v60 = vld [vmem:[#allocation6 + $0x68] sm:$0xff] }
  0x9e   :  { %v554_v62 = vld [vmem:[#allocation6 + $0xc20] sm:$0xff]  ;;  %817 = vmatpush.msrb.mxu1 %v498_v61  ;;  %v307_v61 = vld [vmem:[#allocation6 + $0x468] sm:$0xff] }
  0x9f   :  { %v622_v63 = vld [vmem:[#allocation6 + $0xe40] sm:$0xff]  ;;  %839 = vmatpush.msrb.mxu2 %v554_v62  ;;  %v251_v62 = vld [vmem:[#allocation6 + $0x2a8] sm:$0xff] }
  0xa0   :  { %v422_v0 = vld [vmem:[#allocation6 + $0x800] sm:$0xff]  ;;  %858 = vmatpush.msrb.mxu3 %v622_v63  ;;  %v375_v63 = vld [vmem:[#allocation6 + $0x688] sm:$0xff] }
  0xa1   :  { %v494_v1 = vld [vmem:[#allocation6 + $0xa40] sm:$0xff]  ;;  %800 = vmatpush.msrb.mxu0 %v422_v0  ;;  %v175_v0 = vld [vmem:[#allocation6 + $0x48] sm:$0xff] }
  0xa2   :  { %v550_v2 = vld [vmem:[#allocation6 + $0xc00] sm:$0xff]  ;;  %818 = vmatpush.msrb.mxu1 %v494_v1  ;;  %801 = vmatmul.f32.vlgmr.msrb.gmra.mxu0 %v3244_v8  ;;  %v303_v1 = vld [vmem:[#allocation6 + $0x448] sm:$0xff] }
  0xa3   :  { %v618_v3 = vld [vmem:[#allocation6 + $0xe20] sm:$0xff]  ;;  %840 = vmatpush.msrb.mxu2 %v550_v2  ;;  %865 = vmatpush.msra.mxu0 %v227_v5  ;;  %v247_v2 = vld [vmem:[#allocation6 + $0x288] sm:$0xff] }
  0xa4   :  { %v490_v7 = vld [vmem:[#allocation6 + $0xa20] sm:$0xff]  ;;  %859 = vmatpush.msrb.mxu3 %v618_v3  ;;  %841 = vmatmul.f32.vlgmr.msrb.gmra.mxu2 %v3241_v4  ;;  %v371_v3 = vld [vmem:[#allocation6 + $0x668] sm:$0xff] }
  0xa5   :  { %v614_v9 = vld [vmem:[#allocation6 + $0xe00] sm:$0xff]  ;;  %905 = vmatpush.msra.mxu2 %v355_v6  ;;  %819 = vmatpush.msrb.mxu1 %v490_v7  ;;  %v171_v5 = vld [vmem:[#allocation6 + $0x28] sm:$0xff] }
  0xa6   :  { %860 = vmatpush.msrb.mxu3 %v614_v9  ;;  %v486_v14 = vld [vmem:[#allocation6 + $0xa00] sm:$0xff]  ;;  %866 = vmatpush.msra.mxu0 %v223_v11  ;;  %v299_v6 = vld [vmem:[#allocation6 + $0x428] sm:$0xff] }
  0xa7   :  { %861 = vmatmul.f32.vlgmr.msrb.gmra.mxu3 %v3247_v10  ;;  %906 = vmatpush.msra.mxu2 %v351_v12  ;;  %v243_v7 = vld [vmem:[#allocation6 + $0x268] sm:$0xff] }
  0xa8   :  { %925 = vmatpush.msra.mxu3 %v419_v13  ;;  %820 = vmatpush.msrb.mxu1 %v486_v14  ;;  %v367_v9 = vld [vmem:[#allocation6 + $0x648] sm:$0xff] }
  0xa9   :  { %867 = vmatpush.msra.mxu0 %v219_v16  ;;  %821 = vmatmul.f32.vlgmr.msrb.gmra.mxu1 %v3252_v15  ;;  %v167_v11 = vld [vmem:[#allocation6 + $0x8] sm:$0xff] }
  0xaa   :  { %907 = vmatpush.msra.mxu2 %v347_v17  ;;  %885 = vmatpush.msra.mxu1 %v291_v18  ;;  %v295_v12 = vld [vmem:[#allocation6 + $0x408] sm:$0xff] }
  0xab   :  { %926 = vmatpush.msra.mxu3 %v415_v19  ;;  %868 = vmatpush.msra.mxu0 %v215_v20  ;;  %v239_v13 = vld [vmem:[#allocation6 + $0x248] sm:$0xff] }
  0xac   :  { %908 = vmatpush.msra.mxu2 %v343_v21  ;;  %886 = vmatpush.msra.mxu1 %v287_v22  ;;  %v363_v14 = vld [vmem:[#allocation6 + $0x628] sm:$0xff] }
  0xad   :  { %927 = vmatpush.msra.mxu3 %v411_v23  ;;  %869 = vmatpush.msra.mxu0 %v211_v24  ;;  %v483_v16 = vld [vmem:[#allocation6 + $0x9e8] sm:$0xff] }
  0xae   :  { %909 = vmatpush.msra.mxu2 %v339_v25  ;;  %887 = vmatpush.msra.mxu1 %v283_v26  ;;  %v611_v17 = vld [vmem:[#allocation6 + $0xde8] sm:$0xff] }
  0xaf   :  { %928 = vmatpush.msra.mxu3 %v407_v27  ;;  %870 = vmatpush.msra.mxu0 %v207_v28  ;;  %v235_v18 = vld [vmem:[#allocation6 + $0x228] sm:$0xff] }
  0xb0   :  { %910 = vmatpush.msra.mxu2 %v335_v29  ;;  %888 = vmatpush.msra.mxu1 %v279_v30  ;;  %v359_v19 = vld [vmem:[#allocation6 + $0x608] sm:$0xff] }
  0xb1   :  { %929 = vmatpush.msra.mxu3 %v403_v31  ;;  %871 = vmatpush.msra.mxu0 %v203_v32  ;;  %v479_v20 = vld [vmem:[#allocation6 + $0x9c8] sm:$0xff] }
  0xb2   :  { %911 = vmatpush.msra.mxu2 %v331_v33  ;;  %889 = vmatpush.msra.mxu1 %v275_v34  ;;  %v607_v21 = vld [vmem:[#allocation6 + $0xdc8] sm:$0xff] }
  0xb3   :  { %930 = vmatpush.msra.mxu3 %v399_v35  ;;  %872 = vmatpush.msra.mxu0 %v199_v36  ;;  %v675_v22 = vld [vmem:[#allocation6 + $0xfe8] sm:$0xff] }
  0xb4   :  { %912 = vmatpush.msra.mxu2 %v327_v37  ;;  %890 = vmatpush.msra.mxu1 %v271_v38  ;;  %v231_v23 = vld [vmem:[#allocation6 + $0x208] sm:$0xff] }
  0xb5   :  { %931 = vmatpush.msra.mxu3 %v395_v39  ;;  %873 = vmatpush.msra.mxu0 %v195_v40  ;;  %v475_v24 = vld [vmem:[#allocation6 + $0x9a8] sm:$0xff] }
  0xb6   :  { %913 = vmatpush.msra.mxu2 %v323_v41  ;;  %891 = vmatpush.msra.mxu1 %v267_v42  ;;  %v547_v25 = vld [vmem:[#allocation6 + $0xbe8] sm:$0xff] }
  0xb7   :  { %932 = vmatpush.msra.mxu3 %v391_v43  ;;  %874 = vmatpush.msra.mxu0 %v191_v44  ;;  %v603_v26 = vld [vmem:[#allocation6 + $0xda8] sm:$0xff] }
  0xb8   :  { %914 = vmatpush.msra.mxu2 %v319_v45  ;;  %892 = vmatpush.msra.mxu1 %v263_v46  ;;  %v671_v27 = vld [vmem:[#allocation6 + $0xfc8] sm:$0xff] }
  0xb9   :  { %933 = vmatpush.msra.mxu3 %v387_v47  ;;  %875 = vmatpush.msra.mxu0 %v187_v49  ;;  %v471_v28 = vld [vmem:[#allocation6 + $0x988] sm:$0xff] }
  0xba   :  { %915 = vmatpush.msra.mxu2 %v315_v50  ;;  %893 = vmatpush.msra.mxu1 %v259_v51  ;;  %v543_v29 = vld [vmem:[#allocation6 + $0xbc8] sm:$0xff] }
  0xbb   :  { %934 = vmatpush.msra.mxu3 %v383_v53  ;;  %876 = vmatpush.msra.mxu0 %v183_v55  ;;  %v599_v30 = vld [vmem:[#allocation6 + $0xd88] sm:$0xff] }
  0xbc   :  { %916 = vmatpush.msra.mxu2 %v311_v56  ;;  %894 = vmatpush.msra.mxu1 %v255_v57  ;;  %v667_v31 = vld [vmem:[#allocation6 + $0xfa8] sm:$0xff] }
  0xbd   :  { %935 = vmatpush.msra.mxu3 %v379_v59  ;;  %877 = vmatpush.msra.mxu0 %v179_v60  ;;  %v467_v32 = vld [vmem:[#allocation6 + $0x968] sm:$0xff] }
  0xbe   :  { %917 = vmatpush.msra.mxu2 %v307_v61  ;;  %895 = vmatpush.msra.mxu1 %v251_v62  ;;  %v539_v33 = vld [vmem:[#allocation6 + $0xba8] sm:$0xff] }
  0xbf   :  { %936 = vmatpush.msra.mxu3 %v375_v63  ;;  %878 = vmatpush.msra.mxu0 %v175_v0  ;;  %v595_v34 = vld [vmem:[#allocation6 + $0xd68] sm:$0xff] }
  0xc0   :  { %918 = vmatpush.msra.mxu2 %v303_v1  ;;  %896 = vmatpush.msra.mxu1 %v247_v2  ;;  %v663_v35 = vld [vmem:[#allocation6 + $0xf88] sm:$0xff] }
  0xc1   :  { %937 = vmatpush.msra.mxu3 %v371_v3  ;;  %879 = vmatpush.msra.mxu0 %v171_v5  ;;  %v463_v36 = vld [vmem:[#allocation6 + $0x948] sm:$0xff] }
  0xc2   :  { %919 = vmatpush.msra.mxu2 %v299_v6  ;;  %897 = vmatpush.msra.mxu1 %v243_v7  ;;  %v535_v37 = vld [vmem:[#allocation6 + $0xb88] sm:$0xff] }
  0xc3   :  { %938 = vmatpush.msra.mxu3 %v367_v9  ;;  %880 = vmatpush.msra.mxu0 %v167_v11  ;;  %v591_v38 = vld [vmem:[#allocation6 + $0xd48] sm:$0xff] }
  0xc4   :  { %920 = vmatpush.msra.mxu2 %v295_v12  ;;  %898 = vmatpush.msra.mxu1 %v239_v13  ;;  %v659_v39 = vld [vmem:[#allocation6 + $0xf68] sm:$0xff] }
  0xc5   :  { %939 = vmatpush.msra.mxu3 %v363_v14  ;;  %945 = vmatpush.msrb.mxu0 %v483_v16  ;;  %v459_v40 = vld [vmem:[#allocation6 + $0x928] sm:$0xff] }
  0xc6   :  { %985 = vmatpush.msrb.mxu2 %v611_v17  ;;  %899 = vmatpush.msra.mxu1 %v235_v18  ;;  %v531_v41 = vld [vmem:[#allocation6 + $0xb68] sm:$0xff] }
  0xc7   :  { %940 = vmatpush.msra.mxu3 %v359_v19  ;;  %946 = vmatpush.msrb.mxu0 %v479_v20  ;;  %v587_v42 = vld [vmem:[#allocation6 + $0xd28] sm:$0xff] }
  0xc8   :  { %986 = vmatpush.msrb.mxu2 %v607_v21  ;;  %900 = vmatpush.msra.mxu1 %v231_v23  ;;  %v655_v43 = vld [vmem:[#allocation6 + $0xf48] sm:$0xff] }
  0xc9   :  { %1005 = vmatpush.msrb.mxu3 %v675_v22  ;;  %947 = vmatpush.msrb.mxu0 %v475_v24  ;;  %v455_v44 = vld [vmem:[#allocation6 + $0x908] sm:$0xff]  ;;  %v228_v24 = vld [vmem:[#allocation6 + $0x1f0] sm:$0xff] }
  0xca   :  { %965 = vmatpush.msrb.mxu1 %v547_v25  ;;  %987 = vmatpush.msrb.mxu2 %v603_v26  ;;  %v527_v45 = vld [vmem:[#allocation6 + $0xb48] sm:$0xff]  ;;  %v356_v25 = vld [vmem:[#allocation6 + $0x5f0] sm:$0xff] }
  0xcb   :  { %1006 = vmatpush.msrb.mxu3 %v671_v27  ;;  %948 = vmatpush.msrb.mxu0 %v471_v28  ;;  %v583_v46 = vld [vmem:[#allocation6 + $0xd08] sm:$0xff]  ;;  %v224_v28 = vld [vmem:[#allocation6 + $0x1d0] sm:$0xff] }
  0xcc   :  { %966 = vmatpush.msrb.mxu1 %v543_v29  ;;  %988 = vmatpush.msrb.mxu2 %v599_v30  ;;  %v651_v47 = vld [vmem:[#allocation6 + $0xf28] sm:$0xff]  ;;  %v352_v29 = vld [vmem:[#allocation6 + $0x5d0] sm:$0xff] }
  0xcd   :  { %1007 = vmatpush.msrb.mxu3 %v667_v31  ;;  %949 = vmatpush.msrb.mxu0 %v467_v32  ;;  %v451_v49 = vld [vmem:[#allocation6 + $0x8e8] sm:$0xff]  ;;  %v420_v30 = vld [vmem:[#allocation6 + $0x7f0] sm:$0xff] }
  0xce   :  { %967 = vmatpush.msrb.mxu1 %v539_v33  ;;  %989 = vmatpush.msrb.mxu2 %v595_v34  ;;  %v523_v50 = vld [vmem:[#allocation6 + $0xb28] sm:$0xff]  ;;  %v220_v32 = vld [vmem:[#allocation6 + $0x1b0] sm:$0xff] }
  0xcf   :  { %1008 = vmatpush.msrb.mxu3 %v663_v35  ;;  %950 = vmatpush.msrb.mxu0 %v463_v36  ;;  %v579_v51 = vld [vmem:[#allocation6 + $0xce8] sm:$0xff]  ;;  %v348_v33 = vld [vmem:[#allocation6 + $0x5b0] sm:$0xff] }
  0xd0   :  { %968 = vmatpush.msrb.mxu1 %v535_v37  ;;  %990 = vmatpush.msrb.mxu2 %v591_v38  ;;  %v647_v53 = vld [vmem:[#allocation6 + $0xf08] sm:$0xff]  ;;  %v292_v34 = vld [vmem:[#allocation6 + $0x3f0] sm:$0xff] }
  0xd1   :  { %1009 = vmatpush.msrb.mxu3 %v659_v39  ;;  %951 = vmatpush.msrb.mxu0 %v459_v40  ;;  %v447_v55 = vld [vmem:[#allocation6 + $0x8c8] sm:$0xff]  ;;  %v416_v35 = vld [vmem:[#allocation6 + $0x7d0] sm:$0xff] }
  0xd2   :  { %969 = vmatpush.msrb.mxu1 %v531_v41  ;;  %991 = vmatpush.msrb.mxu2 %v587_v42  ;;  %v519_v56 = vld [vmem:[#allocation6 + $0xb08] sm:$0xff]  ;;  %v216_v36 = vld [vmem:[#allocation6 + $0x190] sm:$0xff] }
  0xd3   :  { %1010 = vmatpush.msrb.mxu3 %v655_v43  ;;  %952 = vmatpush.msrb.mxu0 %v455_v44  ;;  %v575_v57 = vld [vmem:[#allocation6 + $0xcc8] sm:$0xff]  ;;  %v344_v37 = vld [vmem:[#allocation6 + $0x590] sm:$0xff] }
  0xd4   :  { %970 = vmatpush.msrb.mxu1 %v527_v45  ;;  %992 = vmatpush.msrb.mxu2 %v583_v46  ;;  %v643_v59 = vld [vmem:[#allocation6 + $0xee8] sm:$0xff]  ;;  %v288_v38 = vld [vmem:[#allocation6 + $0x3d0] sm:$0xff] }
  0xd5   :  { %1011 = vmatpush.msrb.mxu3 %v651_v47  ;;  %953 = vmatpush.msrb.mxu0 %v451_v49  ;;  %v443_v60 = vld [vmem:[#allocation6 + $0x8a8] sm:$0xff]  ;;  %v412_v39 = vld [vmem:[#allocation6 + $0x7b0] sm:$0xff] }
  0xd6   :  { %971 = vmatpush.msrb.mxu1 %v523_v50  ;;  %993 = vmatpush.msrb.mxu2 %v579_v51  ;;  %v515_v61 = vld [vmem:[#allocation6 + $0xae8] sm:$0xff]  ;;  %v212_v40 = vld [vmem:[#allocation6 + $0x170] sm:$0xff] }
  0xd7   :  { %1012 = vmatpush.msrb.mxu3 %v647_v53  ;;  %954 = vmatpush.msrb.mxu0 %v447_v55  ;;  %v571_v62 = vld [vmem:[#allocation6 + $0xca8] sm:$0xff]  ;;  %v340_v41 = vld [vmem:[#allocation6 + $0x570] sm:$0xff] }
  0xd8   :  { %972 = vmatpush.msrb.mxu1 %v519_v56  ;;  %v639_v63 = vld [vmem:[#allocation6 + $0xec8] sm:$0xff]  ;;  %994 = vmatpush.msrb.mxu2 %v575_v57  ;;  %v284_v42 = vld [vmem:[#allocation6 + $0x3b0] sm:$0xff] }
  0xd9   :  { %1013 = vmatpush.msrb.mxu3 %v643_v59  ;;  %v439_v0 = vld [vmem:[#allocation6 + $0x888] sm:$0xff]  ;;  %955 = vmatpush.msrb.mxu0 %v443_v60  ;;  %v408_v43 = vld [vmem:[#allocation6 + $0x790] sm:$0xff] }
  0xda   :  { %v511_v1 = vld [vmem:[#allocation6 + $0xac8] sm:$0xff]  ;;  %973 = vmatpush.msrb.mxu1 %v515_v61  ;;  %995 = vmatpush.msrb.mxu2 %v571_v62  ;;  %v208_v44 = vld [vmem:[#allocation6 + $0x150] sm:$0xff] }
  0xdb   :  { %v567_v2 = vld [vmem:[#allocation6 + $0xc88] sm:$0xff]  ;;  %1014 = vmatpush.msrb.mxu3 %v639_v63  ;;  %956 = vmatpush.msrb.mxu0 %v439_v0  ;;  %v336_v45 = vld [vmem:[#allocation6 + $0x550] sm:$0xff] }
  0xdc   :  { %v635_v3 = vld [vmem:[#allocation6 + $0xea8] sm:$0xff]  ;;  %974 = vmatpush.msrb.mxu1 %v511_v1  ;;  %996 = vmatpush.msrb.mxu2 %v567_v2  ;;  %v280_v46 = vld [vmem:[#allocation6 + $0x390] sm:$0xff] }
  0xdd   :  { %v435_v5 = vld [vmem:[#allocation6 + $0x868] sm:$0xff]  ;;  %1015 = vmatpush.msrb.mxu3 %v635_v3  ;;  %921 = vmatmul.f32.vlgmr.msra.gmra.mxu2 %v3225_v48  ;;  %v404_v47 = vld [vmem:[#allocation6 + $0x770] sm:$0xff] }
  0xde   :  { %v507_v6 = vld [vmem:[#allocation6 + $0xaa8] sm:$0xff]  ;;  %957 = vmatpush.msrb.mxu0 %v435_v5  ;;  %941 = vmatmul.f32.vlgmr.msra.gmra.mxu3 %v3231_v54  ;;  %v204_v49 = vld [vmem:[#allocation6 + $0x130] sm:$0xff] }
  0xdf   :  { %v563_v7 = vld [vmem:[#allocation6 + $0xc68] sm:$0xff]  ;;  %975 = vmatpush.msrb.mxu1 %v507_v6  ;;  %881 = vmatmul.f32.vlgmr.msra.gmra.mxu0 %v3228_v52  ;;  %v332_v50 = vld [vmem:[#allocation6 + $0x530] sm:$0xff] }
  0xe0   :  { %v631_v9 = vld [vmem:[#allocation6 + $0xe88] sm:$0xff]  ;;  %997 = vmatpush.msrb.mxu2 %v563_v7  ;;  %901 = vmatmul.f32.vlgmr.msra.gmra.mxu1 %v3235_v58  ;;  %v276_v51 = vld [vmem:[#allocation6 + $0x370] sm:$0xff] }
  0xe1   :  { %v431_v11 = vld [vmem:[#allocation6 + $0x848] sm:$0xff]  ;;  %1016 = vmatpush.msrb.mxu3 %v631_v9  ;;  %v400_v53 = vld [vmem:[#allocation6 + $0x750] sm:$0xff] }
  0xe2   :  { %v503_v12 = vld [vmem:[#allocation6 + $0xa88] sm:$0xff]  ;;  %958 = vmatpush.msrb.mxu0 %v431_v11  ;;  %v200_v55 = vld [vmem:[#allocation6 + $0x110] sm:$0xff] }
  0xe3   :  { %v559_v13 = vld [vmem:[#allocation6 + $0xc48] sm:$0xff]  ;;  %976 = vmatpush.msrb.mxu1 %v503_v12  ;;  %v328_v56 = vld [vmem:[#allocation6 + $0x510] sm:$0xff] }
  0xe4   :  { %v627_v14 = vld [vmem:[#allocation6 + $0xe68] sm:$0xff]  ;;  %998 = vmatpush.msrb.mxu2 %v559_v13  ;;  %v272_v57 = vld [vmem:[#allocation6 + $0x350] sm:$0xff] }
  0xe5   :  { %v427_v16 = vld [vmem:[#allocation6 + $0x828] sm:$0xff]  ;;  %1017 = vmatpush.msrb.mxu3 %v627_v14  ;;  %v396_v59 = vld [vmem:[#allocation6 + $0x730] sm:$0xff] }
  0xe6   :  { %v499_v17 = vld [vmem:[#allocation6 + $0xa68] sm:$0xff]  ;;  %959 = vmatpush.msrb.mxu0 %v427_v16  ;;  %v196_v60 = vld [vmem:[#allocation6 + $0xf0] sm:$0xff] }
  0xe7   :  { %v555_v18 = vld [vmem:[#allocation6 + $0xc28] sm:$0xff]  ;;  %977 = vmatpush.msrb.mxu1 %v499_v17  ;;  %v324_v61 = vld [vmem:[#allocation6 + $0x4f0] sm:$0xff] }
  0xe8   :  { %v623_v19 = vld [vmem:[#allocation6 + $0xe48] sm:$0xff]  ;;  %999 = vmatpush.msrb.mxu2 %v555_v18  ;;  %v268_v62 = vld [vmem:[#allocation6 + $0x330] sm:$0xff] }
  0xe9   :  { %v423_v20 = vld [vmem:[#allocation6 + $0x808] sm:$0xff]  ;;  %1018 = vmatpush.msrb.mxu3 %v623_v19  ;;  %v392_v63 = vld [vmem:[#allocation6 + $0x710] sm:$0xff] }
  0xea   :  { %v495_v21 = vld [vmem:[#allocation6 + $0xa48] sm:$0xff]  ;;  %960 = vmatpush.msrb.mxu0 %v423_v20  ;;  %v192_v0 = vld [vmem:[#allocation6 + $0xd0] sm:$0xff] }
  0xeb   :  { %v551_v22 = vld [vmem:[#allocation6 + $0xc08] sm:$0xff]  ;;  %978 = vmatpush.msrb.mxu1 %v495_v21  ;;  %961 = vmatmul.f32.vlgmr.msrb.gmra.mxu0 %v3244_v8  ;;  %v320_v1 = vld [vmem:[#allocation6 + $0x4d0] sm:$0xff] }
  0xec   :  { %v619_v23 = vld [vmem:[#allocation6 + $0xe28] sm:$0xff]  ;;  %1000 = vmatpush.msrb.mxu2 %v551_v22  ;;  %1025 = vmatpush.msra.mxu0 %v228_v24  ;;  %v264_v2 = vld [vmem:[#allocation6 + $0x310] sm:$0xff] }
  0xed   :  { %v491_v26 = vld [vmem:[#allocation6 + $0xa28] sm:$0xff]  ;;  %1019 = vmatpush.msrb.mxu3 %v619_v23  ;;  %1001 = vmatmul.f32.vlgmr.msrb.gmra.mxu2 %v3241_v4  ;;  %v388_v3 = vld [vmem:[#allocation6 + $0x6f0] sm:$0xff] }
  0xee   :  { %v615_v27 = vld [vmem:[#allocation6 + $0xe08] sm:$0xff]  ;;  %1065 = vmatpush.msra.mxu2 %v356_v25  ;;  %979 = vmatpush.msrb.mxu1 %v491_v26  ;;  %v188_v5 = vld [vmem:[#allocation6 + $0xb0] sm:$0xff] }
  0xef   :  { %1020 = vmatpush.msrb.mxu3 %v615_v27  ;;  %v487_v31 = vld [vmem:[#allocation6 + $0xa08] sm:$0xff]  ;;  %1026 = vmatpush.msra.mxu0 %v224_v28  ;;  %v316_v6 = vld [vmem:[#allocation6 + $0x4b0] sm:$0xff] }
  0xf0   :  { %1021 = vmatmul.f32.vlgmr.msrb.gmra.mxu3 %v3247_v10  ;;  %1066 = vmatpush.msra.mxu2 %v352_v29  ;;  %v260_v7 = vld [vmem:[#allocation6 + $0x2f0] sm:$0xff] }
  0xf1   :  { %1085 = vmatpush.msra.mxu3 %v420_v30  ;;  %980 = vmatpush.msrb.mxu1 %v487_v31  ;;  %v384_v9 = vld [vmem:[#allocation6 + $0x6d0] sm:$0xff] }
  0xf2   :  { %1027 = vmatpush.msra.mxu0 %v220_v32  ;;  %981 = vmatmul.f32.vlgmr.msrb.gmra.mxu1 %v3252_v15  ;;  %v184_v11 = vld [vmem:[#allocation6 + $0x90] sm:$0xff] }
  0xf3   :  { %1067 = vmatpush.msra.mxu2 %v348_v33  ;;  %1045 = vmatpush.msra.mxu1 %v292_v34  ;;  %v312_v12 = vld [vmem:[#allocation6 + $0x490] sm:$0xff] }
  0xf4   :  { %1086 = vmatpush.msra.mxu3 %v416_v35  ;;  %1028 = vmatpush.msra.mxu0 %v216_v36  ;;  %v256_v13 = vld [vmem:[#allocation6 + $0x2d0] sm:$0xff] }
  0xf5   :  { %1068 = vmatpush.msra.mxu2 %v344_v37  ;;  %1046 = vmatpush.msra.mxu1 %v288_v38  ;;  %v380_v14 = vld [vmem:[#allocation6 + $0x6b0] sm:$0xff] }
  0xf6   :  { %1087 = vmatpush.msra.mxu3 %v412_v39  ;;  %1029 = vmatpush.msra.mxu0 %v212_v40  ;;  %v180_v16 = vld [vmem:[#allocation6 + $0x70] sm:$0xff] }
  0xf7   :  { %1069 = vmatpush.msra.mxu2 %v340_v41  ;;  %1047 = vmatpush.msra.mxu1 %v284_v42  ;;  %v308_v17 = vld [vmem:[#allocation6 + $0x470] sm:$0xff] }
  0xf8   :  { %1088 = vmatpush.msra.mxu3 %v408_v43  ;;  %1030 = vmatpush.msra.mxu0 %v208_v44  ;;  %v252_v18 = vld [vmem:[#allocation6 + $0x2b0] sm:$0xff] }
  0xf9   :  { %1070 = vmatpush.msra.mxu2 %v336_v45  ;;  %1048 = vmatpush.msra.mxu1 %v280_v46  ;;  %v376_v19 = vld [vmem:[#allocation6 + $0x690] sm:$0xff] }
  0xfa   :  { %1089 = vmatpush.msra.mxu3 %v404_v47  ;;  %1031 = vmatpush.msra.mxu0 %v204_v49  ;;  %v176_v20 = vld [vmem:[#allocation6 + $0x50] sm:$0xff] }
  0xfb   :  { %1071 = vmatpush.msra.mxu2 %v332_v50  ;;  %1049 = vmatpush.msra.mxu1 %v276_v51  ;;  %v304_v21 = vld [vmem:[#allocation6 + $0x450] sm:$0xff] }
  0xfc   :  { %1090 = vmatpush.msra.mxu3 %v400_v53  ;;  %1032 = vmatpush.msra.mxu0 %v200_v55  ;;  %v248_v22 = vld [vmem:[#allocation6 + $0x290] sm:$0xff] }
  0xfd   :  { %1072 = vmatpush.msra.mxu2 %v328_v56  ;;  %1050 = vmatpush.msra.mxu1 %v272_v57  ;;  %v372_v23 = vld [vmem:[#allocation6 + $0x670] sm:$0xff] }
  0xfe   :  { %1091 = vmatpush.msra.mxu3 %v396_v59  ;;  %1033 = vmatpush.msra.mxu0 %v196_v60  ;;  %v172_v24 = vld [vmem:[#allocation6 + $0x30] sm:$0xff] }
  0xff   :  { %1073 = vmatpush.msra.mxu2 %v324_v61  ;;  %1051 = vmatpush.msra.mxu1 %v268_v62  ;;  %v300_v25 = vld [vmem:[#allocation6 + $0x430] sm:$0xff]  ;;  %v3264_v62 = vld [vmem:[#allocation7] sm:$0xf] }
 0x100   :  { %1092 = vmatpush.msra.mxu3 %v392_v63  ;;  %1034 = vmatpush.msra.mxu0 %v192_v0  ;;  %v244_v26 = vld [vmem:[#allocation6 + $0x270] sm:$0xff] }
 0x101   :  { %1074 = vmatpush.msra.mxu2 %v320_v1  ;;  %1052 = vmatpush.msra.mxu1 %v264_v2  ;;  %v368_v27 = vld [vmem:[#allocation6 + $0x650] sm:$0xff] }
 0x102   :  { %1093 = vmatpush.msra.mxu3 %v388_v3  ;;  %1035 = vmatpush.msra.mxu0 %v188_v5  ;;  %v168_v28 = vld [vmem:[#allocation6 + $0x10] sm:$0xff] }
 0x103   :  { %1075 = vmatpush.msra.mxu2 %v316_v6  ;;  %1053 = vmatpush.msra.mxu1 %v260_v7  ;;  %v296_v29 = vld [vmem:[#allocation6 + $0x410] sm:$0xff]  ;;  %v697_v6 = vperm.slane %v3264_v62, 0 }
 0x104   :  { %1094 = vmatpush.msra.mxu3 %v384_v9  ;;  %1036 = vmatpush.msra.mxu0 %v184_v11  ;;  %v240_v30 = vld [vmem:[#allocation6 + $0x250] sm:$0xff] }
 0x105   :  { %1076 = vmatpush.msra.mxu2 %v312_v12  ;;  %1054 = vmatpush.msra.mxu1 %v256_v13  ;;  %v364_v31 = vld [vmem:[#allocation6 + $0x630] sm:$0xff] }
 0x106   :  { %1095 = vmatpush.msra.mxu3 %v380_v14  ;;  %1037 = vmatpush.msra.mxu0 %v180_v16  ;;  %v484_v32 = vld [vmem:[#allocation6 + $0x9f0] sm:$0xff]  ;;  %v722_v16 = vpop.f32.mrf.mxu0 }
 0x107   :  { %1077 = vmatpush.msra.mxu2 %v308_v17  ;;  %1055 = vmatpush.msra.mxu1 %v252_v18  ;;  %v612_v33 = vld [vmem:[#allocation6 + $0xdf0] sm:$0xff] }
 0x108   :  { %1096 = vmatpush.msra.mxu3 %v376_v19  ;;  %1038 = vmatpush.msra.mxu0 %v176_v20  ;;  %v236_v34 = vld [vmem:[#allocation6 + $0x230] sm:$0xff]  ;;  %v723_v19 = vadd.f32 %v722_v16, %v697_v6  ;;  %v421_v6 = vld [vmem:[#allocation6 + $0x7f8] sm:$0xff] }
 0x109   :  { %1078 = vmatpush.msra.mxu2 %v304_v21  ;;  %1056 = vmatpush.msra.mxu1 %v248_v22  ;;  %v360_v35 = vld [vmem:[#allocation6 + $0x610] sm:$0xff] }
 0x10a   :  { %1097 = vmatpush.msra.mxu3 %v372_v23  ;;  %1039 = vmatpush.msra.mxu0 %v172_v24  ;;  %v480_v36 = vld [vmem:[#allocation6 + $0x9d0] sm:$0xff]  ;;  %v742_v24 = vpop.f32.mrf.mxu1 }
 0x10b   :  { %1079 = vmatpush.msra.mxu2 %v300_v25  ;;  %1057 = vmatpush.msra.mxu1 %v244_v26  ;;  %v608_v37 = vld [vmem:[#allocation6 + $0xdd0] sm:$0xff] }
 0x10c   :  { %1098 = vmatpush.msra.mxu3 %v368_v27  ;;  %1040 = vmatpush.msra.mxu0 %v168_v28  ;;  %v676_v38 = vld [vmem:[#allocation6 + $0xff0] sm:$0xff]  ;;  %v743_v27 = vadd.f32 %v742_v24, %v723_v19  ;;  %v762_v28 = vpop.f32.mrf.mxu2  ;;  %v289_v19 = vld [vmem:[#allocation6 + $0x3d8] sm:$0xff] }
 0x10d   :  { %1080 = vmatpush.msra.mxu2 %v296_v29  ;;  %1058 = vmatpush.msra.mxu1 %v240_v30  ;;  %v232_v39 = vld [vmem:[#allocation6 + $0x210] sm:$0xff] }
 0x10e   :  { %1099 = vmatpush.msra.mxu3 %v364_v31  ;;  %1105 = vmatpush.msrb.mxu0 %v484_v32  ;;  %v476_v40 = vld [vmem:[#allocation6 + $0x9b0] sm:$0xff]  ;;  %v763_v32 = vadd.f32 %v762_v28, %v743_v27  ;;  %v209_v28 = vld [vmem:[#allocation6 + $0x158] sm:$0xff] }
 0x10f   :  { %1145 = vmatpush.msrb.mxu2 %v612_v33  ;;  %1059 = vmatpush.msra.mxu1 %v236_v34  ;;  %v548_v41 = vld [vmem:[#allocation6 + $0xbf0] sm:$0xff] }
 0x110   :  { %1100 = vmatpush.msra.mxu3 %v360_v35  ;;  %1106 = vmatpush.msrb.mxu0 %v480_v36  ;;  %v604_v42 = vld [vmem:[#allocation6 + $0xdb0] sm:$0xff]  ;;  %v782_v35 = vpop.f32.mrf.mxu3 }
 0x111   :  { %1146 = vmatpush.msrb.mxu2 %v608_v37  ;;  %v672_v43 = vld [vmem:[#allocation6 + $0xfd0] sm:$0xff]  ;;  %1060 = vmatpush.msra.mxu1 %v232_v39  ;;  %v783_v37 = vadd.f32 %v782_v35, %v763_v32  ;;  %v205_v32 = vld [vmem:[#allocation6 + $0x138] sm:$0xff] }
 0x112   :  { %1165 = vmatpush.msrb.mxu3 %v676_v38  ;;  %v472_v44 = vld [vmem:[#allocation6 + $0x990] sm:$0xff]  ;;  %1107 = vmatpush.msrb.mxu0 %v476_v40 }
 0x113   :  { %v544_v45 = vld [vmem:[#allocation6 + $0xbd0] sm:$0xff]  ;;  %1125 = vmatpush.msrb.mxu1 %v548_v41  ;;  %1147 = vmatpush.msrb.mxu2 %v604_v42 }
 0x114   :  { %v600_v46 = vld [vmem:[#allocation6 + $0xd90] sm:$0xff]  ;;  %1166 = vmatpush.msrb.mxu3 %v672_v43  ;;  %1108 = vmatpush.msrb.mxu0 %v472_v44 }
 0x115   :  { %v668_v47 = vld [vmem:[#allocation6 + $0xfb0] sm:$0xff]  ;;  %1126 = vmatpush.msrb.mxu1 %v544_v45  ;;  %1148 = vmatpush.msrb.mxu2 %v600_v46 }
 0x116   :  { %v468_v49 = vld [vmem:[#allocation6 + $0x970] sm:$0xff]  ;;  %1167 = vmatpush.msrb.mxu3 %v668_v47  ;;  %1081 = vmatmul.f32.vlgmr.msra.gmra.mxu2 %v3225_v48 }
 0x117   :  { %v540_v50 = vld [vmem:[#allocation6 + $0xbb0] sm:$0xff]  ;;  %1109 = vmatpush.msrb.mxu0 %v468_v49  ;;  %1101 = vmatmul.f32.vlgmr.msra.gmra.mxu3 %v3231_v54 }
 0x118   :  { %v596_v51 = vld [vmem:[#allocation6 + $0xd70] sm:$0xff]  ;;  %1127 = vmatpush.msrb.mxu1 %v540_v50  ;;  %1041 = vmatmul.f32.vlgmr.msra.gmra.mxu0 %v3228_v52 }
 0x119   :  { %v664_v53 = vld [vmem:[#allocation6 + $0xf90] sm:$0xff]  ;;  %1149 = vmatpush.msrb.mxu2 %v596_v51  ;;  %1061 = vmatmul.f32.vlgmr.msra.gmra.mxu1 %v3235_v58 }
 0x11a   :  { %v464_v55 = vld [vmem:[#allocation6 + $0x950] sm:$0xff]  ;;  %1168 = vmatpush.msrb.mxu3 %v664_v53 }
 0x11b   :  { %v536_v56 = vld [vmem:[#allocation6 + $0xb90] sm:$0xff]  ;;  %1110 = vmatpush.msrb.mxu0 %v464_v55 }
 0x11c   :  { %v592_v57 = vld [vmem:[#allocation6 + $0xd50] sm:$0xff]  ;;  %1128 = vmatpush.msrb.mxu1 %v536_v56 }
 0x11d   :  { %v660_v59 = vld [vmem:[#allocation6 + $0xf70] sm:$0xff]  ;;  %1150 = vmatpush.msrb.mxu2 %v592_v57 }
 0x11e   :  { %v460_v60 = vld [vmem:[#allocation6 + $0x930] sm:$0xff]  ;;  %1169 = vmatpush.msrb.mxu3 %v660_v59  ;;  %v229_v59 = vld [vmem:[#allocation6 + $0x1f8] sm:$0xff] }
 0x11f   :  { %v532_v61 = vld [vmem:[#allocation6 + $0xb70] sm:$0xff]  ;;  %1111 = vmatpush.msrb.mxu0 %v460_v60  ;;  %v802_v41 = vpop.f32.mrf.mxu0  ;;  %v357_v60 = vld [vmem:[#allocation6 + $0x5f8] sm:$0xff] }
 0x120   :  { %v588_v63 = vld [vmem:[#allocation6 + $0xd30] sm:$0xff]  ;;  %1129 = vmatpush.msrb.mxu1 %v532_v61  ;;  %v803_v43 = vadd.f32 %v802_v41, %v783_v37 }
 0x121   :  { %v656_v0 = vld [vmem:[#allocation6 + $0xf50] sm:$0xff]  ;;  %1151 = vmatpush.msrb.mxu2 %v588_v63 }
 0x122   :  { %v456_v1 = vld [vmem:[#allocation6 + $0x910] sm:$0xff]  ;;  %1170 = vmatpush.msrb.mxu3 %v656_v0 }
 0x123   :  { %v528_v2 = vld [vmem:[#allocation6 + $0xb50] sm:$0xff]  ;;  %1112 = vmatpush.msrb.mxu0 %v456_v1 }
 0x124   :  { %v584_v3 = vld [vmem:[#allocation6 + $0xd10] sm:$0xff]  ;;  %1130 = vmatpush.msrb.mxu1 %v528_v2  ;;  %v225_v2 = vld [vmem:[#allocation6 + $0x1d8] sm:$0xff] }
 0x125   :  { %v652_v5 = vld [vmem:[#allocation6 + $0xf30] sm:$0xff]  ;;  %1152 = vmatpush.msrb.mxu2 %v584_v3 }
 0x126   :  { %v452_v7 = vld [vmem:[#allocation6 + $0x8f0] sm:$0xff]  ;;  %1171 = vmatpush.msrb.mxu3 %v652_v5  ;;  %v822_v51 = vpop.f32.mrf.mxu1  ;;  %v353_v5 = vld [vmem:[#allocation6 + $0x5d8] sm:$0xff] }
 0x127   :  { %v524_v9 = vld [vmem:[#allocation6 + $0xb30] sm:$0xff]  ;;  %1113 = vmatpush.msrb.mxu0 %v452_v7  ;;  %v842_v53 = vpop.f32.mrf.mxu2  ;;  %v823_v57 = vadd.f32 %v822_v51, %v803_v43 }
 0x128   :  { %v580_v11 = vld [vmem:[#allocation6 + $0xcf0] sm:$0xff]  ;;  %1131 = vmatpush.msrb.mxu1 %v524_v9  ;;  %v221_v9 = vld [vmem:[#allocation6 + $0x1b8] sm:$0xff] }
 0x129   :  { %v648_v12 = vld [vmem:[#allocation6 + $0xf10] sm:$0xff]  ;;  %1153 = vmatpush.msrb.mxu2 %v580_v11  ;;  %v843_v63 = vadd.f32 %v842_v53, %v823_v57  ;;  %v3136_v53 = vmov 2102212464  }
 0x12a   :  { %v448_v13 = vld [vmem:[#allocation6 + $0x8d0] sm:$0xff]  ;;  %1172 = vmatpush.msrb.mxu3 %v648_v12  ;;  %v862_v0 = vpop.f32.mrf.mxu3  ;;  %v349_v12 = vld [vmem:[#allocation6 + $0x5b8] sm:$0xff] }
 0x12b   :  { %v520_v14 = vld [vmem:[#allocation6 + $0xb10] sm:$0xff]  ;;  %1114 = vmatpush.msrb.mxu0 %v448_v13  ;;  %v3272_v3 = vadd.f32 %v862_v0, %v843_v63  ;;  %v293_v13 = vld [vmem:[#allocation6 + $0x3f8] sm:$0xff] }
 0x12c   :  { %v576_v17 = vld [vmem:[#allocation6 + $0xcd0] sm:$0xff]  ;;  %1132 = vmatpush.msrb.mxu1 %v520_v14  ;;  %v417_v14 = vld [vmem:[#allocation6 + $0x7d8] sm:$0xff] }
 0x12d   :  { %v644_v18 = vld [vmem:[#allocation6 + $0xef0] sm:$0xff]  ;;  %1154 = vmatpush.msrb.mxu2 %v576_v17  ;;  %v1348_v11 = vand.u32 2139095040, %v3272_v3  ;;  %v217_v17 = vld [vmem:[#allocation6 + $0x198] sm:$0xff]  ;;  %v1345_v24 = vand.u32 2147483647, %v3272_v3  ;;  %vm1347_vm12 = vcmp.lt.s32.totalorder %v3272_v3, 0 }
 0x12e   :  { %v444_v20 = vld [vmem:[#allocation6 + $0x8b0] sm:$0xff]  ;;  %1173 = vmatpush.msrb.mxu3 %v644_v18  ;;  %v345_v18 = vld [vmem:[#allocation6 + $0x598] sm:$0xff] }
 0x12f   :  { %v516_v21 = vld [vmem:[#allocation6 + $0xaf0] sm:$0xff]  ;;  %1115 = vmatpush.msrb.mxu0 %v444_v20  ;;  %v1349_v16 = vshrl.u32 %v1348_v11, 23  ;;  %v413_v20 = vld [vmem:[#allocation6 + $0x7b8] sm:$0xff]  ;;  %vm3405_vm13 = vcmp.le.f32.partialorder %v1345_v24, 0.7853982 }
 0x130   :  { %v572_v22 = vld [vmem:[#allocation6 + $0xcb0] sm:$0xff]  ;;  %1133 = vmatpush.msrb.mxu1 %v516_v21  ;;  %v193_v11 = vld [vmem:[#allocation6 + $0xd8] sm:$0xff] }
 0x131   :  { %v640_v23 = vld [vmem:[#allocation6 + $0xed0] sm:$0xff]  ;;  %1155 = vmatpush.msrb.mxu2 %v572_v22  ;;  %v2846_v21 = vadd.s32 4294967169, %v1349_v16  ;;  %v213_v22 = vld [vmem:[#allocation6 + $0x178] sm:$0xff] }
 0x132   :  { %v440_v25 = vld [vmem:[#allocation6 + $0x890] sm:$0xff]  ;;  %1174 = vmatpush.msrb.mxu3 %v640_v23  ;;  %v341_v23 = vld [vmem:[#allocation6 + $0x578] sm:$0xff] }
 0x133   :  { %v512_v26 = vld [vmem:[#allocation6 + $0xad0] sm:$0xff]  ;;  %1116 = vmatpush.msrb.mxu0 %v440_v25  ;;  %v285_v25 = vld [vmem:[#allocation6 + $0x3b8] sm:$0xff]  ;;  %v1355_v27 = vadd.s32 1, %v2846_v21 }
 0x134   :  { %v568_v29 = vld [vmem:[#allocation6 + $0xc90] sm:$0xff]  ;;  %1134 = vmatpush.msrb.mxu1 %v512_v26  ;;  %v409_v26 = vld [vmem:[#allocation6 + $0x798] sm:$0xff] }
 0x135   :  { %v636_v30 = vld [vmem:[#allocation6 + $0xeb0] sm:$0xff]  ;;  %1156 = vmatpush.msrb.mxu2 %v568_v29  ;;  %v281_v29 = vld [vmem:[#allocation6 + $0x398] sm:$0xff]  ;;  %vm1356_vm0 = vcmp.gt.s32.totalorder %v1355_v27, 0 }
 0x136   :  { %v436_v31 = vld [vmem:[#allocation6 + $0x870] sm:$0xff]  ;;  %1175 = vmatpush.msrb.mxu3 %v636_v30  ;;  %v337_v30 = vld [vmem:[#allocation6 + $0x558] sm:$0xff]  ;;  %v1357_v35 = vsel %vm1356_vm0, %v1355_v27, 0 }
 0x137   :  { %v508_v33 = vld [vmem:[#allocation6 + $0xab0] sm:$0xff]  ;;  %1117 = vmatpush.msrb.mxu0 %v436_v31  ;;  %v405_v31 = vld [vmem:[#allocation6 + $0x778] sm:$0xff]  ;;  %v1359_v37 = vand.u32 31, %v1357_v35 }
 0x138   :  { %v564_v34 = vld [vmem:[#allocation6 + $0xc70] sm:$0xff]  ;;  %1135 = vmatpush.msrb.mxu1 %v508_v33  ;;  %v277_v33 = vld [vmem:[#allocation6 + $0x378] sm:$0xff] }
 0x139   :  { %v632_v36 = vld [vmem:[#allocation6 + $0xe90] sm:$0xff]  ;;  %1157 = vmatpush.msrb.mxu2 %v564_v34  ;;  %v1352_v34 = vand.u32 8388607, %v1345_v24  ;;  %v3283_v41 = vsub.s32 32, %v1359_v37  ;;  %v265_v16 = vld [vmem:[#allocation6 + $0x318] sm:$0xff] }
 0x13a   :  { %v432_v38 = vld [vmem:[#allocation6 + $0x850] sm:$0xff]  ;;  %1176 = vmatpush.msrb.mxu3 %v632_v36  ;;  %v333_v36 = vld [vmem:[#allocation6 + $0x538] sm:$0xff] }
 0x13b   :  { %v504_v39 = vld [vmem:[#allocation6 + $0xa90] sm:$0xff]  ;;  %1118 = vmatpush.msrb.mxu0 %v432_v38  ;;  %v401_v38 = vld [vmem:[#allocation6 + $0x758] sm:$0xff]  ;;  %v1353_v51 = vor.u32 8388608, %v1352_v34  ;;  %v1369_v0 = vshrl.u32 %v3136_v53, %v3283_v41 }
 0x13c   :  { %v560_v40 = vld [vmem:[#allocation6 + $0xc50] sm:$0xff]  ;;  %1136 = vmatpush.msrb.mxu1 %v504_v39  ;;  %v3281_v39 = vshrl.u32 %v1357_v35, 5  ;;  %v389_v21 = vld [vmem:[#allocation6 + $0x6f8] sm:$0xff] }
 0x13d   :  { %v628_v42 = vld [vmem:[#allocation6 + $0xe70] sm:$0xff]  ;;  %1158 = vmatpush.msrb.mxu2 %v560_v40  ;;  %v201_v40 = vld [vmem:[#allocation6 + $0x118] sm:$0xff] }
 0x13e   :  { %v428_v44 = vld [vmem:[#allocation6 + $0x830] sm:$0xff]  ;;  %1177 = vmatpush.msrb.mxu3 %v628_v42  ;;  %v3133_v42 = vmov 683565275   ;;  %vm1377_vm1 = vcmp.lt.s32.totalorder %v3281_v39, 1  ;;  %vm1380_vm2 = vcmp.lt.s32.totalorder %v3281_v39, 4  ;;  %vm1379_vm3 = vcmp.lt.s32.totalorder %v3281_v39, 3 }
 0x13f   :  { %v500_v45 = vld [vmem:[#allocation6 + $0xa70] sm:$0xff]  ;;  %1119 = vmatpush.msrb.mxu0 %v428_v44  ;;  %v1362_v43 = vshll.u32 %v3133_v42, %v1359_v37  ;;  %v3134_v44 = vmov 2475754826   ;;  %vm1378_vm4 = vcmp.lt.s32.totalorder %v3281_v39, 2  ;;  %v317_v27 = vld [vmem:[#allocation6 + $0x4b8] sm:$0xff] }
 0x140   :  { %v556_v46 = vld [vmem:[#allocation6 + $0xc30] sm:$0xff]  ;;  %1137 = vmatpush.msrb.mxu1 %v500_v45  ;;  %v1365_v45 = vshll.u32 %v3134_v44, %v1359_v37  ;;  %v257_v34 = vld [vmem:[#allocation6 + $0x2d8] sm:$0xff] }
 0x141   :  { %v624_v47 = vld [vmem:[#allocation6 + $0xe50] sm:$0xff]  ;;  %1159 = vmatpush.msrb.mxu2 %v556_v46  ;;  %v3135_v46 = vmov 2131351028   ;;  %v313_v35 = vld [vmem:[#allocation6 + $0x498] sm:$0xff] }
 0x142   :  { %v424_v49 = vld [vmem:[#allocation6 + $0x810] sm:$0xff]  ;;  %1178 = vmatpush.msrb.mxu3 %v624_v47  ;;  %v1368_v47 = vshll.u32 %v3135_v46, %v1359_v37  ;;  %v1366_v63 = vshrl.u32 %v3135_v46, %v3283_v41 }
 0x143   :  { %v496_v50 = vld [vmem:[#allocation6 + $0xa50] sm:$0xff]  ;;  %1120 = vmatpush.msrb.mxu0 %v424_v49  ;;  %v273_v49 = vld [vmem:[#allocation6 + $0x358] sm:$0xff] }
 0x144   :  { %v552_v55 = vld [vmem:[#allocation6 + $0xc10] sm:$0xff]  ;;  %1138 = vmatpush.msrb.mxu1 %v496_v50  ;;  %1121 = vmatmul.f32.vlgmr.msrb.gmra.mxu0 %v3244_v8  ;;  %v329_v50 = vld [vmem:[#allocation6 + $0x518] sm:$0xff] }
 0x145   :  { %v620_v56 = vld [vmem:[#allocation6 + $0xe30] sm:$0xff]  ;;  %1160 = vmatpush.msrb.mxu2 %v552_v55  ;;  %1185 = vmatpush.msra.mxu0 %v229_v59  ;;  %v1371_v55 = vshll.u32 %v3136_v53, %v1359_v37  ;;  %v397_v59 = vld [vmem:[#allocation6 + $0x738] sm:$0xff] }
 0x146   :  { %v492_v61 = vld [vmem:[#allocation6 + $0xa30] sm:$0xff]  ;;  %1179 = vmatpush.msrb.mxu3 %v620_v56  ;;  %1161 = vmatmul.f32.vlgmr.msrb.gmra.mxu2 %v3241_v4  ;;  %v3137_v56 = vmov 920167782  }
 0x147   :  { %v616_v1 = vld [vmem:[#allocation6 + $0xe10] sm:$0xff]  ;;  %1225 = vmatpush.msra.mxu2 %v357_v60  ;;  %1139 = vmatpush.msrb.mxu1 %v492_v61  ;;  %v1374_v57 = vshll.u32 %v3137_v56, %v1359_v37  ;;  %v197_v60 = vld [vmem:[#allocation6 + $0xf8] sm:$0xff]  ;;  %v1363_v61 = vshrl.u32 %v3134_v44, %v3283_v41 }
 0x148   :  { %1180 = vmatpush.msrb.mxu3 %v616_v1  ;;  %v488_v7 = vld [vmem:[#allocation6 + $0xa10] sm:$0xff]  ;;  %1186 = vmatpush.msra.mxu0 %v225_v2  ;;  %v269_v1 = vld [vmem:[#allocation6 + $0x338] sm:$0xff] }
 0x149   :  { %1181 = vmatmul.f32.vlgmr.msrb.gmra.mxu3 %v3247_v10  ;;  %1226 = vmatpush.msra.mxu2 %v353_v5  ;;  %v325_v2 = vld [vmem:[#allocation6 + $0x4f8] sm:$0xff]  ;;  %v1372_v5 = vshrl.u32 %v3137_v56, %v3283_v41 }
 0x14a   :  { %1245 = vmatpush.msra.mxu3 %v421_v6  ;;  %1140 = vmatpush.msrb.mxu1 %v488_v7  ;;  %v3138_v6 = vmov 1326507024  }
 0x14b   :  { %1187 = vmatpush.msra.mxu0 %v221_v9  ;;  %1141 = vmatmul.f32.vlgmr.msrb.gmra.mxu1 %v3252_v15  ;;  %v1375_v7 = vshrl.u32 %v3138_v6, %v3283_v41  ;;  %v393_v9 = vld [vmem:[#allocation6 + $0x718] sm:$0xff] }
 0x14c   :  { %1227 = vmatpush.msra.mxu2 %v349_v12  ;;  %1205 = vmatpush.msra.mxu1 %v293_v13  ;;  %v3301_v12 = vor.u32 %v1363_v61, %v1362_v43  ;;  %v3303_v13 = vor.u32 %v1366_v63, %v1365_v45  ;;  %v381_v43 = vld [vmem:[#allocation6 + $0x6b8] sm:$0xff] }
 0x14d   :  { %1246 = vmatpush.msra.mxu3 %v417_v14  ;;  %1188 = vmatpush.msra.mxu0 %v217_v17  ;;  %v3305_v14 = vor.u32 %v1369_v0, %v1368_v47  ;;  %v321_v17 = vld [vmem:[#allocation6 + $0x4d8] sm:$0xff] }
 0x14e   :  { %1228 = vmatpush.msra.mxu2 %v345_v18  ;;  %1206 = vmatpush.msra.mxu1 %v289_v19  ;;  %v1373_v18 = vor.u32 %v1372_v5, %v1371_v55  ;;  %v1376_v19 = vor.u32 %v1375_v7, %v1374_v57  ;;  %v253_v55 = vld [vmem:[#allocation6 + $0x2b8] sm:$0xff] }
 0x14f   :  { %1247 = vmatpush.msra.mxu3 %v413_v20  ;;  %1189 = vmatpush.msra.mxu0 %v213_v22  ;;  %v3309_v20 = vshll.u32 %v1353_v51, 8  ;;  %v189_v22 = vld [vmem:[#allocation6 + $0xb8] sm:$0xff] }
 0x150   :  { %1229 = vmatpush.msra.mxu2 %v341_v23  ;;  %1207 = vmatpush.msra.mxu1 %v285_v25  ;;  %v1385_v23 = vsel %vm1377_vm1, %v3301_v12, %v3303_v13  ;;  %v1389_v25 = vsel %vm1377_vm1, %v3303_v13, %v3305_v14  ;;  %v181_v51 = vld [vmem:[#allocation6 + $0x78] sm:$0xff] }
 0x151   :  { %1248 = vmatpush.msra.mxu3 %v409_v26  ;;  %1190 = vmatpush.msra.mxu0 %v209_v28  ;;  %v261_v26 = vld [vmem:[#allocation6 + $0x2f8] sm:$0xff]  ;;  %v1386_v28 = vsel %vm1380_vm2, %v1373_v18, 920167782 }
 0x152   :  { %1230 = vmatpush.msra.mxu2 %v337_v30  ;;  %1208 = vmatpush.msra.mxu1 %v281_v29  ;;  %v1390_v29 = vsel %vm1380_vm2, %v1376_v19, 1326507024  ;;  %v385_v30 = vld [vmem:[#allocation6 + $0x6d8] sm:$0xff] }
 0x153   :  { %1249 = vmatpush.msra.mxu3 %v405_v31  ;;  %1191 = vmatpush.msra.mxu0 %v205_v32  ;;  %v185_v31 = vld [vmem:[#allocation6 + $0x98] sm:$0xff]  ;;  %v1387_v32 = vsel %vm1379_vm3, %v3305_v14, %v1386_v28 }
 0x154   :  { %1231 = vmatpush.msra.mxu2 %v333_v36  ;;  %1209 = vmatpush.msra.mxu1 %v277_v33  ;;  %v1391_v33 = vsel %vm1379_vm3, %v1373_v18, %v1390_v29  ;;  %v1388_v36 = vsel %vm1378_vm4, %v1385_v23, %v1387_v32  ;;  %v309_v57 = vld [vmem:[#allocation6 + $0x478] sm:$0xff]  ;;  %v3139_v29 = vmov 0  }
 0x155   :  { %1250 = vmatpush.msra.mxu3 %v401_v38  ;;  %1192 = vmatpush.msra.mxu0 %v201_v40  ;;  %v1392_v37 = vsel %vm1378_vm4, %v1389_v25, %v1391_v33  ;;  %v1394_v38 = vand.u32 65535, %v3309_v20  ;;  %v1395_v40 = vshrl.u32 %v3309_v20, 16  ;;  %v377_v61 = vld [vmem:[#allocation6 + $0x698] sm:$0xff] }
 0x156   :  { %1210 = vmatpush.msra.mxu1 %v273_v49  ;;  %1232 = vmatpush.msra.mxu2 %v329_v50  ;;  %v1396_v45 = vand.u32 65535, %v1392_v37  ;;  %v1397_v47 = vshrl.u32 %v1392_v37, 16  ;;  %v1418_v49 = vand.u32 65535, %v1388_v36  ;;  %v1419_v50 = vshrl.u32 %v1388_v36, 16  ;;  %v177_v63 = vld [vmem:[#allocation6 + $0x58] sm:$0xff] }
 0x157   :  { %1251 = vmatpush.msra.mxu3 %v397_v59  ;;  %1193 = vmatpush.msra.mxu0 %v197_v60  ;;  %v305_v5 = vld [vmem:[#allocation6 + $0x458] sm:$0xff] }
 0x158   :  { %1211 = vmatpush.msra.mxu1 %v269_v1  ;;  %1233 = vmatpush.msra.mxu2 %v325_v2  ;;  %v3335_v59 = vmul.u32 %v1397_v47, %v1394_v38  ;;  %v3337_v60 = vmul.u32 %v1396_v45, %v1395_v40  ;;  %v3339_v0 = vmul.u32 %v1419_v50, %v1394_v38  ;;  %v249_v2 = vld [vmem:[#allocation6 + $0x298] sm:$0xff] }
 0x159   :  { %1252 = vmatpush.msra.mxu3 %v393_v9  ;;  %1194 = vmatpush.msra.mxu0 %v193_v11  ;;  %v3341_v1 = vmul.u32 %v1418_v49, %v1395_v40  ;;  %v1398_v7 = vmul.u32 %v1396_v45, %v1394_v38  ;;  %v373_v11 = vld [vmem:[#allocation6 + $0x678] sm:$0xff]  ;;  %v1420_v18 = vmul.u32 %v1418_v49, %v1394_v38 }
 0x15a   :  { %1212 = vmatpush.msra.mxu1 %v265_v16  ;;  %1234 = vmatpush.msra.mxu2 %v321_v17  ;;  %v1402_v9 = vshll.u32 %v3335_v59, 16  ;;  %v173_v16 = vld [vmem:[#allocation6 + $0x38] sm:$0xff]  ;;  %v1401_v17 = vmul.u32 %v1397_v47, %v1395_v40  ;;  %v1404_v23 = vshll.u32 %v3337_v60, 16 }
 0x15b   :  { %1253 = vmatpush.msra.mxu3 %v389_v21  ;;  %1195 = vmatpush.msra.mxu0 %v189_v22  ;;  %v245_v19 = vld [vmem:[#allocation6 + $0x278] sm:$0xff]  ;;  %v1424_v22 = vshll.u32 %v3339_v0, 16  ;;  %v1426_v33 = vshll.u32 %v3341_v1, 16 }
 0x15c   :  { %1213 = vmatpush.msra.mxu1 %v261_v26  ;;  %1235 = vmatpush.msra.mxu2 %v317_v27  ;;  %v301_v21 = vld [vmem:[#allocation6 + $0x438] sm:$0xff]  ;;  %vm1406_vm5 = vc.u32 %v1398_v7, %v1402_v9  ;;  %v1408_v25 = vadd.s32 %v1402_v9, %v1398_v7  ;;  %v1423_v26 = vmul.u32 %v1419_v50, %v1395_v40 }
 0x15d   :  { %1254 = vmatpush.msra.mxu3 %v385_v30  ;;  %1196 = vmatpush.msra.mxu0 %v185_v31  ;;  %v369_v27 = vld [vmem:[#allocation6 + $0x658] sm:$0xff]  ;;  %v1407_v30 = vsel %vm1406_vm5, 1, %v3139_v29  ;;  %vm1428_vm6 = vc.u32 %v1420_v18, %v1424_v22 }
 0x15e   :  { %1214 = vmatpush.msra.mxu1 %v257_v34  ;;  %1236 = vmatpush.msra.mxu2 %v313_v35  ;;  %v169_v28 = vld [vmem:[#allocation6 + $0x18] sm:$0xff]  ;;  %v1430_v34 = vadd.s32 %v1424_v22, %v1420_v18  ;;  %v1361_v35 = vshrl.u32 %v3133_v42, %v3283_v41  ;;  %v1409_v36 = vadd.s32 %v1407_v30, %v1401_v17  ;;  %v1429_v40 = vsel %vm1428_vm6, 1, %v3139_v29 }
 0x15f   :  { %1255 = vmatpush.msra.mxu3 %v381_v43  ;;  %1197 = vmatpush.msra.mxu0 %v181_v51  ;;  %v241_v31 = vld [vmem:[#allocation6 + $0x258] sm:$0xff]  ;;  %vm1410_vm7 = vc.u32 %v1408_v25, %v1404_v23  ;;  %v1382_v43 = vsel %vm1380_vm2, %v3305_v14, 2102212464  ;;  %v1431_v50 = vadd.s32 %v1429_v40, %v1423_v26 }
 0x160   :  { %1215 = vmatpush.msra.mxu1 %v253_v55  ;;  %1237 = vmatpush.msra.mxu2 %v309_v57  ;;  %v297_v32 = vld [vmem:[#allocation6 + $0x418] sm:$0xff]  ;;  %v1411_v49 = vsel %vm1410_vm7, 1, %v3139_v29  ;;  %vm1432_vm8 = vc.u32 %v1430_v34, %v1426_v33  ;;  %v1403_v55 = vshrl.u32 %v3335_v59, 16  ;;  %v1381_v7 = vsel %vm1377_vm1, %v1361_v35, %v3301_v12 }
 0x161   :  { %1256 = vmatpush.msra.mxu3 %v377_v61  ;;  %1198 = vmatpush.msra.mxu0 %v177_v63  ;;  %v365_v37 = vld [vmem:[#allocation6 + $0x638] sm:$0xff]  ;;  %v1413_v57 = vadd.s32 %v1411_v49, %v1409_v36  ;;  %v1433_v61 = vsel %vm1432_vm8, 1, %v3139_v29  ;;  %v1383_v9 = vsel %vm1379_vm3, %v3303_v13, %v1382_v43  ;;  %v3368_v13 = vadd.s32 %v1430_v34, %v1426_v33 }
 0x162   :  { %1216 = vmatpush.msra.mxu1 %v249_v2  ;;  %1238 = vmatpush.msra.mxu2 %v305_v5  ;;  %v485_v38 = vld [vmem:[#allocation6 + $0x9f8] sm:$0xff]  ;;  %v1425_v2 = vshrl.u32 %v3339_v0, 16  ;;  %v1435_v5 = vadd.s32 %v1433_v61, %v1431_v50  ;;  %v1384_v25 = vsel %vm1378_vm4, %v1381_v7, %v1383_v9  ;;  %v698_v50 = vperm.slane %v3264_v62, 1 }
 0x163   :  { %1257 = vmatpush.msra.mxu3 %v373_v11  ;;  %1199 = vmatpush.msra.mxu0 %v173_v16  ;;  %v613_v45 = vld [vmem:[#allocation6 + $0xdf8] sm:$0xff]  ;;  %v1405_v16 = vshrl.u32 %v3337_v60, 16  ;;  %v1414_v17 = vadd.s32 %v1413_v57, %v1403_v55  ;;  %v1438_v39 = vmul.u32 %v3309_v20, %v1384_v25  ;;  %v922_v25 = vpop.f32.mrf.mxu2 }
 0x164   :  { %1217 = vmatpush.msra.mxu1 %v245_v19  ;;  %1239 = vmatpush.msra.mxu2 %v301_v21  ;;  %v237_v47 = vld [vmem:[#allocation6 + $0x238] sm:$0xff]  ;;  %v1427_v19 = vshrl.u32 %v3341_v1, 16  ;;  %v1436_v21 = vadd.s32 %v1435_v5, %v1425_v2  ;;  %v882_v5 = vpop.f32.mrf.mxu0 }
 0x165   :  { %1258 = vmatpush.msra.mxu3 %v369_v27  ;;  %1200 = vmatpush.msra.mxu0 %v169_v28  ;;  %v361_v41 = vld [vmem:[#allocation6 + $0x618] sm:$0xff]  ;;  %v3366_v23 = vadd.s32 %v1414_v17, %v1405_v16  ;;  %v883_v9 = vadd.f32 %v882_v5, %v698_v50 }
 0x166   :  { %1218 = vmatpush.msra.mxu1 %v241_v31  ;;  %1240 = vmatpush.msra.mxu2 %v297_v32  ;;  %v481_v51 = vld [vmem:[#allocation6 + $0x9d8] sm:$0xff]  ;;  %v1437_v27 = vadd.s32 %v1436_v21, %v1427_v19 }
 0x167   :  { %1259 = vmatpush.msra.mxu3 %v365_v37  ;;  %1265 = vmatpush.msrb.mxu0 %v485_v38  ;;  %v609_v14 = vld [vmem:[#allocation6 + $0xdd8] sm:$0xff]  ;;  %vm1440_vm9 = vc.u32 %v3366_v23, %v3368_v13 }
 0x168   :  { %v677_v63 = vld [vmem:[#allocation6 + $0xff8] sm:$0xff]  ;;  %1305 = vmatpush.msrb.mxu2 %v613_v45  ;;  %1219 = vmatpush.msra.mxu1 %v237_v47  ;;  %v1441_v32 = vadd.s32 1, %v1437_v27 }
 0x169   :  { %v233_v59 = vld [vmem:[#allocation6 + $0x218] sm:$0xff]  ;;  %1260 = vmatpush.msra.mxu3 %v361_v41  ;;  %1266 = vmatpush.msrb.mxu0 %v481_v51 }
 0x16a   :  { %v477_v11 = vld [vmem:[#allocation6 + $0x9b8] sm:$0xff]  ;;  %1306 = vmatpush.msrb.mxu2 %v609_v14  ;;  %1220 = vmatpush.msra.mxu1 %v233_v59  ;;  %v1442_v37 = vsel %vm1440_vm9, %v1441_v32, %v1437_v27  ;;  %v942_v32 = vpop.f32.mrf.mxu3 }
 0x16b   :  { %v549_v18 = vld [vmem:[#allocation6 + $0xbf8] sm:$0xff]  ;;  %1325 = vmatpush.msrb.mxu3 %v677_v63  ;;  %1267 = vmatpush.msrb.mxu0 %v477_v11  ;;  %v1443_v43 = vadd.s32 %v1442_v37, %v1438_v39 }
 0x16c   :  { %v605_v0 = vld [vmem:[#allocation6 + $0xdb8] sm:$0xff]  ;;  %1285 = vmatpush.msrb.mxu1 %v549_v18  ;;  %1241 = vmatmul.f32.vlgmr.msra.gmra.mxu2 %v3225_v48 }
 0x16d   :  { %v673_v12 = vld [vmem:[#allocation6 + $0xfd8] sm:$0xff]  ;;  %1307 = vmatpush.msrb.mxu2 %v605_v0  ;;  %v1444_v41 = vadd.s32 536870912, %v1443_v43  ;;  %v902_v0 = vpop.f32.mrf.mxu1  ;;  %1201 = vmatmul.f32.vlgmr.msra.gmra.mxu0 %v3228_v52 }
 0x16e   :  { %v473_v22 = vld [vmem:[#allocation6 + $0x998] sm:$0xff]  ;;  %1326 = vmatpush.msrb.mxu3 %v673_v12  ;;  %1221 = vmatmul.f32.vlgmr.msra.gmra.mxu1 %v3235_v58 }
 0x16f   :  { %v545_v60 = vld [vmem:[#allocation6 + $0xbd8] sm:$0xff]  ;;  %1268 = vmatpush.msrb.mxu0 %v473_v22  ;;  %v3376_v14 = vshrl.u32 %v1444_v41, 30  ;;  %v903_v22 = vadd.f32 %v902_v0, %v883_v9  ;;  %1261 = vmatmul.f32.vlgmr.msra.gmra.mxu3 %v3231_v54 }
 0x170   :  { %v601_v26 = vld [vmem:[#allocation6 + $0xd98] sm:$0xff]  ;;  %1286 = vmatpush.msrb.mxu1 %v545_v60 }
 0x171   :  { %v669_v1 = vld [vmem:[#allocation6 + $0xfb8] sm:$0xff]  ;;  %1308 = vmatpush.msrb.mxu2 %v601_v26  ;;  %v1446_v59 = vshll.u32 %v3376_v14, 30 }
 0x172   :  { %v469_v28 = vld [vmem:[#allocation6 + $0x978] sm:$0xff]  ;;  %1327 = vmatpush.msrb.mxu3 %v669_v1 }
 0x173   :  { %v541_v30 = vld [vmem:[#allocation6 + $0xbb8] sm:$0xff]  ;;  %1269 = vmatpush.msrb.mxu0 %v469_v28  ;;  %v3379_v19 = vsub.s32 %v1443_v43, %v1446_v59 }
 0x174   :  { %v597_v31 = vld [vmem:[#allocation6 + $0xd78] sm:$0xff]  ;;  %1287 = vmatpush.msrb.mxu1 %v541_v30  ;;  %v923_v30 = vadd.f32 %v922_v25, %v903_v22 }
 0x175   :  { %v665_v33 = vld [vmem:[#allocation6 + $0xf98] sm:$0xff]  ;;  %1309 = vmatpush.msrb.mxu2 %v597_v31  ;;  %vm1448_vm10 = vcmp.lt.s32.totalorder %v3379_v19, 0  ;;  %v1449_v27 = vsub.s32 0, %v3379_v19 }
 0x176   :  { %v465_v34 = vld [vmem:[#allocation6 + $0x958] sm:$0xff]  ;;  %1328 = vmatpush.msrb.mxu3 %v665_v33 }
 0x177   :  { %v537_v35 = vld [vmem:[#allocation6 + $0xb98] sm:$0xff]  ;;  %1270 = vmatpush.msrb.mxu0 %v465_v34  ;;  %v1450_v39 = vsel %vm1448_vm10, %v1449_v27, %v3379_v19  ;;  %vm1488_vm10 = vweird.f32 %v3272_v3 }
 0x178   :  { %v593_v36 = vld [vmem:[#allocation6 + $0xd58] sm:$0xff]  ;;  %1288 = vmatpush.msrb.mxu1 %v537_v35  ;;  %v943_v35 = vadd.f32 %v942_v32, %v923_v30 }
 0x179   :  { %v661_v38 = vld [vmem:[#allocation6 + $0xf78] sm:$0xff]  ;;  %1310 = vmatpush.msrb.mxu2 %v593_v36  ;;  %v1451_v36 = vclz %v1450_v39  ;;  %v1469_v39 = vsub.s32 4, %v3376_v14 }
 0x17a   :  { %v461_v40 = vld [vmem:[#allocation6 + $0x938] sm:$0xff]  ;;  %1329 = vmatpush.msrb.mxu3 %v661_v38 }
 0x17b   :  { %v533_v45 = vld [vmem:[#allocation6 + $0xb78] sm:$0xff]  ;;  %1271 = vmatpush.msrb.mxu0 %v461_v40  ;;  %v962_v40 = vpop.f32.mrf.mxu0  ;;  %v2847_v43 = vadd.s32 4294967294, %v1451_v36  ;;  %v1985_v36 = vld [vmem:[#allocation9 + $0xa0] sm:$0xff] }
 0x17c   :  { %v589_v47 = vld [vmem:[#allocation6 + $0xd38] sm:$0xff]  ;;  %1289 = vmatpush.msrb.mxu1 %v533_v45 }
 0x17d   :  { %v657_v20 = vld [vmem:[#allocation6 + $0xf58] sm:$0xff]  ;;  %1311 = vmatpush.msrb.mxu2 %v589_v47  ;;  %vm2848_vm11 = vcmp.lt.s32.totalorder %v2847_v43, 0 }
 0x17e   :  { %v457_v49 = vld [vmem:[#allocation6 + $0x918] sm:$0xff]  ;;  %1330 = vmatpush.msrb.mxu3 %v657_v20  ;;  %v963_v20 = vadd.f32 %v962_v40, %v943_v35 }
 0x17f   :  { %v529_v51 = vld [vmem:[#allocation6 + $0xb58] sm:$0xff]  ;;  %1272 = vmatpush.msrb.mxu0 %v457_v49 }
 0x180   :  { %v585_v55 = vld [vmem:[#allocation6 + $0xd18] sm:$0xff]  ;;  %1290 = vmatpush.msrb.mxu1 %v529_v51  ;;  %v1454_v51 = vsel %vm2848_vm11, 0, %v2847_v43 }
 0x181   :  { %v653_v57 = vld [vmem:[#allocation6 + $0xf38] sm:$0xff]  ;;  %1312 = vmatpush.msrb.mxu2 %v585_v55  ;;  %v1459_v5 = vsub.s32 4294967266, %v1454_v51  ;;  %v1456_v59 = vshll.u32 %v3379_v19, %v1454_v51  ;;  %v1993_v19 = vld [vmem:[#allocation9 + $0xe0] sm:$0xff] }
 0x182   :  { %v453_v61 = vld [vmem:[#allocation6 + $0x8f8] sm:$0xff]  ;;  %1331 = vmatpush.msrb.mxu3 %v653_v57  ;;  %v982_v57 = vpop.f32.mrf.mxu1 }
 0x183   :  { %v525_v63 = vld [vmem:[#allocation6 + $0xb38] sm:$0xff]  ;;  %1273 = vmatpush.msrb.mxu0 %v453_v61  ;;  %v1002_v61 = vpop.f32.mrf.mxu2  ;;  %v983_v52 = vadd.f32 %v982_v57, %v963_v20 }
 0x184   :  { %v581_v2 = vld [vmem:[#allocation6 + $0xcf8] sm:$0xff]  ;;  %1291 = vmatpush.msrb.mxu1 %v525_v63  ;;  %v1439_v63 = vadd.s32 %v3368_v13, %v3366_v23  ;;  %v1022_v13 = vpop.f32.mrf.mxu3 }
 0x185   :  { %v649_v7 = vld [vmem:[#allocation6 + $0xf18] sm:$0xff]  ;;  %1313 = vmatpush.msrb.mxu2 %v581_v2  ;;  %v1455_v2 = vsub.s32 32, %v1454_v51  ;;  %v1003_v23 = vadd.f32 %v1002_v61, %v983_v52 }
 0x186   :  { %v449_v62 = vld [vmem:[#allocation6 + $0x8d8] sm:$0xff]  ;;  %1332 = vmatpush.msrb.mxu3 %v649_v7 }
 0x187   :  { %v521_v11 = vld [vmem:[#allocation6 + $0xb18] sm:$0xff]  ;;  %1274 = vmatpush.msrb.mxu0 %v449_v62  ;;  %v3391_v22 = vadd.f32 %v1022_v13, %v1003_v23 }
 0x188   :  { %v577_v16 = vld [vmem:[#allocation6 + $0xcd8] sm:$0xff]  ;;  %1292 = vmatpush.msrb.mxu1 %v521_v11  ;;  %v1457_v11 = vshrl.u32 %v1439_v63, %v1455_v2 }
 0x189   :  { %v645_v17 = vld [vmem:[#allocation6 + $0xef8] sm:$0xff]  ;;  %1314 = vmatpush.msrb.mxu2 %v577_v16  ;;  %v1460_v16 = vadd.s32 127, %v1459_v5  ;;  %v1500_v30 = vand.u32 2147483647, %v3391_v22 }
 0x18a   :  { %v445_v18 = vld [vmem:[#allocation6 + $0x8b8] sm:$0xff]  ;;  %1333 = vmatpush.msrb.mxu3 %v645_v17 }
 0x18b   :  { %v517_v21 = vld [vmem:[#allocation6 + $0xaf8] sm:$0xff]  ;;  %1275 = vmatpush.msrb.mxu0 %v445_v18 }
 0x18c   :  { %v573_v12 = vld [vmem:[#allocation6 + $0xcb8] sm:$0xff]  ;;  %1293 = vmatpush.msrb.mxu1 %v517_v21  ;;  %v1458_v21 = vor.u32 %v1457_v11, %v1456_v59 }
 0x18d   :  { %v641_v60 = vld [vmem:[#allocation6 + $0xed8] sm:$0xff]  ;;  %1315 = vmatpush.msrb.mxu2 %v573_v12  ;;  %v1461_v12 = vshll.u32 %v1460_v16, 23  ;;  %v1977_v16 = vld [vmem:[#allocation9 + $0x60] sm:$0xff] }
 0x18e   :  { %v441_v26 = vld [vmem:[#allocation6 + $0x898] sm:$0xff]  ;;  %1334 = vmatpush.msrb.mxu3 %v641_v60 }
 0x18f   :  { %v513_v1 = vld [vmem:[#allocation6 + $0xad8] sm:$0xff]  ;;  %1276 = vmatpush.msrb.mxu0 %v441_v26  ;;  %v1462_v25 = vor.u32 4788187, %v1461_v12  ;;  %v1503_v26 = vand.u32 2139095040, %v3391_v22 }
 0x190   :  { %v569_v28 = vld [vmem:[#allocation6 + $0xc98] sm:$0xff]  ;;  %1294 = vmatpush.msrb.mxu1 %v513_v1 }
 0x191   :  { %v637_v31 = vld [vmem:[#allocation6 + $0xeb8] sm:$0xff]  ;;  %1316 = vmatpush.msrb.mxu2 %v569_v28  ;;  %v1463_v1 = vand.u32 2147483647, %v1462_v25  ;;  %v1465_v28 = vcvt.s32.f32 %v1458_v21 }
 0x192   :  { %v437_v33 = vld [vmem:[#allocation6 + $0x878] sm:$0xff]  ;;  %1335 = vmatpush.msrb.mxu3 %v637_v31  ;;  %v1504_v31 = vshrl.u32 %v1503_v26, 23 }
 0x193   :  { %v509_v34 = vld [vmem:[#allocation6 + $0xab8] sm:$0xff]  ;;  %1277 = vmatpush.msrb.mxu0 %v437_v33  ;;  %v1466_v32 = vmul.f32 %v1465_v28, %v1463_v1 }
 0x194   :  { %v565_v37 = vld [vmem:[#allocation6 + $0xc78] sm:$0xff]  ;;  %1295 = vmatpush.msrb.mxu1 %v509_v34  ;;  %v2849_v33 = vadd.s32 4294967169, %v1504_v31 }
 0x195   :  { %v633_v38 = vld [vmem:[#allocation6 + $0xe98] sm:$0xff]  ;;  %1317 = vmatpush.msrb.mxu2 %v565_v37 }
 0x196   :  { %v433_v45 = vld [vmem:[#allocation6 + $0x858] sm:$0xff]  ;;  %1336 = vmatpush.msrb.mxu3 %v633_v38  ;;  %v1510_v35 = vadd.s32 1, %v2849_v33 }
 0x197   :  { %v505_v47 = vld [vmem:[#allocation6 + $0xa98] sm:$0xff]  ;;  %1278 = vmatpush.msrb.mxu0 %v433_v45 }
 0x198   :  { %v561_v49 = vld [vmem:[#allocation6 + $0xc58] sm:$0xff]  ;;  %1296 = vmatpush.msrb.mxu1 %v505_v47  ;;  %vm1511_vm14 = vcmp.gt.s32.totalorder %v1510_v35, 0 }
 0x199   :  { %v629_v50 = vld [vmem:[#allocation6 + $0xe78] sm:$0xff]  ;;  %1318 = vmatpush.msrb.mxu2 %v561_v49  ;;  %v1512_v43 = vsel %vm1511_vm14, %v1510_v35, 0  ;;  %vm1502_vm14 = vcmp.lt.s32.totalorder %v3391_v22, 0 }
 0x19a   :  { %v429_v41 = vld [vmem:[#allocation6 + $0x838] sm:$0xff]  ;;  %1337 = vmatpush.msrb.mxu3 %v629_v50  ;;  %v1514_v20 = vand.u32 31, %v1512_v43  ;;  %v1981_v50 = vld [vmem:[#allocation9 + $0x80] sm:$0xff] }
 0x19b   :  { %v501_v48 = vld [vmem:[#allocation6 + $0xa78] sm:$0xff]  ;;  %1279 = vmatpush.msrb.mxu0 %v429_v41 }
 0x19c   :  { %v557_v55 = vld [vmem:[#allocation6 + $0xc38] sm:$0xff]  ;;  %1297 = vmatpush.msrb.mxu1 %v501_v48  ;;  %v3424_v51 = vsub.s32 32, %v1514_v20  ;;  %v1517_v48 = vshll.u32 %v3133_v42, %v1514_v20  ;;  %v1523_v57 = vshll.u32 %v3135_v46, %v1514_v20  ;;  %v1526_v61 = vshll.u32 %v3136_v53, %v1514_v20 }
 0x19d   :  { %v625_v7 = vld [vmem:[#allocation6 + $0xe58] sm:$0xff]  ;;  %1319 = vmatpush.msrb.mxu2 %v557_v55  ;;  %v1520_v55 = vshll.u32 %v3134_v44, %v1514_v20  ;;  %v1529_v63 = vshll.u32 %v3137_v56, %v1514_v20 }
 0x19e   :  { %v425_v62 = vld [vmem:[#allocation6 + $0x818] sm:$0xff]  ;;  %1338 = vmatpush.msrb.mxu3 %v625_v7  ;;  %v1521_v52 = vshrl.u32 %v3135_v46, %v3424_v51  ;;  %v1527_v59 = vshrl.u32 %v3137_v56, %v3424_v51  ;;  %v1530_v11 = vshrl.u32 %v3138_v6, %v3424_v51 }
 0x19f   :  { %v497_v54 = vld [vmem:[#allocation6 + $0xa58] sm:$0xff]  ;;  %1280 = vmatpush.msrb.mxu0 %v425_v62  ;;  %v1518_v62 = vshrl.u32 %v3134_v44, %v3424_v51 }
 0x1a0   :  { %v553_v9 = vld [vmem:[#allocation6 + $0xc18] sm:$0xff]  ;;  %1298 = vmatpush.msrb.mxu1 %v497_v54  ;;  %1281 = vmatmul.f32.vlgmr.msrb.gmra.mxu0 %v3244_v8  ;;  %v1467_v8 = vxor.u32 2147483648, %v1466_v32  ;;  %v1524_v54 = vshrl.u32 %v3136_v53, %v3424_v51  ;;  %v3448_v23 = vor.u32 %v1521_v52, %v1520_v55  ;;  %v1531_v21 = vor.u32 %v1530_v11, %v1529_v63 }
 0x1a1   :  { %v621_v17 = vld [vmem:[#allocation6 + $0xe38] sm:$0xff]  ;;  %1320 = vmatpush.msrb.mxu2 %v553_v9 }
 0x1a2   :  { %v1995_v18 = vld [vmem:[#allocation9 + $0xf0] sm:$0xff]  ;;  %1339 = vmatpush.msrb.mxu3 %v621_v17  ;;  %1321 = vmatmul.f32.vlgmr.msrb.gmra.mxu2 %v3241_v4  ;;  %v1989_v4 = vld [vmem:[#allocation9 + $0xc0] sm:$0xff]  ;;  %v1468_v38 = vsel %vm1347_vm12, %v1467_v8, %v1466_v32  ;;  %v3446_v17 = vor.u32 %v1518_v62, %v1517_v48  ;;  %v3450_v13 = vor.u32 %v1524_v54, %v1523_v57 }
 0x1a3   :  { %v493_v0 = vld [vmem:[#allocation6 + $0xa38] sm:$0xff]  ;;  %2099 = vmatpush.msra.mxu0 %v1995_v18  ;;  %v3413_v40 = vsel %vm3405_vm13, %v3272_v3, %v1468_v38  ;;  %v1965_v54 = vld [vmem:[#allocation9] sm:$0xff] }
 0x1a4   :  { %v617_v58 = vld [vmem:[#allocation6 + $0xe18] sm:$0xff]  ;;  %1299 = vmatpush.msrb.mxu1 %v493_v0  ;;  %v3417_v47 = vmul.f32 %v3413_v40, %v3413_v40  ;;  %v1528_v0 = vor.u32 %v1527_v59, %v1526_v61  ;;  %v2021_v59 = vld [vmem:[#allocation9 + $0x1c0] sm:$0xff] }
 0x1a5   :  { %v489_v60 = vld [vmem:[#allocation6 + $0xa18] sm:$0xff]  ;;  %1340 = vmatpush.msrb.mxu3 %v617_v58  ;;  %2100 = vmatpush.msra.mxu0 %v1993_v19 }
 0x1a6   :  { %v1991_v27 = vld [vmem:[#allocation9 + $0xd0] sm:$0xff]  ;;  %1341 = vmatmul.f32.vlgmr.msrb.gmra.mxu3 %v3247_v10  ;;  %1300 = vmatpush.msrb.mxu1 %v489_v60  ;;  %v1507_v10 = vand.u32 8388607, %v1500_v30  ;;  %v1474_v41 = vmul.f32 -0.001358992, %v3417_v47 }
 0x1a7   :  { %1301 = vmatmul.f32.vlgmr.msrb.gmra.mxu1 %v3252_v15  ;;  %2101 = vmatpush.msra.mxu0 %v1991_v27  ;;  %v1987_v34 = vld [vmem:[#allocation9 + $0xb0] sm:$0xff]  ;;  %v1470_v15 = vsel %vm1347_vm12, %v1469_v39, %v3376_v14  ;;  %v3421_v14 = vshrl.u32 %v1512_v43, 5  ;;  %v1481_v5 = vmul.f32 -0.00019511016, %v3417_v47  ;;  %v1973_v27 = vld [vmem:[#allocation9 + $0x40] sm:$0xff] }
 0x1a8   :  { %v1983_v45 = vld [vmem:[#allocation9 + $0x90] sm:$0xff]  ;;  %v1508_v24 = vor.u32 8388608, %v1507_v10  ;;  %v1472_v49 = vsel %vm3405_vm13, 0, %v1470_v15  ;;  %v1475_v18 = vadd.f32 0.041655596, %v1474_v41 }
 0x1a9   :  { %2102 = vmatpush.msra.mxu0 %v1989_v4  ;;  %v1979_v2 = vld [vmem:[#allocation9 + $0x70] sm:$0xff]  ;;  %v1489_v7 = vadd.s32 3, %v1472_v49  ;;  %vm1532_vm15 = vcmp.lt.s32.totalorder %v3421_v14, 1  ;;  %vm1535_vm0 = vcmp.lt.s32.totalorder %v3421_v14, 4  ;;  %vm1534_vm1 = vcmp.lt.s32.totalorder %v3421_v14, 3  ;;  %v2025_v49 = vld [vmem:[#allocation9 + $0x1e0] sm:$0xff] }
 0x1aa   :  { %v3438_v9 = vshll.u32 %v1508_v24, 8  ;;  %v1975_v12 = vld [vmem:[#allocation9 + $0x50] sm:$0xff]  ;;  %v1482_v58 = vadd.f32 0.008332121, %v1481_v5  ;;  %vm1533_vm2 = vcmp.lt.s32.totalorder %v3421_v14, 2  ;;  %v1540_v19 = vsel %vm1532_vm15, %v3446_v17, %v3448_v23 }
 0x1ab   :  { %2103 = vmatpush.msra.mxu0 %v1987_v34  ;;  %v1544_v25 = vsel %vm1532_vm15, %v3448_v23, %v3450_v13  ;;  %v1541_v60 = vsel %vm1535_vm0, %v1528_v0, 920167782  ;;  %v1545_v26 = vsel %vm1535_vm0, %v1531_v21, 1326507024  ;;  %v1476_v1 = vmul.f32 %v1475_v18, %v3417_v47  ;;  %v1971_v8 = vld [vmem:[#allocation9 + $0x30] sm:$0xff] }
 0x1ac   :  { %v1542_v28 = vsel %vm1534_vm1, %v3450_v13, %v1541_v60  ;;  %v1546_v31 = vsel %vm1534_vm1, %v1528_v0, %v1545_v26  ;;  %v1483_v4 = vmul.f32 %v1482_v58, %v3417_v47  ;;  %v3473_v32 = vand.u32 3, %v1489_v7  ;;  %v2027_v35 = vld [vmem:[#allocation9 + $0x1f0] sm:$0xff]  ;;  %v1996_v0 = vld [vmem:[#allocation9 + $0xf8] sm:$0xff]  ;;  %v1994_v60 = vld [vmem:[#allocation9 + $0xe8] sm:$0xff] }
 0x1ad   :  { %2104 = vmatpush.msra.mxu0 %v1985_v36  ;;  %v1543_v39 = vsel %vm1533_vm2, %v1540_v19, %v1542_v28  ;;  %v1547_v33 = vsel %vm1533_vm2, %v1544_v25, %v1546_v31  ;;  %v1549_v34 = vand.u32 65535, %v3438_v9  ;;  %v1477_v10 = vadd.f32 -0.4999988, %v1476_v1  ;;  %2119 = vmatpush.msra.mxu1 %v2027_v35  ;;  %v1967_v55 = vld [vmem:[#allocation9 + $0x10] sm:$0xff] }
 0x1ae   :  { %v1550_v36 = vshrl.u32 %v3438_v9, 16  ;;  %v1551_v37 = vand.u32 65535, %v1547_v33  ;;  %v1552_v38 = vshrl.u32 %v1547_v33, 16  ;;  %v1574_v15 = vshrl.u32 %v1543_v39, 16  ;;  %v2023_v57 = vld [vmem:[#allocation9 + $0x1d0] sm:$0xff] }
 0x1af   :  { %2105 = vmatpush.msra.mxu0 %v1983_v45  ;;  %v1573_v43 = vand.u32 65535, %v1543_v39  ;;  %v1969_v45 = vld [vmem:[#allocation9 + $0x20] sm:$0xff]  ;;  %v1478_v24 = vmul.f32 %v1477_v10, %v3417_v47  ;;  %v1484_v20 = vadd.f32 -0.16666654, %v1483_v4  ;;  %vm1492_vm3 = vcmp.eq.s32.totalorder %v3473_v32, 0  ;;  %2120 = vmatpush.msra.mxu1 %v2025_v49  ;;  %v2019_v19 = vld [vmem:[#allocation9 + $0x1b0] sm:$0xff] }
 0x1b0   :  { %v3484_v41 = vmul.u32 %v1551_v37, %v1550_v36  ;;  %v3486_v48 = vmul.u32 %v1574_v15, %v1549_v34  ;;  %v1553_v61 = vmul.u32 %v1551_v37, %v1549_v34  ;;  %vm1491_vm4 = vcmp.lt.s32.totalorder %v3473_v32, 2  ;;  %v2015_v10 = vld [vmem:[#allocation9 + $0x190] sm:$0xff] }
 0x1b1   :  { %2106 = vmatpush.msra.mxu0 %v1981_v50  ;;  %v3482_v50 = vmul.u32 %v1552_v38, %v1549_v34  ;;  %v1485_v5 = vmul.f32 %v1484_v20, %v3417_v47  ;;  %v1556_v7 = vmul.u32 %v1552_v38, %v1550_v36  ;;  %v1575_v62 = vmul.u32 %v1573_v43, %v1549_v34  ;;  %v1992_v34 = vld [vmem:[#allocation9 + $0xd8] sm:$0xff]  ;;  %v1990_v38 = vld [vmem:[#allocation9 + $0xc8] sm:$0xff] }
 0x1b2   :  { %v3492_v52 = vmul.u32 %v1573_v43, %v1550_v36  ;;  %2121 = vmatpush.msra.mxu1 %v2023_v57  ;;  %v1579_v11 = vshll.u32 %v3486_v48, 16  ;;  %v1516_v33 = vshrl.u32 %v3133_v42, %v3424_v51  ;;  %vm1495_vm8 = vcmp.eq.s32.totalorder %v3473_v32, 2  ;;  %v2013_v43 = vld [vmem:[#allocation9 + $0x180] sm:$0xff] }
 0x1b3   :  { %2107 = vmatpush.msra.mxu0 %v1979_v2  ;;  %v1557_v63 = vshll.u32 %v3482_v50, 16  ;;  %v1479_v2 = vadd.f32 1.0, %v1478_v24  ;;  %v1486_v21 = vadd.f32 1.0, %v1485_v5  ;;  %v1560_v37 = vshrl.u32 %v3484_v41, 16 }
 0x1b4   :  { %2122 = vmatpush.msra.mxu1 %v2021_v59  ;;  %vm1583_vm6 = vc.u32 %v1575_v62, %v1579_v11  ;;  %v1581_v31 = vshll.u32 %v3492_v52, 16  ;;  %v1585_v4 = vadd.s32 %v1579_v11, %v1575_v62  ;;  %v1580_v20 = vshrl.u32 %v3486_v48, 16  ;;  %v2007_v62 = vld [vmem:[#allocation9 + $0x150] sm:$0xff]  ;;  %v1982_v59 = vld [vmem:[#allocation9 + $0x88] sm:$0xff]  ;;  %v2005_v11 = vld [vmem:[#allocation9 + $0x140] sm:$0xff] }
 0x1b5   :  { %2108 = vmatpush.msra.mxu0 %v1977_v16  ;;  %v1559_v16 = vshll.u32 %v3484_v41, 16  ;;  %vm1561_vm5 = vc.u32 %v1553_v61, %v1557_v63  ;;  %v1563_v18 = vadd.s32 %v1557_v63, %v1553_v61  ;;  %v1496_v58 = vxor.u32 2147483648, %v1479_v2  ;;  %v2011_v61 = vld [vmem:[#allocation9 + $0x170] sm:$0xff]  ;;  %v1986_v63 = vld [vmem:[#allocation9 + $0xa8] sm:$0xff] }
 0x1b6   :  { %v1562_v47 = vsel %vm1561_vm5, 1, %v3139_v29  ;;  %v1487_v26 = vmul.f32 %v1486_v21, %v3413_v40  ;;  %v1584_v1 = vsel %vm1583_vm6, 1, %v3139_v29  ;;  %2123 = vmatpush.msra.mxu1 %v2019_v19  ;;  %v1558_v40 = vshrl.u32 %v3482_v50, 16  ;;  %v1042_v19 = vpop.f32.mrf.mxu0 }
 0x1b7   :  { %2109 = vmatpush.msra.mxu0 %v1975_v12  ;;  %v1578_v12 = vmul.u32 %v1574_v15, %v1550_v36  ;;  %v1564_v25 = vadd.s32 %v1562_v47, %v1556_v7  ;;  %vm1565_vm7 = vc.u32 %v1563_v18, %v1559_v16  ;;  %v1537_v36 = vsel %vm1535_vm0, %v3450_v13, 2102212464  ;;  %v1984_v7 = vld [vmem:[#allocation9 + $0x98] sm:$0xff]  ;;  %v2003_v47 = vld [vmem:[#allocation9 + $0x130] sm:$0xff] }
 0x1b8   :  { %v1566_v28 = vsel %vm1565_vm7, 1, %v3139_v29  ;;  %vm1587_vm9 = vc.u32 %v1585_v4, %v1581_v31  ;;  %v1497_v15 = vsel %vm1495_vm8, %v1496_v58, %v1487_v26  ;;  %v1536_v50 = vsel %vm1532_vm15, %v1516_v33, %v3446_v17  ;;  %v1980_v16 = vld [vmem:[#allocation9 + $0x78] sm:$0xff]  ;;  %v1997_v33 = vld [vmem:[#allocation9 + $0x100] sm:$0xff] }
 0x1b9   :  { %2110 = vmatpush.msra.mxu0 %v1973_v27  ;;  %v2017_v27 = vld [vmem:[#allocation9 + $0x1a0] sm:$0xff]  ;;  %v1586_v39 = vadd.s32 %v1584_v1, %v1578_v12  ;;  %v1568_v35 = vadd.s32 %v1566_v28, %v1564_v25  ;;  %v1588_v24 = vsel %vm1587_vm9, 1, %v3139_v29  ;;  %v1538_v41 = vsel %vm1534_vm1, %v3448_v23, %v1537_v36  ;;  %v3535_v18 = vld [vmem:[#allocation7] sm:$0xf]  ;;  %v1978_v12 = vld [vmem:[#allocation9 + $0x68] sm:$0xff]  ;;  %v1062_v28 = vpop.f32.mrf.mxu1  ;;  %v1102_v36 = vpop.f32.mrf.mxu3 }
 0x1ba   :  { %2124 = vmatpush.msra.mxu1 %v2017_v27  ;;  %v1582_v32 = vshrl.u32 %v3492_v52, 16  ;;  %v1539_v17 = vsel %vm1533_vm2, %v1536_v50, %v1538_v41  ;;  %v2009_v23 = vld [vmem:[#allocation9 + $0x160] sm:$0xff]  ;;  %v1976_v25 = vld [vmem:[#allocation9 + $0x58] sm:$0xff]  ;;  %v1999_v27 = vld [vmem:[#allocation9 + $0x110] sm:$0xff]  ;;  %vm3554_vm0 = vcmp.le.f32.partialorder %v1500_v30, 0.7853982 }
 0x1bb   :  { %2111 = vmatpush.msra.mxu0 %v1971_v8  ;;  %v1493_v8 = vxor.u32 2147483648, %v1487_v26  ;;  %v1590_v49 = vadd.s32 %v1588_v24, %v1586_v39  ;;  %v1974_v1 = vld [vmem:[#allocation9 + $0x48] sm:$0xff]  ;;  %v1082_v39 = vpop.f32.mrf.mxu2 }
 0x1bc   :  { %2125 = vmatpush.msra.mxu1 %v2015_v10  ;;  %v2022_v50 = vld [vmem:[#allocation9 + $0x1c8] sm:$0xff] }
 0x1bd   :  { %2112 = vmatpush.msra.mxu0 %v1969_v45  ;;  %v1494_v51 = vsel %vm1492_vm3, %v1479_v2, %v1493_v8  ;;  %v1569_v45 = vadd.s32 %v1568_v35, %v1558_v40  ;;  %v1591_v48 = vadd.s32 %v1590_v49, %v1580_v20  ;;  %v3528_v2 = vadd.s32 %v1585_v4, %v1581_v31  ;;  %v2028_v8 = vld [vmem:[#allocation9 + $0x1f8] sm:$0xff]  ;;  %v1970_v35 = vld [vmem:[#allocation9 + $0x28] sm:$0xff] }
 0x1be   :  { %v1498_v13 = vsel %vm1491_vm4, %v1494_v51, %v1497_v15  ;;  %2126 = vmatpush.msra.mxu1 %v2013_v43  ;;  %v1968_v15 = vld [vmem:[#allocation9 + $0x18] sm:$0xff]  ;;  %v1966_v20 = vld [vmem:[#allocation9 + $0x8] sm:$0xff] }
 0x1bf   :  { %2113 = vmatpush.msra.mxu0 %v1967_v55  ;;  %v1988_v55 = vld [vmem:[#allocation9 + $0xb8] sm:$0xff]  ;;  %v3522_v57 = vsel %vm1488_vm10, nan, %v1498_v13  ;;  %v3524_v3 = vadd.s32 %v1569_v45, %v1560_v37  ;;  %v1592_v5 = vadd.s32 %v1591_v48, %v1582_v32  ;;  %v2026_v37 = vld [vmem:[#allocation9 + $0x1e8] sm:$0xff] }
 0x1c0   :  { %2127 = vmatpush.msra.mxu1 %v2011_v61  ;;  %v2024_v43 = vld [vmem:[#allocation9 + $0x1d8] sm:$0xff] }
 0x1c1   :  { %2114 = vmatpush.msra.mxu0 %v1965_v54  ;;  %vm1595_vm11 = vc.u32 %v3524_v3, %v3528_v2  ;;  %v1596_v52 = vadd.s32 1, %v1592_v5  ;;  %v1593_v54 = vmul.u32 %v3438_v9, %v1539_v17  ;;  %v2001_v9 = vld [vmem:[#allocation9 + $0x120] sm:$0xff]  ;;  %v1122_v24 = vpop.f32.mrf.mxu0 }
 0x1c2   :  { %2115 = vmatmul.f32.vlgmr.msra.gmra.mxu0 %v3522_v57  ;;  %2128 = vmatpush.msra.mxu1 %v2009_v23  ;;  %v1594_v23 = vadd.s32 %v3528_v2, %v3524_v3  ;;  %v2010_v3 = vld [vmem:[#allocation9 + $0x168] sm:$0xff] }
 0x1c3   :  { %2179 = vmatpush.msrb.mxu0 %v1996_v0  ;;  %v1597_v14 = vsel %vm1595_vm11, %v1596_v52, %v1592_v5  ;;  %v699_v0 = vperm.slane %v3535_v18, 2 }
 0x1c4   :  { %2129 = vmatpush.msra.mxu1 %v2007_v62  ;;  %v1598_v21 = vadd.s32 %v1597_v14, %v1593_v54  ;;  %v2016_v54 = vld [vmem:[#allocation9 + $0x198] sm:$0xff] }
 0x1c5   :  { %2180 = vmatpush.msrb.mxu0 %v1994_v60  ;;  %v1043_v60 = vadd.f32 %v1042_v19, %v699_v0  ;;  %v2012_v0 = vld [vmem:[#allocation9 + $0x178] sm:$0xff] }
 0x1c6   :  { %2130 = vmatpush.msra.mxu1 %v2005_v11  ;;  %v1599_v58 = vadd.s32 536870912, %v1598_v21 }
 0x1c7   :  { %2181 = vmatpush.msrb.mxu0 %v1992_v34  ;;  %v1063_v4 = vadd.f32 %v1062_v28, %v1043_v60  ;;  %v1972_v34 = vld [vmem:[#allocation9 + $0x38] sm:$0xff] }
 0x1c8   :  { %2131 = vmatpush.msra.mxu1 %v2003_v47  ;;  %v3538_v26 = vshrl.u32 %v1599_v58, 30  ;;  %v1142_v61 = vpop.f32.mrf.mxu1 }
 0x1c9   :  { %2182 = vmatpush.msrb.mxu0 %v1990_v38  ;;  %v1083_v40 = vadd.f32 %v1082_v39, %v1063_v4  ;;  %v1162_v32 = vpop.f32.mrf.mxu2 }
 0x1ca   :  { %2132 = vmatpush.msra.mxu1 %v2001_v9  ;;  %v1601_v31 = vshll.u32 %v3538_v26, 30  ;;  %v2008_v9 = vld [vmem:[#allocation9 + $0x158] sm:$0xff]  ;;  %v1624_v39 = vsub.s32 4, %v3538_v26 }
 0x1cb   :  { %2183 = vmatpush.msrb.mxu0 %v1988_v55  ;;  %v1103_v51 = vadd.f32 %v1102_v36, %v1083_v40  ;;  %v2020_v55 = vld [vmem:[#allocation9 + $0x1b8] sm:$0xff]  ;;  %v2002_v36 = vld [vmem:[#allocation9 + $0x128] sm:$0xff] }
 0x1cc   :  { %2133 = vmatpush.msra.mxu1 %v1999_v27  ;;  %v1602_v10 = vsub.s32 %v1598_v21, %v1601_v31  ;;  %v1182_v52 = vpop.f32.mrf.mxu3 }
 0x1cd   :  { %2184 = vmatpush.msrb.mxu0 %v1986_v63  ;;  %v1123_v49 = vadd.f32 %v1122_v24, %v1103_v51  ;;  %v2018_v63 = vld [vmem:[#allocation9 + $0x1a8] sm:$0xff]  ;;  %v1625_v51 = vsel %vm1502_vm14, %v1624_v39, %v3538_v26 }
 0x1ce   :  { %2134 = vmatpush.msra.mxu1 %v1997_v33  ;;  %vm1603_vm12 = vcmp.lt.s32.totalorder %v1602_v10, 0  ;;  %v1604_v38 = vsub.s32 0, %v1602_v10 }
 0x1cf   :  { %2185 = vmatpush.msrb.mxu0 %v1984_v7  ;;  %v1143_v48 = vadd.f32 %v1142_v61, %v1123_v49 }
 0x1d0   :  { %2199 = vmatpush.msrb.mxu1 %v2028_v8  ;;  %v1605_v45 = vsel %vm1603_vm12, %v1604_v38, %v1602_v10  ;;  %v2059_v8 = vld [vmem:[#allocation9 + $0x2f0] sm:$0xff]  ;;  %vm1643_vm12 = vweird.f32 %v3391_v22 }
 0x1d1   :  { %2186 = vmatpush.msrb.mxu0 %v1982_v59  ;;  %v1606_v13 = vclz %v1605_v45  ;;  %v1163_v62 = vadd.f32 %v1162_v32, %v1143_v48  ;;  %2139 = vmatpush.msra.mxu2 %v2059_v8  ;;  %v2000_v45 = vld [vmem:[#allocation9 + $0x118] sm:$0xff] }
 0x1d2   :  { %2200 = vmatpush.msrb.mxu1 %v2026_v37 }
 0x1d3   :  { %2187 = vmatpush.msrb.mxu0 %v1980_v16  ;;  %v2850_v41 = vadd.s32 4294967294, %v1606_v13  ;;  %v3544_v16 = vadd.f32 %v1182_v52, %v1163_v62 }
 0x1d4   :  { %2201 = vmatpush.msrb.mxu1 %v2024_v43 }
 0x1d5   :  { %2188 = vmatpush.msrb.mxu0 %v1978_v12  ;;  %vm2851_vm13 = vcmp.lt.s32.totalorder %v2850_v41, 0  ;;  %v1658_v12 = vand.u32 2139095040, %v3544_v16  ;;  %v1655_v58 = vand.u32 2147483647, %v3544_v16 }
 0x1d6   :  { %2202 = vmatpush.msrb.mxu1 %v2022_v50  ;;  %v1609_v17 = vsel %vm2851_vm13, 0, %v2850_v41  ;;  %v1627_v41 = vsel %vm3554_vm0, 0, %v1625_v51 }
 0x1d7   :  { %2189 = vmatpush.msrb.mxu0 %v1976_v25  ;;  %v1610_v5 = vsub.s32 32, %v1609_v17  ;;  %v1614_v7 = vsub.s32 4294967266, %v1609_v17  ;;  %v1611_v59 = vshll.u32 %v1602_v10, %v1609_v17  ;;  %v1659_v19 = vshrl.u32 %v1658_v12, 23 }
 0x1d8   :  { %2203 = vmatpush.msrb.mxu1 %v2020_v55  ;;  %v1662_v31 = vand.u32 8388607, %v1655_v58  ;;  %v1998_v55 = vld [vmem:[#allocation9 + $0x108] sm:$0xff] }
 0x1d9   :  { %2190 = vmatpush.msrb.mxu0 %v1974_v1  ;;  %v1612_v11 = vshrl.u32 %v1594_v23, %v1610_v5  ;;  %v1615_v14 = vadd.s32 127, %v1614_v7  ;;  %v2852_v27 = vadd.s32 4294967169, %v1659_v19  ;;  %v2006_v1 = vld [vmem:[#allocation9 + $0x148] sm:$0xff]  ;;  %v2057_v5 = vld [vmem:[#allocation9 + $0x2e0] sm:$0xff] }
 0x1da   :  { %2204 = vmatpush.msrb.mxu1 %v2018_v63  ;;  %v1663_v37 = vor.u32 8388608, %v1662_v31  ;;  %2140 = vmatpush.msra.mxu2 %v2057_v5  ;;  %v2053_v31 = vld [vmem:[#allocation9 + $0x2c0] sm:$0xff] }
 0x1db   :  { %2191 = vmatpush.msrb.mxu0 %v1972_v34  ;;  %v1613_v21 = vor.u32 %v1612_v11, %v1611_v59  ;;  %v1616_v47 = vshll.u32 %v1615_v14, 23  ;;  %v1665_v4 = vadd.s32 1, %v2852_v27  ;;  %v2004_v34 = vld [vmem:[#allocation9 + $0x138] sm:$0xff] }
 0x1dc   :  { %2205 = vmatpush.msrb.mxu1 %v2016_v54  ;;  %v3585_v63 = vshll.u32 %v1663_v37, 8 }
 0x1dd   :  { %2192 = vmatpush.msrb.mxu0 %v1970_v35  ;;  %v1617_v2 = vor.u32 4788187, %v1616_v47  ;;  %v1620_v60 = vcvt.s32.f32 %v1613_v21  ;;  %vm1666_vm15 = vcmp.gt.s32.totalorder %v1665_v4, 0  ;;  %v2055_v21 = vld [vmem:[#allocation9 + $0x2d0] sm:$0xff] }
 0x1de   :  { %v1667_v10 = vsel %vm1666_vm15, %v1665_v4, 0  ;;  %2141 = vmatpush.msra.mxu2 %v2055_v21  ;;  %v1705_v4 = vshrl.u32 %v3585_v63, 16 }
 0x1df   :  { %2193 = vmatpush.msrb.mxu0 %v1968_v15  ;;  %v1618_v25 = vand.u32 2147483647, %v1617_v2  ;;  %v1669_v38 = vand.u32 31, %v1667_v10  ;;  %v3564_v43 = vshrl.u32 %v1667_v10, 5 }
 0x1e0   :  { %2142 = vmatpush.msra.mxu2 %v2053_v31 }
 0x1e1   :  { %2194 = vmatpush.msrb.mxu0 %v1966_v20  ;;  %v1621_v28 = vmul.f32 %v1620_v60, %v1618_v25  ;;  %v3570_v24 = vsub.s32 32, %v1669_v38  ;;  %v1672_v13 = vshll.u32 %v3133_v42, %v1669_v38  ;;  %v1675_v20 = vshll.u32 %v3134_v44, %v1669_v38 }
 0x1e2   :  { %2195 = vmatmul.f32.vlgmr.msrb.gmra.mxu0 %v3522_v57  ;;  %v2014_v57 = vld [vmem:[#allocation9 + $0x188] sm:$0xff]  ;;  %v1678_v26 = vshll.u32 %v3135_v46, %v1669_v38  ;;  %v1681_v49 = vshll.u32 %v3136_v53, %v1669_v38  ;;  %v1684_v50 = vshll.u32 %v3137_v56, %v1669_v38  ;;  %vm1687_vm1 = vcmp.lt.s32.totalorder %v3564_v43, 1 }
 0x1e3   :  { %2206 = vmatpush.msrb.mxu1 %v2014_v57  ;;  %v1622_v33 = vxor.u32 2147483648, %v1621_v28  ;;  %v1673_v61 = vshrl.u32 %v3134_v44, %v3570_v24  ;;  %v1676_v32 = vshrl.u32 %v3135_v46, %v3570_v24  ;;  %v1679_v48 = vshrl.u32 %v3136_v53, %v3570_v24 }
 0x1e4   :  { %v1682_v17 = vshrl.u32 %v3137_v56, %v3570_v24  ;;  %v1685_v23 = vshrl.u32 %v3138_v6, %v3570_v24  ;;  %vm1690_vm2 = vcmp.lt.s32.totalorder %v3564_v43, 4  ;;  %vm1689_vm3 = vcmp.lt.s32.totalorder %v3564_v43, 3 }
 0x1e5   :  { %2207 = vmatpush.msrb.mxu1 %v2012_v0  ;;  %v1623_v35 = vsel %vm1502_vm14, %v1622_v33, %v1621_v28  ;;  %v3593_v7 = vor.u32 %v1673_v61, %v1672_v13  ;;  %v3595_v62 = vor.u32 %v1676_v32, %v1675_v20  ;;  %v3597_v52 = vor.u32 %v1679_v48, %v1678_v26  ;;  %v2049_v13 = vld [vmem:[#allocation9 + $0x2a0] sm:$0xff]  ;;  %v2047_v32 = vld [vmem:[#allocation9 + $0x290] sm:$0xff] }
 0x1e6   :  { %v3562_v15 = vsel %vm3554_vm0, %v3391_v22, %v1623_v35  ;;  %v1683_v59 = vor.u32 %v1682_v17, %v1681_v49  ;;  %v1686_v11 = vor.u32 %v1685_v23, %v1684_v50  ;;  %vm1688_vm4 = vcmp.lt.s32.totalorder %v3564_v43, 2  ;;  %v2051_v35 = vld [vmem:[#allocation9 + $0x2b0] sm:$0xff] }
 0x1e7   :  { %2208 = vmatpush.msrb.mxu1 %v2010_v3  ;;  %v3568_v30 = vmul.f32 %v3562_v15, %v3562_v15  ;;  %v1695_v57 = vsel %vm1687_vm1, %v3593_v7, %v3595_v62  ;;  %v1699_v0 = vsel %vm1687_vm1, %v3595_v62, %v3597_v52  ;;  %v1644_v25 = vadd.s32 3, %v1627_v41  ;;  %2143 = vmatpush.msra.mxu2 %v2051_v35  ;;  %v2031_v43 = vld [vmem:[#allocation9 + $0x210] sm:$0xff] }
 0x1e8   :  { %v1696_v47 = vsel %vm1690_vm2, %v1683_v59, 920167782  ;;  %v1700_v12 = vsel %vm1690_vm2, %v1686_v11, 1326507024  ;;  %vm1657_vm0 = vcmp.lt.s32.totalorder %v3544_v16, 0 }
 0x1e9   :  { %2209 = vmatpush.msrb.mxu1 %v2008_v9  ;;  %v1629_v54 = vmul.f32 -0.001358992, %v3568_v30  ;;  %v1636_v14 = vmul.f32 -0.00019511016, %v3568_v30  ;;  %v1697_v2 = vsel %vm1689_vm3, %v3597_v52, %v1696_v47  ;;  %v1701_v19 = vsel %vm1689_vm3, %v1683_v59, %v1700_v12  ;;  %2144 = vmatpush.msra.mxu2 %v2049_v13  ;;  %v2043_v47 = vld [vmem:[#allocation9 + $0x270] sm:$0xff]  ;;  %v2037_v13 = vld [vmem:[#allocation9 + $0x240] sm:$0xff] }
 0x1ea   :  { %v1698_v60 = vsel %vm1688_vm4, %v1695_v57, %v1697_v2  ;;  %v1702_v27 = vsel %vm1688_vm4, %v1699_v0, %v1701_v19 }
 0x1eb   :  { %2210 = vmatpush.msrb.mxu1 %v2006_v1  ;;  %v1630_v3 = vadd.f32 0.041655596, %v1629_v54  ;;  %v1637_v9 = vadd.f32 0.008332121, %v1636_v14  ;;  %v1704_v1 = vand.u32 65535, %v3585_v63  ;;  %v1706_v39 = vand.u32 65535, %v1702_v27  ;;  %2145 = vmatpush.msra.mxu2 %v2047_v32 }
 0x1ec   :  { %v1707_v33 = vshrl.u32 %v1702_v27, 16  ;;  %v1728_v8 = vand.u32 65535, %v1698_v60  ;;  %v1671_v54 = vshrl.u32 %v3133_v42, %v3570_v24  ;;  %v2045_v14 = vld [vmem:[#allocation9 + $0x280] sm:$0xff] }
 0x1ed   :  { %2211 = vmatpush.msrb.mxu1 %v2004_v34  ;;  %v1631_v28 = vmul.f32 %v1630_v3, %v3568_v30  ;;  %v1729_v34 = vshrl.u32 %v1698_v60, 16  ;;  %v1638_v40 = vmul.f32 %v1637_v9, %v3568_v30  ;;  %v1710_v37 = vmul.u32 %v1706_v39, %v1705_v4  ;;  %2146 = vmatpush.msra.mxu2 %v2045_v14  ;;  %v2056_v14 = vld [vmem:[#allocation9 + $0x2d8] sm:$0xff] }
 0x1ee   :  { %v1708_v38 = vmul.u32 %v1706_v39, %v1704_v1  ;;  %v1711_v20 = vmul.u32 %v1707_v33, %v1705_v4  ;;  %v1732_v61 = vmul.u32 %v1728_v8, %v1705_v4  ;;  %v1692_v60 = vsel %vm1690_vm2, %v3597_v52, 2102212464 }
 0x1ef   :  { %2212 = vmatpush.msrb.mxu1 %v2002_v36  ;;  %v1632_v10 = vadd.f32 -0.4999988, %v1631_v28  ;;  %v1709_v36 = vmul.u32 %v1707_v33, %v1704_v1  ;;  %v1731_v51 = vmul.u32 %v1729_v34, %v1704_v1  ;;  %v1639_v50 = vadd.f32 -0.16666654, %v1638_v40  ;;  %2147 = vmatpush.msra.mxu2 %v2043_v47  ;;  %v2054_v47 = vld [vmem:[#allocation9 + $0x2c8] sm:$0xff] }
 0x1f0   :  { %v1714_v41 = vshll.u32 %v1710_v37, 16  ;;  %v1733_v11 = vmul.u32 %v1729_v34, %v1705_v4  ;;  %v1736_v3 = vshll.u32 %v1732_v61, 16  ;;  %v1693_v33 = vsel %vm1689_vm3, %v3595_v62, %v1692_v60 }
 0x1f1   :  { %2213 = vmatpush.msrb.mxu1 %v2000_v45  ;;  %v1645_v45 = vand.u32 3, %v1644_v25  ;;  %v1712_v26 = vshll.u32 %v1709_v36, 16  ;;  %v1633_v49 = vmul.f32 %v1632_v10, %v3568_v30  ;;  %v1734_v48 = vshll.u32 %v1731_v51, 16 }
 0x1f2   :  { %v1640_v5 = vmul.f32 %v1639_v50, %v3568_v30  ;;  %v1713_v21 = vshrl.u32 %v1709_v36, 16  ;;  %v1735_v4 = vshrl.u32 %v1731_v51, 16  ;;  %v1737_v35 = vshrl.u32 %v1732_v61, 16  ;;  %v2029_v61 = vld [vmem:[#allocation9 + $0x200] sm:$0xff] }
 0x1f3   :  { %2214 = vmatpush.msrb.mxu1 %v1998_v55  ;;  %v1730_v55 = vmul.u32 %v1728_v8, %v1704_v1  ;;  %vm1716_vm5 = vc.u32 %v1708_v38, %v1712_v26  ;;  %v1718_v17 = vadd.s32 %v1712_v26, %v1708_v38  ;;  %v1634_v23 = vadd.f32 1.0, %v1633_v49  ;;  %v2041_v8 = vld [vmem:[#allocation9 + $0x260] sm:$0xff] }
 0x1f4   :  { %v1717_v59 = vsel %vm1716_vm5, 1, %v3139_v29  ;;  %v1641_v0 = vadd.f32 1.0, %v1640_v5  ;;  %vm1646_vm8 = vcmp.lt.s32.totalorder %v1645_v45, 2  ;;  %vm1647_vm9 = vcmp.eq.s32.totalorder %v1645_v45, 0  ;;  %2148 = vmatpush.msra.mxu2 %v2041_v8  ;;  %v2033_v49 = vld [vmem:[#allocation9 + $0x220] sm:$0xff]  ;;  %v2058_v5 = vld [vmem:[#allocation9 + $0x2e8] sm:$0xff] }
 0x1f5   :  { %vm1738_vm6 = vc.u32 %v1730_v55, %v1734_v48  ;;  %v1719_v57 = vadd.s32 %v1717_v59, %v1711_v20  ;;  %vm1720_vm7 = vc.u32 %v1718_v17, %v1714_v41  ;;  %v1740_v2 = vadd.s32 %v1734_v48, %v1730_v55  ;;  %v1202_v48 = vpop.f32.mrf.mxu0  ;;  %v2060_v17 = vld [vmem:[#allocation9 + $0x2f8] sm:$0xff]  ;;  %v1242_v59 = vpop.f32.mrf.mxu2 }
 0x1f6   :  { %v1721_v12 = vsel %vm1720_vm7, 1, %v3139_v29  ;;  %v1739_v30 = vsel %vm1738_vm6, 1, %v3139_v29  ;;  %v1642_v19 = vmul.f32 %v1641_v0, %v3562_v15  ;;  %v1651_v24 = vxor.u32 2147483648, %v1634_v23  ;;  %v2044_v8 = vld [vmem:[#allocation9 + $0x278] sm:$0xff] }
 0x1f7   :  { %v1723_v9 = vadd.s32 %v1721_v12, %v1719_v57  ;;  %v1741_v25 = vadd.s32 %v1739_v30, %v1733_v11  ;;  %vm1742_vm10 = vc.u32 %v1740_v2, %v1736_v3  ;;  %v1715_v1 = vshrl.u32 %v1710_v37, 16  ;;  %v2039_v37 = vld [vmem:[#allocation9 + $0x250] sm:$0xff]  ;;  %v2052_v30 = vld [vmem:[#allocation9 + $0x2b8] sm:$0xff] }
 0x1f8   :  { %v1648_v27 = vxor.u32 2147483648, %v1642_v19  ;;  %v1743_v31 = vsel %vm1742_vm10, 1, %v3139_v29  ;;  %v1691_v15 = vsel %vm1687_vm1, %v1671_v54, %v3593_v7  ;;  %vm1650_vm11 = vcmp.eq.s32.totalorder %v1645_v45, 2  ;;  %2149 = vmatpush.msra.mxu2 %v2039_v37  ;;  %v2035_v45 = vld [vmem:[#allocation9 + $0x230] sm:$0xff]  ;;  %v1222_v54 = vpop.f32.mrf.mxu1  ;;  %v2042_v37 = vld [vmem:[#allocation9 + $0x268] sm:$0xff] }
 0x1f9   :  { %v1724_v28 = vadd.s32 %v1723_v9, %v1713_v21  ;;  %v1745_v39 = vadd.s32 %v1743_v31, %v1741_v25  ;;  %v1652_v34 = vsel %vm1650_vm11, %v1651_v24, %v1642_v19  ;;  %v1744_v38 = vadd.s32 %v1740_v2, %v1736_v3  ;;  %v1262_v21 = vpop.f32.mrf.mxu3  ;;  %v2050_v9 = vld [vmem:[#allocation9 + $0x2a8] sm:$0xff] }
 0x1fa   :  { %v1649_v52 = vsel %vm1647_vm9, %v1634_v23, %v1648_v27  ;;  %v1694_v51 = vsel %vm1688_vm4, %v1691_v15, %v1693_v33  ;;  %2150 = vmatpush.msra.mxu2 %v2037_v13  ;;  %v700_v41 = vperm.slane %v3535_v18, 3  ;;  %v2048_v27 = vld [vmem:[#allocation9 + $0x298] sm:$0xff]  ;;  %v2046_v15 = vld [vmem:[#allocation9 + $0x288] sm:$0xff]  ;;  %vm1656_vm2 = vcmp.le.f32.partialorder %v1655_v58, 0.7853982 }
 0x1fb   :  { %v3646_v10 = vadd.s32 %v1724_v28, %v1715_v1  ;;  %v1653_v40 = vsel %vm1646_vm8, %v1649_v52, %v1652_v34  ;;  %v1746_v36 = vadd.s32 %v1745_v39, %v1735_v4  ;;  %v1748_v22 = vmul.u32 %v3585_v63, %v1694_v51  ;;  %v2040_v51 = vld [vmem:[#allocation9 + $0x258] sm:$0xff] }
 0x1fc   :  { %v1654_v7 = vsel %vm1643_vm12, nan, %v1653_v40  ;;  %2151 = vmatpush.msra.mxu2 %v2035_v45  ;;  %v1203_v23 = vadd.f32 %v1202_v48, %v700_v41 }
 0x1fd   :  { %2135 = vmatmul.f32.vlgmr.msra.gmra.mxu1 %v1654_v7  ;;  %v1747_v62 = vadd.s32 %v1746_v36, %v1737_v35  ;;  %vm1750_vm13 = vc.u32 %v3646_v10, %v1744_v38  ;;  %v1749_v4 = vadd.s32 %v1744_v38, %v3646_v10  ;;  %v2038_v38 = vld [vmem:[#allocation9 + $0x248] sm:$0xff] }
 0x1fe   :  { %2152 = vmatpush.msra.mxu2 %v2033_v49  ;;  %v1223_v18 = vadd.f32 %v1222_v54, %v1203_v23  ;;  %v2036_v23 = vld [vmem:[#allocation9 + $0x238] sm:$0xff] }
 0x1ff   :  { %v1751_v20 = vadd.s32 1, %v1747_v62 }
 0x200   :  { %2153 = vmatpush.msra.mxu2 %v2031_v43  ;;  %v1243_v0 = vadd.f32 %v1242_v59, %v1223_v18 }
 0x201   :  { %v1752_v26 = vsel %vm1750_vm13, %v1751_v20, %v1747_v62 }
 0x202   :  { %v1753_v50 = vadd.s32 %v1752_v26, %v1748_v22  ;;  %2154 = vmatpush.msra.mxu2 %v2029_v61  ;;  %v1263_v3 = vadd.f32 %v1262_v21, %v1243_v0 }
 0x204   :  { %v1754_v55 = vadd.s32 536870912, %v1753_v50  ;;  %2219 = vmatpush.msrb.mxu2 %v2060_v17 }
 0x205   :  { %2215 = vmatmul.f32.vlgmr.msrb.gmra.mxu1 %v1654_v7 }
 0x206   :  { %v3655_v32 = vshrl.u32 %v1754_v55, 30  ;;  %2220 = vmatpush.msrb.mxu2 %v2058_v5  ;;  %v2091_v5 = vld [vmem:[#allocation9 + $0x3f0] sm:$0xff] }
 0x207   :  { %2159 = vmatpush.msra.mxu3 %v2091_v5 }
 0x208   :  { %v1756_v63 = vshll.u32 %v3655_v32, 30  ;;  %2221 = vmatpush.msrb.mxu2 %v2056_v14  ;;  %v1779_v26 = vsub.s32 4, %v3655_v32  ;;  %v2032_v14 = vld [vmem:[#allocation9 + $0x218] sm:$0xff] }
 0x20a   :  { %v1757_v11 = vsub.s32 %v1753_v50, %v1756_v63  ;;  %2222 = vmatpush.msrb.mxu2 %v2054_v47  ;;  %v1780_v48 = vsel %vm1657_vm0, %v1779_v26, %v3655_v32  ;;  %v2034_v63 = vld [vmem:[#allocation9 + $0x228] sm:$0xff] }
 0x20b   :  { %v1782_v18 = vsel %vm1656_vm2, 0, %v1780_v48  ;;  %v2030_v32 = vld [vmem:[#allocation9 + $0x208] sm:$0xff] }
 0x20c   :  { %vm1758_vm14 = vcmp.lt.s32.totalorder %v1757_v11, 0  ;;  %v1759_v57 = vsub.s32 0, %v1757_v11  ;;  %2223 = vmatpush.msrb.mxu2 %v2052_v30  ;;  %v1799_v58 = vadd.s32 3, %v1782_v18 }
 0x20e   :  { %v1760_v12 = vsel %vm1758_vm14, %v1759_v57, %v1757_v11  ;;  %2224 = vmatpush.msrb.mxu2 %v2050_v9  ;;  %v3735_v18 = vand.u32 3, %v1799_v58  ;;  %vm1798_vm14 = vweird.f32 %v3544_v16 }
 0x20f   :  { %v1761_v2 = vclz %v1760_v12 }
 0x210   :  { %2225 = vmatpush.msrb.mxu2 %v2048_v27  ;;  %vm1801_vm8 = vcmp.lt.s32.totalorder %v3735_v18, 2  ;;  %vm1802_vm9 = vcmp.eq.s32.totalorder %v3735_v18, 0  ;;  %vm1805_vm13 = vcmp.eq.s32.totalorder %v3735_v18, 2  ;;  %v2092_v18 = vld [vmem:[#allocation9 + $0x3f8] sm:$0xff] }
 0x211   :  { %v2853_v25 = vadd.s32 4294967294, %v1761_v2 }
 0x212   :  { %2226 = vmatpush.msrb.mxu2 %v2046_v15  ;;  %v2087_v15 = vld [vmem:[#allocation9 + $0x3d0] sm:$0xff] }
 0x213   :  { %vm2854_vm15 = vcmp.lt.s32.totalorder %v2853_v25, 0 }
 0x214   :  { %v1764_v31 = vsel %vm2854_vm15, 0, %v2853_v25  ;;  %2227 = vmatpush.msrb.mxu2 %v2044_v8 }
 0x215   :  { %v1765_v39 = vsub.s32 32, %v1764_v31  ;;  %v1769_v33 = vsub.s32 4294967266, %v1764_v31  ;;  %v1766_v40 = vshll.u32 %v1757_v11, %v1764_v31  ;;  %v2089_v31 = vld [vmem:[#allocation9 + $0x3e0] sm:$0xff] }
 0x216   :  { %2228 = vmatpush.msrb.mxu2 %v2042_v37  ;;  %2160 = vmatpush.msra.mxu3 %v2089_v31 }
 0x217   :  { %v1767_v35 = vshrl.u32 %v1749_v4, %v1765_v39  ;;  %v1770_v36 = vadd.s32 127, %v1769_v33 }
 0x218   :  { %2229 = vmatpush.msrb.mxu2 %v2040_v51  ;;  %2161 = vmatpush.msra.mxu3 %v2087_v15  ;;  %v2083_v51 = vld [vmem:[#allocation9 + $0x3b0] sm:$0xff] }
 0x219   :  { %v1768_v62 = vor.u32 %v1767_v35, %v1766_v40  ;;  %v1771_v13 = vshll.u32 %v1770_v36, 23  ;;  %v2085_v35 = vld [vmem:[#allocation9 + $0x3c0] sm:$0xff] }
 0x21a   :  { %2230 = vmatpush.msrb.mxu2 %v2038_v38  ;;  %2162 = vmatpush.msra.mxu3 %v2085_v35 }
 0x21b   :  { %v1772_v22 = vor.u32 4788187, %v1771_v13  ;;  %v1775_v50 = vcvt.s32.f32 %v1768_v62 }
 0x21c   :  { %2231 = vmatpush.msrb.mxu2 %v2036_v23  ;;  %2163 = vmatpush.msra.mxu3 %v2083_v51 }
 0x21d   :  { %v1282_v19 = vpop.f32.mrf.mxu0  ;;  %v1773_v49 = vand.u32 2147483647, %v1772_v22 }
 0x21e   :  { %v1283_v24 = vadd.f32 %v1282_v19, %v1263_v3  ;;  %2232 = vmatpush.msrb.mxu2 %v2034_v63 }
 0x21f   :  { %v1776_v55 = vmul.f32 %v1775_v50, %v1773_v49 }
 0x220   :  { %2233 = vmatpush.msrb.mxu2 %v2032_v14 }
 0x221   :  { %v1777_v17 = vxor.u32 2147483648, %v1776_v55 }
 0x222   :  { %2234 = vmatpush.msrb.mxu2 %v2030_v32 }
 0x223   :  { %v1778_v11 = vsel %vm1657_vm0, %v1777_v17, %v1776_v55 }
 0x224   :  { %v1302_v60 = vpop.f32.mrf.mxu1  ;;  %v3671_v0 = vsel %vm1656_vm2, %v3544_v16, %v1778_v11 }
 0x225   :  { %v1303_v1 = vadd.f32 %v1302_v60, %v1283_v24  ;;  %v1322_v28 = vpop.f32.mrf.mxu2  ;;  %v3677_v47 = vmul.f32 %v3671_v0, %v3671_v0 }
 0x227   :  { %v1323_v52 = vadd.f32 %v1322_v28, %v1303_v1  ;;  %v1791_v40 = vmul.f32 -0.00019511016, %v3677_v47 }
 0x229   :  { %v1342_v34 = vpop.f32.mrf.mxu3 }
 0x22a   :  { %v3659_v7 = vadd.f32 %v1342_v34, %v1323_v52  ;;  %v1784_v52 = vmul.f32 -0.001358992, %v3677_v47 }
 0x22c   :  { %v1813_v20 = vand.u32 2139095040, %v3659_v7  ;;  %v1810_v10 = vand.u32 2147483647, %v3659_v7  ;;  %vm1812_vm2 = vcmp.lt.s32.totalorder %v3659_v7, 0 }
 0x22e   :  { %v1814_v45 = vshrl.u32 %v1813_v20, 23  ;;  %v1817_v43 = vand.u32 8388607, %v1810_v10  ;;  %v1785_v20 = vadd.f32 0.041655596, %v1784_v52 }
 0x230   :  { %v2855_v41 = vadd.s32 4294967169, %v1814_v45  ;;  %v1818_v54 = vor.u32 8388608, %v1817_v43  ;;  %v1792_v45 = vadd.f32 0.008332121, %v1791_v40  ;;  %v2081_v43 = vld [vmem:[#allocation9 + $0x3a0] sm:$0xff] }
 0x231   :  { %2164 = vmatpush.msra.mxu3 %v2081_v43 }
 0x232   :  { %v1820_v61 = vadd.s32 1, %v2855_v41  ;;  %v3683_v2 = vshll.u32 %v1818_v54, 8  ;;  %v1786_v41 = vmul.f32 %v1785_v20, %v3677_v47  ;;  %v1793_v5 = vmul.f32 %v1792_v45, %v3677_v47  ;;  %v2079_v54 = vld [vmem:[#allocation9 + $0x390] sm:$0xff] }
 0x233   :  { %2165 = vmatpush.msra.mxu3 %v2079_v54 }
 0x234   :  { %vm1821_vm1 = vcmp.gt.s32.totalorder %v1820_v61, 0  ;;  %v1859_v50 = vand.u32 65535, %v3683_v2  ;;  %v1860_v55 = vshrl.u32 %v3683_v2, 16  ;;  %v1787_v63 = vadd.f32 -0.4999988, %v1786_v41 }
 0x235   :  { %v1822_v59 = vsel %vm1821_vm1, %v1820_v61, 0 }
 0x236   :  { %v1824_v57 = vand.u32 31, %v1822_v59  ;;  %v3679_v12 = vshrl.u32 %v1822_v59, 5 }
 0x238   :  { %v3673_v21 = vsub.s32 32, %v1824_v57  ;;  %v1827_v3 = vshll.u32 %v3133_v42, %v1824_v57  ;;  %v1830_v30 = vshll.u32 %v3134_v44, %v1824_v57  ;;  %v1833_v9 = vshll.u32 %v3135_v46, %v1824_v57 }
 0x239   :  { %v1836_v60 = vshll.u32 %v3136_v53, %v1824_v57  ;;  %v1839_v1 = vshll.u32 %v3137_v56, %v1824_v57  ;;  %vm1842_vm3 = vcmp.lt.s32.totalorder %v3679_v12, 1  ;;  %vm1844_vm4 = vcmp.lt.s32.totalorder %v3679_v12, 3  ;;  %v2077_v57 = vld [vmem:[#allocation9 + $0x380] sm:$0xff] }
 0x23a   :  { %v1828_v19 = vshrl.u32 %v3134_v44, %v3673_v21  ;;  %v1831_v24 = vshrl.u32 %v3135_v46, %v3673_v21  ;;  %v1834_v25 = vshrl.u32 %v3136_v53, %v3673_v21  ;;  %v1837_v27 = vshrl.u32 %v3137_v56, %v3673_v21  ;;  %2166 = vmatpush.msra.mxu3 %v2077_v57  ;;  %v2063_v57 = vld [vmem:[#allocation9 + $0x310] sm:$0xff] }
 0x23b   :  { %v1840_v28 = vshrl.u32 %v3138_v6, %v3673_v21  ;;  %vm1845_vm5 = vcmp.lt.s32.totalorder %v3679_v12, 4  ;;  %vm1843_vm6 = vcmp.lt.s32.totalorder %v3679_v12, 2  ;;  %v2086_v12 = vld [vmem:[#allocation9 + $0x3c8] sm:$0xff] }
 0x23c   :  { %v3698_v4 = vor.u32 %v1828_v19, %v1827_v3  ;;  %v3700_v39 = vor.u32 %v1831_v24, %v1830_v30  ;;  %v3702_v33 = vor.u32 %v1834_v25, %v1833_v9  ;;  %v1838_v34 = vor.u32 %v1837_v27, %v1836_v60  ;;  %v2075_v60 = vld [vmem:[#allocation9 + $0x370] sm:$0xff] }
 0x23d   :  { %v1841_v8 = vor.u32 %v1840_v28, %v1839_v1  ;;  %v1788_v30 = vmul.f32 %v1787_v63, %v3677_v47  ;;  %v1794_v19 = vadd.f32 -0.16666654, %v1793_v5  ;;  %2167 = vmatpush.msra.mxu3 %v2075_v60  ;;  %v2065_v5 = vld [vmem:[#allocation9 + $0x320] sm:$0xff] }
 0x23e   :  { %v1850_v36 = vsel %vm1842_vm3, %v3698_v4, %v3700_v39  ;;  %v1854_v37 = vsel %vm1842_vm3, %v3700_v39, %v3702_v33  ;;  %v1851_v62 = vsel %vm1845_vm5, %v1838_v34, 920167782  ;;  %v1847_v45 = vsel %vm1845_vm5, %v3702_v33, 2102212464 }
 0x23f   :  { %v1855_v13 = vsel %vm1845_vm5, %v1841_v8, 1326507024  ;;  %v1852_v38 = vsel %vm1844_vm4, %v3702_v33, %v1851_v62  ;;  %v1789_v58 = vadd.f32 1.0, %v1788_v30  ;;  %v1795_v28 = vmul.f32 %v1794_v19, %v3677_v47 }
 0x240   :  { %v1856_v22 = vsel %vm1844_vm4, %v1838_v34, %v1855_v13  ;;  %v1853_v26 = vsel %vm1843_vm6, %v1850_v36, %v1852_v38  ;;  %v2073_v34 = vld [vmem:[#allocation9 + $0x360] sm:$0xff]  ;;  %v2071_v36 = vld [vmem:[#allocation9 + $0x350] sm:$0xff]  ;;  %v1848_v33 = vsel %vm1844_vm4, %v3700_v39, %v1847_v45 }
 0x241   :  { %v1857_v49 = vsel %vm1843_vm6, %v1854_v37, %v1856_v22  ;;  %v1884_v17 = vshrl.u32 %v1853_v26, 16  ;;  %v1883_v23 = vand.u32 65535, %v1853_v26  ;;  %v1796_v40 = vadd.f32 1.0, %v1795_v28  ;;  %2168 = vmatpush.msra.mxu3 %v2073_v34  ;;  %v2069_v26 = vld [vmem:[#allocation9 + $0x340] sm:$0xff]  ;;  %v2082_v28 = vld [vmem:[#allocation9 + $0x3a8] sm:$0xff] }
 0x242   :  { %v1861_v61 = vand.u32 65535, %v1857_v49  ;;  %v1862_v48 = vshrl.u32 %v1857_v49, 16  ;;  %v1806_v13 = vxor.u32 2147483648, %v1789_v58  ;;  %v1826_v22 = vshrl.u32 %v3133_v42, %v3673_v21  ;;  %v2067_v21 = vld [vmem:[#allocation9 + $0x330] sm:$0xff] }
 0x243   :  { %v3737_v14 = vmul.u32 %v1884_v17, %v1859_v50  ;;  %v1887_v25 = vmul.u32 %v1883_v23, %v1860_v55  ;;  %v1885_v15 = vmul.u32 %v1883_v23, %v1859_v50  ;;  %v1888_v52 = vmul.u32 %v1884_v17, %v1860_v55  ;;  %2169 = vmatpush.msra.mxu3 %v2071_v36  ;;  %v2074_v36 = vld [vmem:[#allocation9 + $0x368] sm:$0xff] }
 0x244   :  { %v1864_v59 = vmul.u32 %v1862_v48, %v1859_v50  ;;  %v1865_v11 = vmul.u32 %v1861_v61, %v1860_v55  ;;  %v1863_v32 = vmul.u32 %v1861_v61, %v1859_v50  ;;  %v1866_v24 = vmul.u32 %v1862_v48, %v1860_v55 }
 0x245   :  { %v1889_v27 = vshll.u32 %v3737_v14, 16  ;;  %v1891_v51 = vshll.u32 %v1887_v25, 16  ;;  %v1797_v62 = vmul.f32 %v1796_v40, %v3671_v0  ;;  %v1846_v55 = vsel %vm1842_vm3, %v1826_v22, %v3698_v4  ;;  %2170 = vmatpush.msra.mxu3 %v2069_v26  ;;  %v2076_v40 = vld [vmem:[#allocation9 + $0x378] sm:$0xff] }
 0x246   :  { %v1867_v3 = vshll.u32 %v1864_v59, 16  ;;  %v1869_v9 = vshll.u32 %v1865_v11, 16  ;;  %v1868_v35 = vshrl.u32 %v1864_v59, 16  ;;  %v1870_v41 = vshrl.u32 %v1865_v11, 16 }
 0x247   :  { %vm1893_vm11 = vc.u32 %v1885_v15, %v1889_v27  ;;  %v1895_v47 = vadd.s32 %v1889_v27, %v1885_v15  ;;  %v1803_v50 = vxor.u32 2147483648, %v1797_v62  ;;  %v1890_v61 = vshrl.u32 %v3737_v14, 16  ;;  %2171 = vmatpush.msra.mxu3 %v2067_v21 }
 0x248   :  { %vm1871_vm7 = vc.u32 %v1863_v32, %v1867_v3  ;;  %v1873_v1 = vadd.s32 %v1867_v3, %v1863_v32  ;;  %v1894_v38 = vsel %vm1893_vm11, 1, %v3139_v29  ;;  %v1807_v23 = vsel %vm1805_vm13, %v1806_v13, %v1797_v62  ;;  %v2061_v3 = vld [vmem:[#allocation9 + $0x300] sm:$0xff] }
 0x249   :  { %v1872_v31 = vsel %vm1871_vm7, 1, %v3139_v29  ;;  %v1896_v49 = vadd.s32 %v1894_v38, %v1888_v52  ;;  %vm1897_vm12 = vc.u32 %v1895_v47, %v1891_v51  ;;  %v1804_v17 = vsel %vm1802_vm9, %v1789_v58, %v1803_v50  ;;  %2172 = vmatpush.msra.mxu3 %v2065_v5  ;;  %v2078_v52 = vld [vmem:[#allocation9 + $0x388] sm:$0xff]  ;;  %v2068_v50 = vld [vmem:[#allocation9 + $0x338] sm:$0xff] }
 0x24a   :  { %v1874_v8 = vadd.s32 %v1872_v31, %v1866_v24  ;;  %vm1875_vm10 = vc.u32 %v1873_v1, %v1869_v9  ;;  %v1898_v0 = vsel %vm1897_vm12, 1, %v3139_v29  ;;  %v1808_v4 = vsel %vm1801_vm8, %v1804_v17, %v1807_v23  ;;  %v2090_v24 = vld [vmem:[#allocation9 + $0x3e8] sm:$0xff]  ;;  %v2084_v1 = vld [vmem:[#allocation9 + $0x3b8] sm:$0xff] }
 0x24b   :  { %v1876_v37 = vsel %vm1875_vm10, 1, %v3139_v29  ;;  %v1900_v48 = vadd.s32 %v1898_v0, %v1896_v49  ;;  %v1892_v54 = vshrl.u32 %v1887_v25, 16  ;;  %v1809_v11 = vsel %vm1798_vm14, nan, %v1808_v4  ;;  %2173 = vmatpush.msra.mxu3 %v2063_v57  ;;  %v2088_v25 = vld [vmem:[#allocation9 + $0x3d8] sm:$0xff] }
 0x24c   :  { %v1878_v20 = vadd.s32 %v1876_v37, %v1874_v8  ;;  %v1899_v14 = vadd.s32 %v1895_v47, %v1891_v51  ;;  %v1849_v39 = vsel %vm1843_vm6, %v1846_v55, %v1848_v33  ;;  %2155 = vmatmul.f32.vlgmr.msra.gmra.mxu2 %v1809_v11  ;;  %v2072_v37 = vld [vmem:[#allocation9 + $0x358] sm:$0xff]  ;;  %vm1811_vm3 = vcmp.le.f32.partialorder %v1810_v10, 0.7853982 }
 0x24d   :  { %v1901_v59 = vadd.s32 %v1900_v48, %v1890_v61  ;;  %v1903_v16 = vmul.u32 %v3683_v2, %v1849_v39  ;;  %2174 = vmatpush.msra.mxu3 %v2061_v3  ;;  %v2080_v2 = vld [vmem:[#allocation9 + $0x398] sm:$0xff]  ;;  %v2062_v61 = vld [vmem:[#allocation9 + $0x308] sm:$0xff]  ;;  %vm1953_vm7 = vweird.f32 %v3659_v7 }
 0x24e   :  { %v1879_v43 = vadd.s32 %v1878_v20, %v1868_v35  ;;  %v2070_v20 = vld [vmem:[#allocation9 + $0x348] sm:$0xff]  ;;  %v2064_v0 = vld [vmem:[#allocation9 + $0x318] sm:$0xff] }
 0x24f   :  { %v1902_v32 = vadd.s32 %v1901_v59, %v1892_v54  ;;  %2239 = vmatpush.msrb.mxu3 %v2092_v18 }
 0x250   :  { %v1880_v63 = vadd.s32 %v1879_v43, %v1870_v41  ;;  %v2066_v41 = vld [vmem:[#allocation9 + $0x328] sm:$0xff] }
 0x251   :  { %v1906_v30 = vadd.s32 1, %v1902_v32  ;;  %2240 = vmatpush.msrb.mxu3 %v2090_v24 }
 0x252   :  { %vm1905_vm15 = vc.u32 %v1880_v63, %v1899_v14  ;;  %v1904_v47 = vadd.s32 %v1899_v14, %v1880_v63 }
 0x253   :  { %v1907_v19 = vsel %vm1905_vm15, %v1906_v30, %v1902_v32  ;;  %2241 = vmatpush.msrb.mxu3 %v2088_v25 }
 0x254   :  { %v1908_v9 = vadd.s32 %v1907_v19, %v1903_v16  ;;  %2235 = vmatmul.f32.vlgmr.msrb.gmra.mxu2 %v1809_v11 }
 0x255   :  { %2242 = vmatpush.msrb.mxu3 %v2086_v12 }
 0x256   :  { %v1909_v60 = vadd.s32 536870912, %v1908_v9 }
 0x257   :  { %2243 = vmatpush.msrb.mxu3 %v2084_v1 }
 0x258   :  { %v1910_v27 = vshrl.u32 %v1909_v60, 30 }
 0x259   :  { %2244 = vmatpush.msrb.mxu3 %v2082_v28 }
 0x25a   :  { %v1911_v58 = vshll.u32 %v1910_v27, 30  ;;  %v1934_v23 = vsub.s32 4, %v1910_v27 }
 0x25b   :  { %2245 = vmatpush.msrb.mxu3 %v2080_v2 }
 0x25c   :  { %v1912_v31 = vsub.s32 %v1908_v9, %v1911_v58  ;;  %v1935_v59 = vsel %vm1812_vm2, %v1934_v23, %v1910_v27 }
 0x25d   :  { %2246 = vmatpush.msrb.mxu3 %v2078_v52  ;;  %v1937_v39 = vsel %vm1811_vm3, 0, %v1935_v59 }
 0x25e   :  { %vm1913_vm0 = vcmp.lt.s32.totalorder %v1912_v31, 0  ;;  %v1914_v15 = vsub.s32 0, %v1912_v31  ;;  %v1954_v16 = vadd.s32 3, %v1937_v39 }
 0x25f   :  { %2247 = vmatpush.msrb.mxu3 %v2076_v40 }
 0x260   :  { %v1915_v34 = vsel %vm1913_vm0, %v1914_v15, %v1912_v31  ;;  %v1955_v9 = vand.u32 3, %v1954_v16  ;;  %v2116_v15 = vpop.f32.mrf.mxu0 }
 0x261   :  { %v1916_v8 = vclz %v1915_v34  ;;  %2248 = vmatpush.msrb.mxu3 %v2074_v36 }
 0x262   :  { %vm1957_vm4 = vcmp.eq.s32.totalorder %v1955_v9, 0  ;;  %vm1960_vm5 = vcmp.eq.s32.totalorder %v1955_v9, 2  ;;  %vm1956_vm6 = vcmp.lt.s32.totalorder %v1955_v9, 2 }
 0x263   :  { %v2856_v35 = vadd.s32 4294967294, %v1916_v8  ;;  %2249 = vmatpush.msrb.mxu3 %v2072_v37 }
 0x265   :  { %vm2857_vm1 = vcmp.lt.s32.totalorder %v2856_v35, 0  ;;  %2250 = vmatpush.msrb.mxu3 %v2070_v20 }
 0x266   :  { %v1919_v51 = vsel %vm2857_vm1, 0, %v2856_v35 }
 0x267   :  { %v1920_v62 = vsub.s32 32, %v1919_v51  ;;  %v1924_v13 = vsub.s32 4294967266, %v1919_v51  ;;  %v1921_v38 = vshll.u32 %v1912_v31, %v1919_v51  ;;  %2251 = vmatpush.msrb.mxu3 %v2068_v50  ;;  %v2093_v31 = vld [vmem:[#allocation10] sm:$0x3] }
 0x268   :  { %v2095_v2 = vperm.slane %v2093_v31, 0  ;;  %v2096_v35 = vperm.slane %v2093_v31, 1  ;;  %v2196_v37 = vpop.f32.mrf.mxu0 }
 0x269   :  { %v1922_v22 = vshrl.u32 %v1904_v47, %v1920_v62  ;;  %v1925_v45 = vadd.s32 127, %v1924_v13  ;;  %2252 = vmatpush.msrb.mxu3 %v2066_v41 }
 0x26a   :  { %v2117_v8 = vadd.f32 %v2116_v15, %v2095_v2  ;;  %v2197_v13 = vadd.f32 %v2196_v37, %v2096_v35  ;;  %v2581_v15 = vld [vmem:[#allocation12 + $0x60] sm:$0xff] }
 0x26b   :  { %v1923_v26 = vor.u32 %v1922_v22, %v1921_v38  ;;  %v1926_v49 = vshll.u32 %v1925_v45, 23  ;;  %2253 = vmatpush.msrb.mxu3 %v2064_v0 }
 0x26d   :  { %v1927_v43 = vor.u32 4788187, %v1926_v49  ;;  %v1930_v21 = vcvt.s32.f32 %v1923_v26  ;;  %2254 = vmatpush.msrb.mxu3 %v2062_v61 }
 0x26f   :  { %v1928_v55 = vand.u32 2147483647, %v1927_v43 }
 0x271   :  { %v1931_v48 = vmul.f32 %v1930_v21, %v1928_v55 }
 0x273   :  { %v1932_v33 = vxor.u32 2147483648, %v1931_v48 }
 0x275   :  { %v1933_v17 = vsel %vm1812_vm2, %v1932_v33, %v1931_v48 }
 0x276   :  { %v1936_v63 = vsel %vm1811_vm3, %v3659_v7, %v1933_v17 }
 0x277   :  { %v1938_v4 = vmul.f32 %v1936_v63, %v1936_v63 }
 0x279   :  { %v1939_v5 = vmul.f32 -0.001358992, %v1938_v4  ;;  %v1946_v54 = vmul.f32 -0.00019511016, %v1938_v4 }
 0x27a   :  { %v2136_v52 = vpop.f32.mrf.mxu1 }
 0x27b   :  { %v1940_v11 = vadd.f32 0.041655596, %v1939_v5  ;;  %v1947_v14 = vadd.f32 0.008332121, %v1946_v54  ;;  %v2137_v40 = vadd.f32 %v2136_v52, %v2117_v8 }
 0x27d   :  { %v1941_v57 = vmul.f32 %v1940_v11, %v1938_v4  ;;  %v1948_v32 = vmul.f32 %v1947_v14, %v1938_v4 }
 0x27f   :  { %v1942_v3 = vadd.f32 -0.4999988, %v1941_v57  ;;  %v1949_v30 = vadd.f32 -0.16666654, %v1948_v32  ;;  %v2584_v57 = vld [vmem:[#allocation12 + $0x78] sm:$0xff]  ;;  %v2583_v32 = vld [vmem:[#allocation12 + $0x70] sm:$0xff] }
 0x280   :  { %2602 = vmatpush.msra.mxu0 %v2584_v57 }
 0x281   :  { %v1943_v18 = vmul.f32 %v1942_v3, %v1938_v4  ;;  %v1950_v19 = vmul.f32 %v1949_v30, %v1938_v4 }
 0x282   :  { %v2216_v62 = vpop.f32.mrf.mxu1  ;;  %2603 = vmatpush.msra.mxu0 %v2583_v32 }
 0x283   :  { %v1944_v24 = vadd.f32 1.0, %v1943_v18  ;;  %v1951_v10 = vadd.f32 1.0, %v1950_v19  ;;  %v2217_v38 = vadd.f32 %v2216_v62, %v2197_v13  ;;  %v2600_v19 = vld [vmem:[#allocation12 + $0xf8] sm:$0xff] }
 0x284   :  { %2622 = vmatpush.msra.mxu1 %v2600_v19  ;;  %v2596_v13 = vld [vmem:[#allocation12 + $0xd8] sm:$0xff] }
 0x285   :  { %v1952_v25 = vmul.f32 %v1951_v10, %v1936_v63  ;;  %v1961_v60 = vxor.u32 2147483648, %v1944_v24 }
 0x287   :  { %v1958_v12 = vxor.u32 2147483648, %v1952_v25  ;;  %v1962_v1 = vsel %vm1960_vm5, %v1961_v60, %v1952_v25  ;;  %v2582_v60 = vld [vmem:[#allocation12 + $0x68] sm:$0xff] }
 0x288   :  { %2604 = vmatpush.msra.mxu0 %v2582_v60 }
 0x289   :  { %v1959_v27 = vsel %vm1957_vm4, %v1944_v24, %v1958_v12  ;;  %v2599_v12 = vld [vmem:[#allocation12 + $0xf0] sm:$0xff] }
 0x28a   :  { %v1963_v58 = vsel %vm1956_vm6, %v1959_v27, %v1962_v1  ;;  %2623 = vmatpush.msra.mxu1 %v2599_v12  ;;  %2605 = vmatpush.msra.mxu0 %v2581_v15  ;;  %v2592_v12 = vld [vmem:[#allocation12 + $0xb8] sm:$0xff] }
 0x28b   :  { %v1964_v28 = vsel %vm1953_vm7, nan, %v1963_v58 }
 0x28c   :  { %2175 = vmatmul.f32.vlgmr.msra.gmra.mxu3 %v1964_v28 }
 0x294   :  { %2255 = vmatmul.f32.vlgmr.msrb.gmra.mxu3 %v1964_v28  ;;  %v2598_v28 = vld [vmem:[#allocation12 + $0xe8] sm:$0xff] }
 0x295   :  { %2624 = vmatpush.msra.mxu1 %v2598_v28 }
 0x2cf   :  { %v2156_v34 = vpop.f32.mrf.mxu2 }
 0x2d0   :  { %v2157_v36 = vadd.f32 %v2156_v34, %v2137_v40  ;;  %v2597_v40 = vld [vmem:[#allocation12 + $0xe0] sm:$0xff] }
 0x2d1   :  { %2625 = vmatpush.msra.mxu1 %v2597_v40  ;;  %v2591_v40 = vld [vmem:[#allocation12 + $0xb0] sm:$0xff] }
 0x2d3   :  { %2626 = vmatpush.msra.mxu1 %v2596_v13 }
 0x2d7   :  { %v2236_v20 = vpop.f32.mrf.mxu2 }
 0x2d8   :  { %v2237_v45 = vadd.f32 %v2236_v20, %v2217_v38 }
 0x30f   :  { %v2176_v51 = vpop.f32.mrf.mxu3 }
 0x310   :  { %v3775_v47 = vadd.f32 %v2176_v51, %v2157_v36  ;;  %v2580_v51 = vld [vmem:[#allocation12 + $0x58] sm:$0xff] }
 0x311   :  { %2606 = vmatpush.msra.mxu0 %v2580_v51 }
 0x312   :  { %v2262_v7 = vand.u32 2139095040, %v3775_v47  ;;  %v2259_v26 = vand.u32 2147483647, %v3775_v47 }
 0x314   :  { %v2263_v22 = vshrl.u32 %v2262_v7, 23  ;;  %v2266_v0 = vand.u32 8388607, %v2259_v26 }
 0x316   :  { %v2858_v49 = vadd.s32 4294967169, %v2263_v22  ;;  %v2267_v33 = vor.u32 8388608, %v2266_v0 }
 0x317   :  { %v2256_v50 = vpop.f32.mrf.mxu3 }
 0x318   :  { %v2269_v41 = vadd.s32 1, %v2858_v49  ;;  %v3779_v43 = vadd.f32 %v2256_v50, %v2237_v45  ;;  %v3800_v58 = vshll.u32 %v2267_v33, 8  ;;  %v2579_v45 = vld [vmem:[#allocation12 + $0x50] sm:$0xff] }
 0x319   :  { %2607 = vmatpush.msra.mxu0 %v2579_v45 }
 0x31a   :  { %vm2270_vm8 = vcmp.gt.s32.totalorder %v2269_v41, 0  ;;  %v2414_v21 = vand.u32 2147483647, %v3779_v43  ;;  %v2417_v61 = vand.u32 2139095040, %v3779_v43  ;;  %v3822_v20 = vand.u32 65535, %v3800_v58 }
 0x31b   :  { %v2271_v55 = vsel %vm2270_vm8, %v2269_v41, 0 }
 0x31c   :  { %v2273_v48 = vand.u32 31, %v2271_v55  ;;  %v2418_v23 = vshrl.u32 %v2417_v61, 23  ;;  %v3785_v63 = vshrl.u32 %v2271_v55, 5  ;;  %v2421_v54 = vand.u32 8388607, %v2414_v21  ;;  %v2595_v55 = vld [vmem:[#allocation12 + $0xd0] sm:$0xff] }
 0x31d   :  { %2627 = vmatpush.msra.mxu1 %v2595_v55 }
 0x31e   :  { %v2274_v17 = vsub.s32 32, %v2273_v48  ;;  %v2276_v4 = vshll.u32 %v3133_v42, %v2273_v48  ;;  %v2279_v5 = vshll.u32 %v3134_v44, %v2273_v48  ;;  %v2282_v14 = vshll.u32 %v3135_v46, %v2273_v48 }
 0x31f   :  { %v2285_v3 = vshll.u32 %v3136_v53, %v2273_v48  ;;  %v2288_v16 = vshll.u32 %v3137_v56, %v2273_v48  ;;  %v2861_v25 = vadd.s32 4294967169, %v2418_v23  ;;  %vm2291_vm9 = vcmp.lt.s32.totalorder %v3785_v63, 1  ;;  %v2578_v48 = vld [vmem:[#allocation12 + $0x48] sm:$0xff] }
 0x320   :  { %v2277_v59 = vshrl.u32 %v3134_v44, %v2274_v17  ;;  %v2280_v11 = vshrl.u32 %v3135_v46, %v2274_v17  ;;  %v2283_v39 = vshrl.u32 %v3136_v53, %v2274_v17  ;;  %v2286_v30 = vshrl.u32 %v3137_v56, %v2274_v17  ;;  %2608 = vmatpush.msra.mxu0 %v2578_v48 }
 0x321   :  { %v2289_v18 = vshrl.u32 %v3138_v6, %v2274_v17  ;;  %vm2293_vm10 = vcmp.lt.s32.totalorder %v3785_v63, 3  ;;  %vm2294_vm11 = vcmp.lt.s32.totalorder %v3785_v63, 4  ;;  %v2422_v2 = vor.u32 8388608, %v2421_v54 }
 0x322   :  { %v2278_v24 = vor.u32 %v2277_v59, %v2276_v4  ;;  %v2281_v10 = vor.u32 %v2280_v11, %v2279_v5  ;;  %v2284_v9 = vor.u32 %v2283_v39, %v2282_v14  ;;  %v2287_v27 = vor.u32 %v2286_v30, %v2285_v3  ;;  %v2594_v4 = vld [vmem:[#allocation12 + $0xc8] sm:$0xff]  ;;  %v2577_v14 = vld [vmem:[#allocation12 + $0x40] sm:$0xff] }
 0x323   :  { %v2290_v1 = vor.u32 %v2289_v18, %v2288_v16  ;;  %v2424_v8 = vadd.s32 1, %v2861_v25  ;;  %vm2292_vm12 = vcmp.lt.s32.totalorder %v3785_v63, 2  ;;  %v2275_v49 = vshrl.u32 %v3133_v42, %v2274_v17  ;;  %v2593_v30 = vld [vmem:[#allocation12 + $0xc0] sm:$0xff]  ;;  %2628 = vmatpush.msra.mxu1 %v2594_v4  ;;  %2609 = vmatpush.msra.mxu0 %v2577_v14  ;;  %v2572_v14 = vld [vmem:[#allocation12 + $0x18] sm:$0xff] }
 0x324   :  { %v2303_v31 = vsel %vm2291_vm9, %v2281_v10, %v2284_v9  ;;  %v2300_v52 = vsel %vm2294_vm11, %v2287_v27, 920167782  ;;  %v2299_v35 = vsel %vm2291_vm9, %v2278_v24, %v2281_v10  ;;  %v2296_v7 = vsel %vm2294_vm11, %v2284_v9, 2102212464 }
 0x325   :  { %v2304_v34 = vsel %vm2294_vm11, %v2290_v1, 1326507024  ;;  %v2301_v36 = vsel %vm2293_vm10, %v2284_v9, %v2300_v52  ;;  %vm2425_vm13 = vcmp.gt.s32.totalorder %v2424_v8, 0  ;;  %v3829_v0 = vshll.u32 %v2422_v2, 8  ;;  %v2575_v2 = vld [vmem:[#allocation12 + $0x30] sm:$0xff]  ;;  %2629 = vmatpush.msra.mxu1 %v2593_v30 }
 0x326   :  { %v2305_v37 = vsel %vm2293_vm10, %v2287_v27, %v2304_v34  ;;  %v3827_v50 = vsel %vm2292_vm12, %v2299_v35, %v2301_v36  ;;  %v2426_v41 = vsel %vm2425_vm13, %v2424_v8, 0  ;;  %v3836_v33 = vsel %vm2291_vm9, %v2275_v49, %v2278_v24  ;;  %v2576_v24 = vld [vmem:[#allocation12 + $0x38] sm:$0xff] }
 0x327   :  { %v2306_v62 = vsel %vm2292_vm12, %v2303_v31, %v2305_v37  ;;  %v3840_v17 = vsel %vm2293_vm10, %v2281_v10, %v2296_v7  ;;  %v3843_v23 = vshrl.u32 %v3800_v58, 16  ;;  %v2332_v59 = vand.u32 65535, %v3827_v50  ;;  %2610 = vmatpush.msra.mxu0 %v2576_v24  ;;  %2630 = vmatpush.msra.mxu1 %v2592_v12 }
 0x328   :  { %v2310_v38 = vand.u32 65535, %v2306_v62  ;;  %v2311_v22 = vshrl.u32 %v2306_v62, 16  ;;  %v2428_v11 = vand.u32 31, %v2426_v41  ;;  %v2333_v57 = vshrl.u32 %v3827_v50, 16  ;;  %v2574_v62 = vld [vmem:[#allocation12 + $0x28] sm:$0xff]  ;;  %v2569_v50 = vld [vmem:[#allocation12] sm:$0xff] }
 0x329   :  { %v3853_v32 = vand.u32 65535, %v3829_v0  ;;  %v3856_v3 = vshrl.u32 %v3829_v0, 16  ;;  %v3859_v18 = vshrl.u32 %v2426_v41, 5  ;;  %2611 = vmatpush.msra.mxu0 %v2575_v2  ;;  %v2573_v41 = vld [vmem:[#allocation12 + $0x20] sm:$0xff]  ;;  %2631 = vmatpush.msra.mxu1 %v2591_v40  ;;  %v2570_v40 = vld [vmem:[#allocation12 + $0x8] sm:$0xff] }
 0x32a   :  { %v3832_v61 = vmul.u32 %v2311_v22, %v3822_v20  ;;  %v2312_v5 = vmul.u32 %v2310_v38, %v3822_v20  ;;  %v3849_v39 = vmul.u32 %v2310_v38, %v3843_v23  ;;  %v2315_v16 = vmul.u32 %v2311_v22, %v3843_v23  ;;  %v2590_v22 = vld [vmem:[#allocation12 + $0xa8] sm:$0xff] }
 0x32b   :  { %v3861_v19 = vsub.s32 32, %v2428_v11  ;;  %v2431_v25 = vshll.u32 %v3133_v42, %v2428_v11  ;;  %v2434_v60 = vshll.u32 %v3134_v44, %v2428_v11  ;;  %v2437_v28 = vshll.u32 %v3135_v46, %v2428_v11  ;;  %2612 = vmatpush.msra.mxu0 %v2574_v62  ;;  %2632 = vmatpush.msra.mxu1 %v2590_v22 }
 0x32c   :  { %v2316_v54 = vshll.u32 %v3832_v61, 16  ;;  %v2440_v31 = vshll.u32 %v3136_v53, %v2428_v11  ;;  %v2443_v34 = vshll.u32 %v3137_v56, %v2428_v11  ;;  %v2318_v35 = vshll.u32 %v3849_v39, 16 }
 0x32d   :  { %v2432_v27 = vshrl.u32 %v3134_v44, %v3861_v19  ;;  %v2435_v1 = vshrl.u32 %v3135_v46, %v3861_v19  ;;  %v2438_v15 = vshrl.u32 %v3136_v53, %v3861_v19  ;;  %v2441_v52 = vshrl.u32 %v3137_v56, %v3861_v19  ;;  %2613 = vmatpush.msra.mxu0 %v2573_v41 }
 0x32e   :  { %vm2320_vm14 = vc.u32 %v2312_v5, %v2316_v54  ;;  %v2322_v9 = vadd.s32 %v2316_v54, %v2312_v5  ;;  %v2444_v8 = vshrl.u32 %v3138_v6, %v3861_v19  ;;  %vm2446_vm15 = vcmp.lt.s32.totalorder %v3859_v18, 1  ;;  %v2589_v5 = vld [vmem:[#allocation12 + $0xa0] sm:$0xff] }
 0x32f   :  { %v2321_v10 = vsel %vm2320_vm14, 1, %v3139_v29  ;;  %v3880_v37 = vor.u32 %v2432_v27, %v2431_v25  ;;  %v3882_v51 = vor.u32 %v2435_v1, %v2434_v60  ;;  %v3884_v13 = vor.u32 %v2438_v15, %v2437_v28  ;;  %v2571_v27 = vld [vmem:[#allocation12 + $0x10] sm:$0xff]  ;;  %2633 = vmatpush.msra.mxu1 %v2589_v5  ;;  %2614 = vmatpush.msra.mxu0 %v2572_v14 }
 0x330   :  { %v2323_v36 = vadd.s32 %v2321_v10, %v2315_v16  ;;  %v2442_v7 = vor.u32 %v2441_v52, %v2440_v31  ;;  %v2445_v38 = vor.u32 %v2444_v8, %v2443_v34  ;;  %v3890_v45 = vmul.u32 %v2333_v57, %v3822_v20 }
 0x331   :  { %vm2449_vm0 = vcmp.lt.s32.totalorder %v3859_v18, 4  ;;  %v2454_v49 = vsel %vm2446_vm15, %v3880_v37, %v3882_v51  ;;  %vm2324_vm1 = vc.u32 %v2322_v9, %v2318_v35  ;;  %vm2448_vm2 = vcmp.lt.s32.totalorder %v3859_v18, 3  ;;  %2615 = vmatpush.msra.mxu0 %v2571_v27 }
 0x332   :  { %v2455_v55 = vsel %vm2449_vm0, %v2442_v7, 920167782  ;;  %v2458_v48 = vsel %vm2446_vm15, %v3882_v51, %v3884_v13  ;;  %v2459_v4 = vsel %vm2449_vm0, %v2445_v38, 1326507024  ;;  %vm2447_vm3 = vcmp.lt.s32.totalorder %v3859_v18, 2 }
 0x333   :  { %v2456_v54 = vsel %vm2448_vm2, %v3884_v13, %v2455_v55  ;;  %v2460_v11 = vsel %vm2448_vm2, %v2442_v7, %v2459_v4  ;;  %v2325_v30 = vsel %vm2324_vm1, 1, %v3139_v29  ;;  %v3916_v16 = vmul.u32 %v2332_v59, %v3843_v23  ;;  %2616 = vmatpush.msra.mxu0 %v2570_v40 }
 0x334   :  { %v2457_v24 = vsel %vm2447_vm3, %v2454_v49, %v2456_v54  ;;  %v2461_v10 = vsel %vm2447_vm3, %v2458_v48, %v2460_v11  ;;  %v2327_v9 = vadd.s32 %v2325_v30, %v2323_v36  ;;  %v2338_v1 = vshll.u32 %v3890_v45, 16 }
 0x335   :  { %v2465_v25 = vand.u32 65535, %v2461_v10  ;;  %v2466_v60 = vshrl.u32 %v2461_v10, 16  ;;  %v2488_v12 = vshrl.u32 %v2457_v24, 16  ;;  %v3927_v28 = vsel %vm2292_vm12, %v3836_v33, %v3840_v17  ;;  %2617 = vmatpush.msra.mxu0 %v2569_v50 }
 0x336   :  { %v2487_v31 = vand.u32 65535, %v2457_v24  ;;  %v2317_v2 = vshrl.u32 %v3832_v61, 16  ;;  %v2334_v15 = vmul.u32 %v2332_v59, %v3822_v20  ;;  %v2337_v52 = vmul.u32 %v2333_v57, %v3843_v23 }
 0x337   :  { %v2468_v34 = vmul.u32 %v2466_v60, %v3853_v32  ;;  %v2469_v8 = vmul.u32 %v2465_v25, %v3856_v3  ;;  %v2490_v63 = vmul.u32 %v2488_v12, %v3853_v32  ;;  %v2319_v33 = vshrl.u32 %v3849_v39, 16 }
 0x338   :  { %v2328_v17 = vadd.s32 %v2327_v9, %v2317_v2  ;;  %v2340_v61 = vshll.u32 %v3916_v16, 16  ;;  %v2467_v35 = vmul.u32 %v2465_v25, %v3853_v32  ;;  %v2470_v20 = vmul.u32 %v2466_v60, %v3856_v3 }
 0x339   :  { %v2471_v59 = vshll.u32 %v2468_v34, 16  ;;  %vm2342_vm4 = vc.u32 %v2334_v15, %v2338_v1  ;;  %v2473_v23 = vshll.u32 %v2469_v8, 16  ;;  %v2491_v57 = vmul.u32 %v2487_v31, %v3856_v3 }
 0x33a   :  { %v2343_v36 = vsel %vm2342_vm4, 1, %v3139_v29  ;;  %v2344_v62 = vadd.s32 %v2338_v1, %v2334_v15  ;;  %v2493_v38 = vshll.u32 %v2490_v63, 16  ;;  %v2489_v49 = vmul.u32 %v2487_v31, %v3853_v32 }
 0x33b   :  { %vm2475_vm5 = vc.u32 %v2467_v35, %v2471_v59  ;;  %v2477_v7 = vadd.s32 %v2471_v59, %v2467_v35  ;;  %v2345_v39 = vadd.s32 %v2343_v36, %v2337_v52  ;;  %v2339_v41 = vshrl.u32 %v3890_v45, 16 }
 0x33c   :  { %v2476_v22 = vsel %vm2475_vm5, 1, %v3139_v29  ;;  %vm2346_vm6 = vc.u32 %v2344_v62, %v2340_v61  ;;  %v2492_v48 = vmul.u32 %v2488_v12, %v3856_v3  ;;  %v2329_v5 = vadd.s32 %v2328_v17, %v2319_v33 }
 0x33d   :  { %v2478_v55 = vadd.s32 %v2476_v22, %v2470_v20  ;;  %v2347_v4 = vsel %vm2346_vm6, 1, %v3139_v29  ;;  %vm2479_vm7 = vc.u32 %v2477_v7, %v2473_v23  ;;  %v2472_v11 = vshrl.u32 %v2468_v34, 16 }
 0x33e   :  { %v2349_v54 = vadd.s32 %v2347_v4, %v2345_v39  ;;  %v2480_v14 = vsel %vm2479_vm7, 1, %v3139_v29  ;;  %v2495_v24 = vshll.u32 %v2491_v57, 16  ;;  %vm2497_vm8 = vc.u32 %v2489_v49, %v2493_v38 }
 0x33f   :  { %v2482_v30 = vadd.s32 %v2480_v14, %v2478_v55  ;;  %v2499_v10 = vadd.s32 %v2493_v38, %v2489_v49  ;;  %v2451_v32 = vsel %vm2449_vm0, %v3884_v13, 2102212464  ;;  %v2341_v45 = vshrl.u32 %v3916_v16, 16 }
 0x340   :  { %v2350_v9 = vadd.s32 %v2349_v54, %v2339_v41  ;;  %v2498_v3 = vsel %vm2497_vm8, 1, %v3139_v29  ;;  %v2348_v25 = vadd.s32 %v2344_v62, %v2340_v61  ;;  %v2430_v27 = vshrl.u32 %v3133_v42, %v3861_v19 }
 0x341   :  { %v2483_v60 = vadd.s32 %v2482_v30, %v2472_v11  ;;  %v2500_v12 = vadd.s32 %v2498_v3, %v2492_v48  ;;  %vm2501_vm9 = vc.u32 %v2499_v10, %v2495_v24  ;;  %v2474_v31 = vshrl.u32 %v2469_v8, 16  ;;  %v2588_v3 = vld [vmem:[#allocation12 + $0x98] sm:$0xff] }
 0x342   :  { %v2351_v1 = vadd.s32 %v2350_v9, %v2341_v45  ;;  %v2502_v2 = vsel %vm2501_vm9, 1, %v3139_v29  ;;  %vm2354_vm10 = vc.u32 %v2329_v5, %v2348_v25  ;;  %v2494_v15 = vshrl.u32 %v2490_v63, 16  ;;  %2634 = vmatpush.msra.mxu1 %v2588_v3 }
 0x343   :  { %v2504_v52 = vadd.s32 %v2502_v2, %v2500_v12  ;;  %v2450_v13 = vsel %vm2446_vm15, %v2430_v27, %v3880_v37  ;;  %v2452_v16 = vsel %vm2448_vm2, %v3882_v51, %v2451_v32  ;;  %v2484_v40 = vadd.s32 %v2483_v60, %v2474_v31  ;;  %v2587_v60 = vld [vmem:[#allocation12 + $0x90] sm:$0xff]  ;;  %v2586_v2 = vld [vmem:[#allocation12 + $0x88] sm:$0xff] }
 0x344   :  { %v2355_v34 = vadd.s32 1, %v2351_v1  ;;  %v2352_v19 = vmul.u32 %v3800_v58, %v3927_v28  ;;  %v2496_v33 = vshrl.u32 %v2491_v57, 16  ;;  %v2503_v61 = vadd.s32 %v2499_v10, %v2495_v24  ;;  %2635 = vmatpush.msra.mxu1 %v2587_v60 }
 0x345   :  { %v2505_v8 = vadd.s32 %v2504_v52, %v2494_v15  ;;  %v2453_v63 = vsel %vm2447_vm3, %v2450_v13, %v2452_v16  ;;  %v2353_v4 = vadd.s32 %v2348_v25, %v2329_v5  ;;  %v2585_v16 = vld [vmem:[#allocation12 + $0x80] sm:$0xff]  ;;  %vm2261_vm0 = vcmp.lt.s32.totalorder %v3775_v47, 0 }
 0x346   :  { %v2356_v17 = vsel %vm2354_vm10, %v2355_v34, %v2351_v1  ;;  %vm2509_vm11 = vc.u32 %v2484_v40, %v2503_v61  ;;  %v2507_v50 = vmul.u32 %v3829_v0, %v2453_v63  ;;  %v2508_v12 = vadd.s32 %v2503_v61, %v2484_v40  ;;  %2636 = vmatpush.msra.mxu1 %v2586_v2 }
 0x347   :  { %v2357_v35 = vadd.s32 %v2356_v17, %v2352_v19  ;;  %v2506_v20 = vadd.s32 %v2505_v8, %v2496_v33  ;;  %vm3979_vm1 = vcmp.le.f32.partialorder %v2259_v26, 0.7853982  ;;  %vm2416_vm2 = vcmp.lt.s32.totalorder %v3779_v43, 0 }
 0x348   :  { %2637 = vmatpush.msra.mxu1 %v2585_v16  ;;  %vm3991_vm3 = vcmp.le.f32.partialorder %v2414_v21, 0.7853982  ;;  %vm2402_vm7 = vweird.f32 %v3775_v47 }
 0x349   :  { %v2358_v37 = vadd.s32 536870912, %v2357_v35  ;;  %v2510_v59 = vadd.s32 1, %v2506_v20 }
 0x34b   :  { %v3970_v51 = vshrl.u32 %v2358_v37, 30  ;;  %v2511_v23 = vsel %vm2509_vm11, %v2510_v59, %v2506_v20  ;;  %vm2557_vm11 = vweird.f32 %v3779_v43 }
 0x34c   :  { %v2512_v36 = vadd.s32 %v2511_v23, %v2507_v50 }
 0x34d   :  { %v2360_v58 = vshll.u32 %v3970_v51, 30  ;;  %v2383_v20 = vsub.s32 4, %v3970_v51 }
 0x34e   :  { %v2513_v28 = vadd.s32 536870912, %v2512_v36 }
 0x34f   :  { %v2361_v57 = vsub.s32 %v2357_v35, %v2360_v58 }
 0x350   :  { %v3973_v62 = vshrl.u32 %v2513_v28, 30  ;;  %v2384_v28 = vsel %vm2261_vm0, %v2383_v20, %v3970_v51 }
 0x351   :  { %vm2362_vm12 = vcmp.lt.s32.totalorder %v2361_v57, 0  ;;  %v2363_v18 = vsub.s32 0, %v2361_v57  ;;  %v2386_v51 = vsel %vm3979_vm1, 0, %v2384_v28  ;;  %v2810_v28 = vld [vmem:[%s4147_s8 + $0x68] sm:$0xff] }
 0x352   :  { %v2515_v7 = vshll.u32 %v3973_v62, 30 }
 0x353   :  { %v2364_v39 = vsel %vm2362_vm12, %v2363_v18, %v2361_v57 }
 0x354   :  { %v2365_v38 = vclz %v2364_v39  ;;  %v2516_v22 = vsub.s32 %v2512_v36, %v2515_v7  ;;  %v2538_v39 = vsub.s32 4, %v3973_v62 }
 0x356   :  { %v2859_v49 = vadd.s32 4294967294, %v2365_v38  ;;  %vm2517_vm13 = vcmp.lt.s32.totalorder %v2516_v22, 0  ;;  %v2518_v0 = vsub.s32 0, %v2516_v22 }
 0x358   :  { %vm2860_vm14 = vcmp.lt.s32.totalorder %v2859_v49, 0  ;;  %v2519_v41 = vsel %vm2517_vm13, %v2518_v0, %v2516_v22 }
 0x359   :  { %v2368_v55 = vsel %vm2860_vm14, 0, %v2859_v49  ;;  %v2520_v48 = vclz %v2519_v41 }
 0x35a   :  { %v2369_v54 = vsub.s32 32, %v2368_v55  ;;  %v2373_v11 = vsub.s32 4294967266, %v2368_v55  ;;  %v2370_v30 = vshll.u32 %v2361_v57, %v2368_v55 }
 0x35b   :  { %v2862_v14 = vadd.s32 4294967294, %v2520_v48 }
 0x35c   :  { %v2371_v24 = vshrl.u32 %v2353_v4, %v2369_v54  ;;  %v2374_v10 = vadd.s32 127, %v2373_v11  ;;  %v2539_v4 = vsel %vm2416_vm2, %v2538_v39, %v3973_v62  ;;  %v2403_v54 = vadd.s32 3, %v2386_v51  ;;  %v2806_v51 = vld [vmem:[%s4147_s8 + $0x48] sm:$0xff] }
 0x35d   :  { %vm2863_vm15 = vcmp.lt.s32.totalorder %v2862_v14, 0 }
 0x35e   :  { %v2372_v32 = vor.u32 %v2371_v24, %v2370_v30  ;;  %v2375_v45 = vshll.u32 %v2374_v10, 23  ;;  %v2523_v9 = vsel %vm2863_vm15, 0, %v2862_v14  ;;  %v2541_v10 = vsel %vm3991_vm3, 0, %v2539_v4 }
 0x35f   :  { %v2524_v27 = vsub.s32 32, %v2523_v9  ;;  %v2528_v1 = vsub.s32 4294967266, %v2523_v9  ;;  %v2525_v15 = vshll.u32 %v2516_v22, %v2523_v9  ;;  %v2404_v60 = vand.u32 3, %v2403_v54 }
 0x360   :  { %v2376_v31 = vor.u32 4788187, %v2375_v45  ;;  %v2379_v13 = vcvt.s32.f32 %v2372_v32  ;;  %v2558_v2 = vadd.s32 3, %v2541_v10 }
 0x361   :  { %v2526_v5 = vshrl.u32 %v2508_v12, %v2524_v27  ;;  %v2529_v25 = vadd.s32 127, %v2528_v1  ;;  %vm2406_vm4 = vcmp.eq.s32.totalorder %v2404_v60, 0  ;;  %vm2409_vm5 = vcmp.eq.s32.totalorder %v2404_v60, 2 }
 0x362   :  { %v2377_v52 = vand.u32 2147483647, %v2376_v31  ;;  %vm2405_vm6 = vcmp.lt.s32.totalorder %v2404_v60, 2 }
 0x363   :  { %v2527_v34 = vor.u32 %v2526_v5, %v2525_v15  ;;  %v2530_v19 = vshll.u32 %v2529_v25, 23 }
 0x364   :  { %v2380_v33 = vmul.f32 %v2379_v13, %v2377_v52 }
 0x365   :  { %v2531_v8 = vor.u32 4788187, %v2530_v19  ;;  %v2534_v61 = vcvt.s32.f32 %v2527_v34  ;;  %v2559_v34 = vand.u32 3, %v2558_v2 }
 0x366   :  { %v2381_v17 = vxor.u32 2147483648, %v2380_v33 }
 0x367   :  { %v2532_v40 = vand.u32 2147483647, %v2531_v8  ;;  %vm2561_vm8 = vcmp.eq.s32.totalorder %v2559_v34, 0  ;;  %vm2564_vm9 = vcmp.eq.s32.totalorder %v2559_v34, 2  ;;  %vm2560_vm10 = vcmp.lt.s32.totalorder %v2559_v34, 2 }
 0x368   :  { %v2382_v35 = vsel %vm2261_vm0, %v2381_v17, %v2380_v33 }
 0x369   :  { %v2385_v37 = vsel %vm3979_vm1, %v3775_v47, %v2382_v35  ;;  %v2535_v59 = vmul.f32 %v2534_v61, %v2532_v40 }
 0x36a   :  { %v2387_v50 = vmul.f32 %v2385_v37, %v2385_v37 }
 0x36b   :  { %v2536_v23 = vxor.u32 2147483648, %v2535_v59 }
 0x36c   :  { %v2388_v36 = vmul.f32 -0.001358992, %v2387_v50  ;;  %v2395_v58 = vmul.f32 -0.00019511016, %v2387_v50 }
 0x36d   :  { %v2537_v57 = vsel %vm2416_vm2, %v2536_v23, %v2535_v59 }
 0x36e   :  { %v2389_v18 = vadd.f32 0.041655596, %v2388_v36  ;;  %v2396_v7 = vadd.f32 0.008332121, %v2395_v58  ;;  %v2540_v38 = vsel %vm3991_vm3, %v3779_v43, %v2537_v57  ;;  %v2812_v36 = vld [vmem:[%s4147_s8 + $0x78] sm:$0xff]  ;;  %v2811_v58 = vld [vmem:[%s4147_s8 + $0x70] sm:$0xff] }
 0x36f   :  { %v2542_v22 = vmul.f32 %v2540_v38, %v2540_v38  ;;  %2814 = vmatpush.msra.mxu2 %v2812_v36  ;;  %v2809_v57 = vld [vmem:[%s4147_s8 + $0x60] sm:$0xff] }
 0x370   :  { %v2390_v49 = vmul.f32 %v2389_v18, %v2387_v50  ;;  %v2397_v21 = vmul.f32 %v2396_v7, %v2387_v50  ;;  %v2808_v7 = vld [vmem:[%s4147_s8 + $0x58] sm:$0xff] }
 0x371   :  { %v2543_v0 = vmul.f32 -0.001358992, %v2542_v22  ;;  %v2550_v41 = vmul.f32 -0.00019511016, %v2542_v22  ;;  %2815 = vmatpush.msra.mxu2 %v2811_v58  ;;  %v2797_v58 = vld [vmem:[%s4147_s8] sm:$0xff] }
 0x372   :  { %v2391_v55 = vadd.f32 -0.4999988, %v2390_v49  ;;  %v2398_v48 = vadd.f32 -0.16666654, %v2397_v21 }
 0x373   :  { %v2544_v11 = vadd.f32 0.041655596, %v2543_v0  ;;  %v2551_v14 = vadd.f32 0.008332121, %v2550_v41  ;;  %2816 = vmatpush.msra.mxu2 %v2810_v28  ;;  %v2805_v41 = vld [vmem:[%s4147_s8 + $0x40] sm:$0xff] }
 0x374   :  { %v2392_v30 = vmul.f32 %v2391_v55, %v2387_v50  ;;  %v2399_v24 = vmul.f32 %v2398_v48, %v2387_v50  ;;  %v2804_v48 = vld [vmem:[%s4147_s8 + $0x38] sm:$0xff] }
 0x375   :  { %v2545_v32 = vmul.f32 %v2544_v11, %v2542_v22  ;;  %v2552_v45 = vmul.f32 %v2551_v14, %v2542_v22  ;;  %2817 = vmatpush.msra.mxu2 %v2809_v57 }
 0x376   :  { %v2393_v9 = vadd.f32 1.0, %v2392_v30  ;;  %v2400_v3 = vadd.f32 1.0, %v2399_v24 }
 0x377   :  { %v2546_v12 = vadd.f32 -0.4999988, %v2545_v32  ;;  %v2553_v27 = vadd.f32 -0.16666654, %v2552_v45  ;;  %2818 = vmatpush.msra.mxu2 %v2808_v7  ;;  %v2803_v45 = vld [vmem:[%s4147_s8 + $0x30] sm:$0xff] }
 0x378   :  { %v2401_v1 = vmul.f32 %v2400_v3, %v2385_v37  ;;  %v2410_v31 = vxor.u32 2147483648, %v2393_v9  ;;  %v2601_v37 = vld [vmem:[#allocation13] sm:$0x1] }
 0x379   :  { %v2547_v15 = vmul.f32 %v2546_v12, %v2542_v22  ;;  %v2554_v62 = vmul.f32 %v2553_v27, %v2542_v22  ;;  %v2807_v22 = vld [vmem:[%s4147_s8 + $0x50] sm:$0xff] }
 0x37a   :  { %v2407_v5 = vxor.u32 2147483648, %v2401_v1  ;;  %v2411_v16 = vsel %vm2409_vm5, %v2410_v31, %v2401_v1  ;;  %2819 = vmatpush.msra.mxu2 %v2807_v22  ;;  %v2802_v1 = vld [vmem:[%s4147_s8 + $0x28] sm:$0xff] }
 0x37b   :  { %v2548_v25 = vadd.f32 1.0, %v2547_v15  ;;  %v2555_v52 = vadd.f32 1.0, %v2554_v62  ;;  %v2801_v15 = vld [vmem:[%s4147_s8 + $0x20] sm:$0xff] }
 0x37c   :  { %v2408_v13 = vsel %vm2406_vm4, %v2393_v9, %v2407_v5  ;;  %2820 = vmatpush.msra.mxu2 %v2806_v51 }
 0x37d   :  { %v2412_v19 = vsel %vm2405_vm6, %v2408_v13, %v2411_v16  ;;  %v2556_v33 = vmul.f32 %v2555_v52, %v2540_v38  ;;  %v2565_v8 = vxor.u32 2147483648, %v2548_v25  ;;  %v2800_v13 = vld [vmem:[%s4147_s8 + $0x18] sm:$0xff] }
 0x37e   :  { %v2413_v17 = vsel %vm2402_vm7, nan, %v2412_v19  ;;  %2821 = vmatpush.msra.mxu2 %v2805_v41 }
 0x37f   :  { %2618 = vmatmul.f32.vlgmr.msra.gmra.mxu0 %v2413_v17  ;;  %v2562_v40 = vxor.u32 2147483648, %v2556_v33  ;;  %v2566_v63 = vsel %vm2564_vm9, %v2565_v8, %v2556_v33 }
 0x380   :  { %2822 = vmatpush.msra.mxu2 %v2804_v48 }
 0x381   :  { %v2563_v61 = vsel %vm2561_vm8, %v2548_v25, %v2562_v40 }
 0x382   :  { %v2567_v35 = vsel %vm2560_vm10, %v2563_v61, %v2566_v63  ;;  %2823 = vmatpush.msra.mxu2 %v2803_v45  ;;  %v2799_v63 = vld [vmem:[%s4147_s8 + $0x10] sm:$0xff] }
 0x383   :  { %v2568_v20 = vsel %vm2557_vm11, nan, %v2567_v35 }
 0x384   :  { %2638 = vmatmul.f32.vlgmr.msra.gmra.mxu1 %v2568_v20  ;;  %2824 = vmatpush.msra.mxu2 %v2802_v1 }
 0x386   :  { %2825 = vmatpush.msra.mxu2 %v2801_v15 }
 0x388   :  { %2826 = vmatpush.msra.mxu2 %v2800_v13 }
 0x38a   :  { %2827 = vmatpush.msra.mxu2 %v2799_v63 }
 0x3fc   :  { %v2619_v59 = vpop.f32.mrf.mxu0 }
 0x3fd   :  { %v2620_v50 = vadd.f32 %v2619_v59, %v2601_v37  ;;  %v2798_v37 = vld [vmem:[%s4147_s8 + $0x8] sm:$0xff] }
 0x3fe   :  { %2828 = vmatpush.msra.mxu2 %v2798_v37 }
 0x400   :  { %2829 = vmatpush.msra.mxu2 %v2797_v58 }
 0x401   :  { %v2639_v47 = vpop.f32.mrf.mxu1 }
 0x402   :  { %v4010_v23 = vadd.f32 %v2639_v47, %v2620_v50 }
 0x404   :  { %v2645_v43 = vand.u32 2139095040, %v4010_v23  ;;  %v2642_v39 = vand.u32 2147483647, %v4010_v23  ;;  %vm2644_vm8 = vcmp.lt.s32.totalorder %v4010_v23, 0 }
 0x406   :  { %v2646_v26 = vshrl.u32 %v2645_v43, 23  ;;  %v2649_v49 = vand.u32 8388607, %v2642_v39  ;;  %vm2643_vm9 = vcmp.le.f32.partialorder %v2642_v39, 0.7853982 }
 0x408   :  { %v2864_v18 = vadd.s32 4294967169, %v2646_v26  ;;  %v2650_v4 = vor.u32 8388608, %v2649_v49 }
 0x40a   :  { %v2652_v38 = vadd.s32 1, %v2864_v18  ;;  %v4073_v2 = vshll.u32 %v2650_v4, 8 }
 0x40c   :  { %vm2653_vm12 = vcmp.gt.s32.totalorder %v2652_v38, 0  ;;  %v2691_v19 = vand.u32 65535, %v4073_v2  ;;  %v2692_v33 = vshrl.u32 %v4073_v2, 16 }
 0x40d   :  { %v2654_v21 = vsel %vm2653_vm12, %v2652_v38, 0 }
 0x40e   :  { %v2656_v0 = vand.u32 31, %v2654_v21  ;;  %v4045_v54 = vshrl.u32 %v2654_v21, 5 }
 0x410   :  { %v4040_v55 = vsub.s32 32, %v2656_v0  ;;  %v2659_v11 = vshll.u32 %v3133_v42, %v2656_v0  ;;  %v2662_v14 = vshll.u32 %v3134_v44, %v2656_v0  ;;  %v2665_v10 = vshll.u32 %v3135_v46, %v2656_v0 }
 0x411   :  { %v2668_v9 = vshll.u32 %v3136_v53, %v2656_v0  ;;  %v2671_v60 = vshll.u32 %v3137_v56, %v2656_v0  ;;  %vm2674_vm13 = vcmp.lt.s32.totalorder %v4045_v54, 1  ;;  %vm2677_vm14 = vcmp.lt.s32.totalorder %v4045_v54, 4 }
 0x412   :  { %v2660_v30 = vshrl.u32 %v3134_v44, %v4040_v55  ;;  %v2663_v24 = vshrl.u32 %v3135_v46, %v4040_v55  ;;  %v2666_v32 = vshrl.u32 %v3136_v53, %v4040_v55  ;;  %v2669_v3 = vshrl.u32 %v3137_v56, %v4040_v55 }
 0x413   :  { %v2672_v44 = vshrl.u32 %v3138_v6, %v4040_v55  ;;  %vm2676_vm15 = vcmp.lt.s32.totalorder %v4045_v54, 3  ;;  %vm2675_vm0 = vcmp.lt.s32.totalorder %v4045_v54, 2  ;;  %v2658_v4 = vshrl.u32 %v3133_v42, %v4040_v55 }
 0x414   :  { %v4065_v12 = vor.u32 %v2660_v30, %v2659_v11  ;;  %v4067_v46 = vor.u32 %v2663_v24, %v2662_v14  ;;  %v2667_v27 = vor.u32 %v2666_v32, %v2665_v10  ;;  %v2670_v31 = vor.u32 %v2669_v3, %v2668_v9 }
 0x415   :  { %v2673_v53 = vor.u32 %v2672_v44, %v2671_v60 }
 0x416   :  { %v2682_v56 = vsel %vm2674_vm13, %v4065_v12, %v4067_v46  ;;  %v2686_v6 = vsel %vm2674_vm13, %v4067_v46, %v2667_v27  ;;  %v2683_v62 = vsel %vm2677_vm14, %v2670_v31, 920167782  ;;  %v2679_v0 = vsel %vm2677_vm14, %v2667_v27, 2102212464 }
 0x417   :  { %v2687_v5 = vsel %vm2677_vm14, %v2673_v53, 1326507024  ;;  %v2684_v25 = vsel %vm2676_vm15, %v2667_v27, %v2683_v62  ;;  %v2678_v32 = vsel %vm2674_vm13, %v2658_v4, %v4065_v12  ;;  %v2680_v45 = vsel %vm2676_vm15, %v4067_v46, %v2679_v0 }
 0x418   :  { %v2688_v52 = vsel %vm2676_vm15, %v2670_v31, %v2687_v5  ;;  %v2685_v16 = vsel %vm2675_vm0, %v2682_v56, %v2684_v25  ;;  %v2681_v55 = vsel %vm2675_vm0, %v2678_v32, %v2680_v45  ;;  %vm2785_vm13 = vweird.f32 %v4010_v23  ;;  %v2813_v32 = vld [vmem:[#allocation15] sm:$0x1] }
 0x419   :  { %v2689_v34 = vsel %vm2675_vm0, %v2686_v6, %v2688_v52  ;;  %v2715_v40 = vand.u32 65535, %v2685_v16  ;;  %v2716_v61 = vshrl.u32 %v2685_v16, 16  ;;  %v2735_v31 = vmul.u32 %v4073_v2, %v2681_v55 }
 0x41a   :  { %v2693_v8 = vand.u32 65535, %v2689_v34  ;;  %v2694_v17 = vshrl.u32 %v2689_v34, 16  ;;  %vm2835_vm14 = vcmask 8192  }
 0x41b   :  { %v2718_v59 = vmul.u32 %v2716_v61, %v2691_v19  ;;  %v2719_v50 = vmul.u32 %v2715_v40, %v2692_v33  ;;  %v2717_v28 = vmul.u32 %v2715_v40, %v2691_v19  ;;  %v2720_v7 = vmul.u32 %v2716_v61, %v2692_v33 }
 0x41c   :  { %v2696_v35 = vmul.u32 %v2694_v17, %v2691_v19  ;;  %v2697_v20 = vmul.u32 %v2693_v8, %v2692_v33  ;;  %v2695_v47 = vmul.u32 %v2693_v8, %v2691_v19  ;;  %v2698_v43 = vmul.u32 %v2694_v17, %v2692_v33 }
 0x41d   :  { %v2721_v26 = vshll.u32 %v2718_v59, 16  ;;  %v2723_v22 = vshll.u32 %v2719_v50, 16  ;;  %v2722_v24 = vshrl.u32 %v2718_v59, 16  ;;  %v2724_v60 = vshrl.u32 %v2719_v50, 16 }
 0x41e   :  { %v2699_v36 = vshll.u32 %v2696_v35, 16  ;;  %v2701_v57 = vshll.u32 %v2697_v20, 16  ;;  %v2700_v11 = vshrl.u32 %v2696_v35, 16  ;;  %v2702_v9 = vshrl.u32 %v2697_v20, 16 }
 0x41f   :  { %vm2725_vm2 = vc.u32 %v2717_v28, %v2721_v26  ;;  %v2727_v51 = vadd.s32 %v2721_v26, %v2717_v28 }
 0x420   :  { %vm2703_vm1 = vc.u32 %v2695_v47, %v2699_v36  ;;  %v2705_v18 = vadd.s32 %v2699_v36, %v2695_v47  ;;  %v2726_v21 = vsel %vm2725_vm2, 1, %v3139_v29 }
 0x421   :  { %v2704_v38 = vsel %vm2703_vm1, 1, %v3139_v29  ;;  %v2728_v48 = vadd.s32 %v2726_v21, %v2720_v7  ;;  %vm2729_vm4 = vc.u32 %v2727_v51, %v2723_v22  ;;  %v2731_v42 = vadd.s32 %v2727_v51, %v2723_v22 }
 0x422   :  { %v2706_v49 = vadd.s32 %v2704_v38, %v2698_v43  ;;  %vm2707_vm3 = vc.u32 %v2705_v18, %v2701_v57  ;;  %v2730_v30 = vsel %vm2729_vm4, 1, %v3139_v29 }
 0x423   :  { %v2708_v41 = vsel %vm2707_vm3, 1, %v3139_v29  ;;  %v2732_v10 = vadd.s32 %v2730_v30, %v2728_v48 }
 0x424   :  { %v2710_v14 = vadd.s32 %v2708_v41, %v2706_v49 }
 0x425   :  { %v2733_v44 = vadd.s32 %v2732_v10, %v2722_v24 }
 0x426   :  { %v2711_v3 = vadd.s32 %v2710_v14, %v2700_v11 }
 0x427   :  { %v2734_v29 = vadd.s32 %v2733_v44, %v2724_v60 }
 0x428   :  { %v2712_v27 = vadd.s32 %v2711_v3, %v2702_v9 }
 0x429   :  { %v2738_v1 = vadd.s32 1, %v2734_v29 }
 0x42a   :  { %vm2737_vm5 = vc.u32 %v2712_v27, %v2731_v42  ;;  %v2736_v54 = vadd.s32 %v2731_v42, %v2712_v27 }
 0x42b   :  { %v2739_v53 = vsel %vm2737_vm5, %v2738_v1, %v2734_v29 }
 0x42c   :  { %v2740_v12 = vadd.s32 %v2739_v53, %v2735_v31 }
 0x42e   :  { %v2741_v56 = vadd.s32 536870912, %v2740_v12 }
 0x430   :  { %v2742_v6 = vshrl.u32 %v2741_v56, 30 }
 0x432   :  { %v2743_v15 = vshll.u32 %v2742_v6, 30  ;;  %v2766_v59 = vsub.s32 4, %v2742_v6 }
 0x434   :  { %v2744_v46 = vsub.s32 %v2740_v12, %v2743_v15  ;;  %v2767_v43 = vsel %vm2644_vm8, %v2766_v59, %v2742_v6 }
 0x435   :  { %v2769_v57 = vsel %vm2643_vm9, 0, %v2767_v43 }
 0x436   :  { %vm2745_vm6 = vcmp.lt.s32.totalorder %v2744_v46, 0  ;;  %v2746_v62 = vsub.s32 0, %v2744_v46  ;;  %v2786_v51 = vadd.s32 3, %v2769_v57 }
 0x438   :  { %v2747_v5 = vsel %vm2745_vm6, %v2746_v62, %v2744_v46  ;;  %v2787_v41 = vand.u32 3, %v2786_v51 }
 0x439   :  { %v2748_v25 = vclz %v2747_v5 }
 0x43a   :  { %vm2789_vm10 = vcmp.eq.s32.totalorder %v2787_v41, 0  ;;  %vm2792_vm11 = vcmp.eq.s32.totalorder %v2787_v41, 2  ;;  %vm2788_vm12 = vcmp.lt.s32.totalorder %v2787_v41, 2 }
 0x43b   :  { %v2865_v52 = vadd.s32 4294967294, %v2748_v25 }
 0x43d   :  { %vm2866_vm7 = vcmp.lt.s32.totalorder %v2865_v52, 0 }
 0x43e   :  { %v2751_v13 = vsel %vm2866_vm7, 0, %v2865_v52 }
 0x43f   :  { %v2752_v16 = vsub.s32 32, %v2751_v13  ;;  %v2756_v34 = vsub.s32 4294967266, %v2751_v13  ;;  %v2753_v19 = vshll.u32 %v2744_v46, %v2751_v13 }
 0x441   :  { %v2754_v33 = vshrl.u32 %v2736_v54, %v2752_v16  ;;  %v2757_v8 = vadd.s32 127, %v2756_v34 }
 0x443   :  { %v2755_v2 = vor.u32 %v2754_v33, %v2753_v19  ;;  %v2758_v17 = vshll.u32 %v2757_v8, 23 }
 0x445   :  { %v2759_v40 = vor.u32 4788187, %v2758_v17  ;;  %v2762_v63 = vcvt.s32.f32 %v2755_v2 }
 0x447   :  { %v2760_v61 = vand.u32 2147483647, %v2759_v40 }
 0x449   :  { %v2763_v35 = vmul.f32 %v2762_v63, %v2760_v61 }
 0x44b   :  { %v2764_v20 = vxor.u32 2147483648, %v2763_v35 }
 0x44d   :  { %v2765_v37 = vsel %vm2644_vm8, %v2764_v20, %v2763_v35 }
 0x44e   :  { %v2768_v50 = vsel %vm2643_vm9, %v4010_v23, %v2765_v37 }
 0x44f   :  { %v2770_v47 = vmul.f32 %v2768_v50, %v2768_v50 }
 0x451   :  { %v2771_v36 = vmul.f32 -0.001358992, %v2770_v47  ;;  %v2778_v58 = vmul.f32 -0.00019511016, %v2770_v47 }
 0x453   :  { %v2772_v28 = vadd.f32 0.041655596, %v2771_v36  ;;  %v2779_v26 = vadd.f32 0.008332121, %v2778_v58 }
 0x455   :  { %v2773_v18 = vmul.f32 %v2772_v28, %v2770_v47  ;;  %v2780_v7 = vmul.f32 %v2779_v26, %v2770_v47 }
 0x457   :  { %v2774_v38 = vadd.f32 -0.4999988, %v2773_v18  ;;  %v2781_v22 = vadd.f32 -0.16666654, %v2780_v7 }
 0x459   :  { %v2775_v49 = vmul.f32 %v2774_v38, %v2770_v47  ;;  %v2782_v21 = vmul.f32 %v2781_v22, %v2770_v47 }
 0x45b   :  { %v2776_v0 = vadd.f32 1.0, %v2775_v49  ;;  %v2783_v39 = vadd.f32 1.0, %v2782_v21 }
 0x45d   :  { %v2784_v48 = vmul.f32 %v2783_v39, %v2768_v50  ;;  %v2793_v4 = vxor.u32 2147483648, %v2776_v0 }
 0x45f   :  { %v2790_v11 = vxor.u32 2147483648, %v2784_v48  ;;  %v2794_v30 = vsel %vm2792_vm11, %v2793_v4, %v2784_v48 }
 0x461   :  { %v2791_v14 = vsel %vm2789_vm10, %v2776_v0, %v2790_v11 }
 0x462   :  { %v2795_v24 = vsel %vm2788_vm12, %v2791_v14, %v2794_v30 }
 0x463   :  { %v2796_v10 = vsel %vm2785_vm13, nan, %v2795_v24 }
 0x464   :  { %2830 = vmatmul.f32.vlgmr.msra.gmra.mxu2 %v2796_v10 }
 0x4e7   :  { %v2831_v45 = vpop.f32.mrf.mxu2 }
 0x4e8   :  { %v2832_v9 = vadd.f32 %v2831_v45, %v2813_v32 }
 0x4ea   :  { %2889 = vtanh.f32 %v2832_v9 }
 0x4f0   :  { %v2890_v3 = vpop.eup %2889 }
 0x4f1   :  { %2836 = vst.msk [vmem:[%s4149_s10] sm:$0x1] %vm2835_vm14, %v2890_v3 }
 0x4f2   :  { %2841 = vsyncpa [#allocation3], 1 }
 0x4f3   :  { %2842 = vsyncpa [#allocation5], 1 }
 0x4f4   :  { %2843 = vsyncpa [#allocation8], 1 }
 0x4f5   :  { %2844 = vsyncpa [#allocation11], 1 }
 0x4f6   :  { %2845 = vsyncpa [#allocation14], 1 }

</bundles_post_ra>
